<compile_context>
chip_gen: v6e
topology: v6e:2x2x1
jax: 0.10.0
libtpu: 0.0.40
codegen_flags: <defaults>
</compile_context>

<pallas_src>
from functools import partial

import jax
import jax.numpy as jnp
from jax.experimental import pallas as pl
from jax.experimental.pallas import tpu as pltpu

BN_EPS = 1e-5
EXPANSION = 4
LANE = 128                       # pad channel dims to the TPU lane width
DEFAULT_TILE_M = 512             # fits v7x's 64 MiB VMEM; can be raised on v5e/v6e
_VMEM_LIMIT = 48 * 1024 * 1024   # explicit scoped-VMEM budget (> 16/32 MiB defaults)


# ---------------------------------------------------------------------------
# small helpers
# ---------------------------------------------------------------------------
def _round_up(x, m):
    return ((x + m - 1) // m) * m


def _pad_to(a, targets):
    """Zero-pad each axis of `a` up to targets[axis] (None = leave unchanged)."""
    pads = []
    for ax, t in enumerate(targets):
        pads.append((0, 0) if t is None else (0, t - a.shape[ax]))
    if all(p == (0, 0) for p in pads):
        return a
    return jnp.pad(a, pads)


def _choose_tile_m(m, target=DEFAULT_TILE_M):
    if m <= target:
        return _round_up(m, 8)
    return target  # target is a multiple of 8


# ---------------------------------------------------------------------------
# Pallas kernels
# ---------------------------------------------------------------------------
def _matmul_stats_kernel(*refs, fuse_in_act, m_true, m_padded, tile_m):
    """y_tile = (relu(x*a + b) if fused else x) @ w; accumulate per-channel
    sum / sum-of-squares into a grid-resident (2, Cout) stats output."""
    if fuse_in_act:
        x_ref, a_ref, b_ref, w_ref, y_ref, stats_ref = refs
    else:
        x_ref, w_ref, y_ref, stats_ref = refs
    i = pl.program_id(0)
    x = x_ref[...]
    if fuse_in_act:
        xf = x.astype(jnp.float32) * a_ref[...] + b_ref[...]
        xf = jnp.maximum(xf, 0.0)
        if m_padded != m_true:
            # rows that are only M-padding must not pollute the batch stats
            row = jax.lax.broadcasted_iota(jnp.int32, xf.shape, 0) + i * tile_m
            xf = jnp.where(row < m_true, xf, 0.0)
        x = xf.astype(x_ref.dtype)
    y = jnp.dot(x, w_ref[...], preferred_element_type=jnp.float32)

    @pl.when(i == 0)
    def _init():
        stats_ref[...] = jnp.zeros_like(stats_ref)

    s_sum = jnp.sum(y, axis=0, keepdims=True)
    s_sq = jnp.sum(y * y, axis=0, keepdims=True)
    stats_ref[...] += jnp.concatenate([s_sum, s_sq], axis=0)
    y_ref[...] = y.astype(y_ref.dtype)


def _conv3x3_stats_kernel(*refs, tap_plan, ho, wo):
    """Per-image 3x3 conv via 3 accumulated (Ho*Wo, 3C)@(3C, Cout) matmuls
    (dx taps are pre-concatenated along channels; dy taps are contiguous row
    slices per tap_plan = ((plane_idx, row_offset), ...))."""
    n_planes = max(p for p, _ in tap_plan) + 1
    plane_refs = refs[:n_planes]
    w_ref = refs[n_planes]
    y_ref = refs[n_planes + 1]
    stats_ref = refs[n_planes + 2]
    cin3 = w_ref.shape[1]
    cout = w_ref.shape[2]

    acc = jnp.zeros((ho * wo, cout), jnp.float32)
    for dy, (p, off) in enumerate(tap_plan):            # static 3-way unroll
        rows = plane_refs[p][0, off:off + ho, :, :]     # (ho, wo, 3C) contiguous
        acc = acc + jnp.dot(rows.reshape(ho * wo, cin3), w_ref[dy],
                            preferred_element_type=jnp.float32)

    n = pl.program_id(0)

    @pl.when(n == 0)
    def _init():
        stats_ref[...] = jnp.zeros_like(stats_ref)

    s_sum = jnp.sum(acc, axis=0, keepdims=True)
    s_sq = jnp.sum(acc * acc, axis=0, keepdims=True)
    stats_ref[...] += jnp.concatenate([s_sum, s_sq], axis=0)
    y_ref[0] = acc.astype(y_ref.dtype)


def _scale_shift_kernel(y_ref, a_ref, b_ref, o_ref, *, relu):
    out = y_ref[...].astype(jnp.float32) * a_ref[...] + b_ref[...]
    if relu:
        out = jnp.maximum(out, 0.0)
    o_ref[...] = out.astype(o_ref.dtype)


def _scale_shift_add_kernel(y_ref, a_ref, b_ref, r_ref, ra_ref, rb_ref, o_ref):
    main = y_ref[...].astype(jnp.float32) * a_ref[...] + b_ref[...]
    res = r_ref[...].astype(jnp.float32) * ra_ref[...] + rb_ref[...]
    o_ref[...] = jnp.maximum(main + res, 0.0).astype(o_ref.dtype)


# ---------------------------------------------------------------------------
# pallas_call wrappers
# ---------------------------------------------------------------------------
def matmul_stats(x2d, w2d, *, m_true, tile_m, act_dtype,
                 in_scale=None, in_shift=None):
    m_padded, k = x2d.shape
    cout = w2d.shape[1]
    fuse = in_scale is not None
    kernel = partial(_matmul_stats_kernel, fuse_in_act=fuse, m_true=m_true,
                     m_padded=m_padded, tile_m=tile_m)
    in_specs = [pl.BlockSpec((tile_m, k), lambda i: (i, 0))]
    inputs = [x2d.astype(act_dtype)]
    if fuse:
        in_specs += [pl.BlockSpec((1, k), lambda i: (0, 0)),
                     pl.BlockSpec((1, k), lambda i: (0, 0))]
        inputs += [in_scale, in_shift]
    in_specs.append(pl.BlockSpec((k, cout), lambda i: (0, 0)))
    inputs.append(w2d.astype(act_dtype))
    itemsize = jnp.dtype(act_dtype).itemsize
    cost = pl.CostEstimate(
        flops=2 * m_padded * k * cout,
        transcendentals=0,
        bytes_accessed=(m_padded * k + k * cout + m_padded * cout) * itemsize)
    return pl.pallas_call(
        kernel,
        out_shape=(jax.ShapeDtypeStruct((m_padded, cout), act_dtype),
                   jax.ShapeDtypeStruct((2, cout), jnp.float32)),
        grid=(m_padded // tile_m,),
        in_specs=in_specs,
        out_specs=(pl.BlockSpec((tile_m, cout), lambda i: (i, 0)),
                   pl.BlockSpec((2, cout), lambda i: (0, 0))),
        compiler_params=pltpu.CompilerParams(
            dimension_semantics=("arbitrary",),   # stats accumulate across M tiles
            vmem_limit_bytes=_VMEM_LIMIT),
        cost_estimate=cost,
    )(*inputs)


def conv3x3_stats(act_nhwc, w_hwio, stride, act_dtype):
    """3x3 / pad=1 / stride conv on NHWC activations; returns raw (pre-BN) output
    flattened to (N*Ho*Wo, Cout) plus per-channel (sum, sumsq) stats."""
    n, h, w, cp = act_nhwc.shape
    cout = w_hwio.shape[-1]
    ho = (h - 1) // stride + 1
    wo = (w - 1) // stride + 1
    xp = jnp.pad(act_nhwc, ((0, 0), (1, 1), (1, 1), (0, 0))).astype(act_dtype)
    # 3 dx taps: shifted + W-strided in the wrapper, concatenated along channels
    slabs = [xp[:, :, dx:dx + (wo - 1) * stride + 1:stride, :] for dx in range(3)]
    xcat = jnp.concatenate(slabs, axis=-1)               # (N, H+2, Wo, 3*Cp)
    if stride == 1:
        plane_arrays = [xcat]
        tap_plan = ((0, 0), (0, 1), (0, 2))
    elif stride == 2:
        plane_arrays = [xcat[:, 0::2], xcat[:, 1::2]]    # even/odd input rows
        tap_plan = tuple((dy % 2, dy // 2) for dy in range(3))
    else:
        raise NotImplementedError("Bottleneck conv2 stride must be 1 or 2")
    w_r = w_hwio.reshape(3, 3 * cp, cout).astype(act_dtype)  # dy-major, dx within K

    kernel = partial(_conv3x3_stats_kernel, tap_plan=tap_plan, ho=ho, wo=wo)
    in_specs = [pl.BlockSpec((1,) + p.shape[1:], lambda i: (i, 0, 0, 0))
                for p in plane_arrays]
    in_specs.append(pl.BlockSpec(w_r.shape, lambda i: (0, 0, 0)))
    itemsize = jnp.dtype(act_dtype).itemsize
    cost = pl.CostEstimate(
        flops=2 * n * ho * wo * 9 * cp * cout,
        transcendentals=0,
        bytes_accessed=(xcat.size + 9 * cp * cout + n * ho * wo * cout) * itemsize)
    y, stats = pl.pallas_call(
        kernel,
        out_shape=(jax.ShapeDtypeStruct((n, ho * wo, cout), act_dtype),
                   jax.ShapeDtypeStruct((2, cout), jnp.float32)),
        grid=(n,),
        in_specs=in_specs,
        out_specs=(pl.BlockSpec((1, ho * wo, cout), lambda i: (i, 0, 0)),
                   pl.BlockSpec((2, cout), lambda i: (0, 0))),
        compiler_params=pltpu.CompilerParams(
            dimension_semantics=("arbitrary",),
            vmem_limit_bytes=_VMEM_LIMIT),
        cost_estimate=cost,
    )(*plane_arrays, w_r)
    return y.reshape(n * ho * wo, cout), stats


def scale_shift_act(y, scale, shift, *, tile_m, relu, out_dtype):
    m_padded, c = y.shape
    return pl.pallas_call(
        partial(_scale_shift_kernel, relu=relu),
        out_shape=jax.ShapeDtypeStruct((m_padded, c), out_dtype),
        grid=(m_padded // tile_m,),
        in_specs=[pl.BlockSpec((tile_m, c), lambda i: (i, 0)),
                  pl.BlockSpec((1, c), lambda i: (0, 0)),
                  pl.BlockSpec((1, c), lambda i: (0, 0))],
        out_specs=pl.BlockSpec((tile_m, c), lambda i: (i, 0)),
        compiler_params=pltpu.CompilerParams(
            dimension_semantics=("parallel",), vmem_limit_bytes=_VMEM_LIMIT),
    )(y, scale, shift)


def scale_shift_add_act(y, a, b, res, ra, rb, *, tile_m, out_dtype):
    m_padded, c = y.shape
    return pl.pallas_call(
        _scale_shift_add_kernel,
        out_shape=jax.ShapeDtypeStruct((m_padded, c), out_dtype),
        grid=(m_padded // tile_m,),
        in_specs=[pl.BlockSpec((tile_m, c), lambda i: (i, 0)),
                  pl.BlockSpec((1, c), lambda i: (0, 0)),
                  pl.BlockSpec((1, c), lambda i: (0, 0)),
                  pl.BlockSpec((tile_m, c), lambda i: (i, 0)),
                  pl.BlockSpec((1, c), lambda i: (0, 0)),
                  pl.BlockSpec((1, c), lambda i: (0, 0))],
        out_specs=pl.BlockSpec((tile_m, c), lambda i: (i, 0)),
        compiler_params=pltpu.CompilerParams(
            dimension_semantics=("parallel",), vmem_limit_bytes=_VMEM_LIMIT),
    )(y, a, b, res, ra, rb)


def _bn_scale_shift(stats, gamma, beta, count):
    """Fold (sum, sumsq) + gamma/beta into per-channel scale/shift (tiny XLA op)."""
    stats = stats.astype(jnp.float32)
    mean = stats[0] / count
    var = jnp.maximum(stats[1] / count - mean * mean, 0.0)  # biased var (training)
    inv = jax.lax.rsqrt(var + BN_EPS)
    scale = gamma.astype(jnp.float32) * inv
    shift = beta.astype(jnp.float32) - mean * scale
    return scale.reshape(1, -1), shift.reshape(1, -1)


# ---------------------------------------------------------------------------
# Bottleneck forward (wrapper = layout plumbing only)
# ---------------------------------------------------------------------------
def bottleneck_forward(x_nchw, params, stride, act_dtype=jnp.bfloat16,
                       tile_m=DEFAULT_TILE_M):
    N, Cin, H, W = x_nchw.shape
    planes = params["conv1_w"].shape[0]
    exp = EXPANSION * planes
    cin_p = _round_up(Cin, LANE)
    c1_p = _round_up(planes, LANE)
    c3_p = _round_up(exp, LANE)

    # NCHW -> NHWC once per block.
    # TODO(synk): in a full network keep activations NHWC (and channel-padded)
    #             across blocks so these transposes/pads amortize.
    x_nhwc = jnp.transpose(x_nchw, (0, 2, 3, 1))
    M1 = N * H * W
    tm1 = _choose_tile_m(M1, tile_m)
    x2d = _pad_to(x_nhwc.reshape(M1, Cin), (_round_up(M1, tm1), cin_p))
    x2d = x2d.astype(act_dtype)

    # ---- conv1 (1x1): raw matmul output + batch stats ------------------------
    w1 = _pad_to(params["conv1_w"].reshape(planes, Cin).T, (cin_p, c1_p))
    y1, st1 = matmul_stats(x2d, w1, m_true=M1, tile_m=tm1, act_dtype=act_dtype)
    a1, b1 = _bn_scale_shift(st1, _pad_to(params["bn1_gamma"], (c1_p,)),
                             _pad_to(params["bn1_beta"], (c1_p,)), M1)

    # ---- bn1 + relu (separate pass so conv2's zero spatial padding is exact) --
    act1 = scale_shift_act(y1, a1, b1, tile_m=tm1, relu=True, out_dtype=act_dtype)
    act1 = act1[:M1].reshape(N, H, W, c1_p)

    # ---- conv2 (3x3, stride, pad=1): in-kernel 3-tap accumulation ------------
    w2 = _pad_to(jnp.transpose(params["conv2_w"], (2, 3, 1, 0)),
                 (None, None, c1_p, c1_p))
    y2, st2 = conv3x3_stats(act1, w2, stride, act_dtype)
    Ho = (H - 1) // stride + 1
    Wo = (W - 1) // stride + 1
    M2 = N * Ho * Wo
    a2, b2 = _bn_scale_shift(st2, _pad_to(params["bn2_gamma"], (c1_p,)),
                             _pad_to(params["bn2_beta"], (c1_p,)), M2)

    tm2 = _choose_tile_m(M2, tile_m)
    mp2 = _round_up(M2, tm2)
    y2 = _pad_to(y2, (mp2, None))

    # ---- conv3 (1x1) with bn2+relu fused onto its input ----------------------
    w3 = _pad_to(params["conv3_w"].reshape(exp, planes).T, (c1_p, c3_p))
    y3, st3 = matmul_stats(y2, w3, m_true=M2, tile_m=tm2, act_dtype=act_dtype,
                           in_scale=a2, in_shift=b2)
    a3, b3 = _bn_scale_shift(st3, _pad_to(params["bn3_gamma"], (c3_p,)),
                             _pad_to(params["bn3_beta"], (c3_p,)), M2)

    # ---- shortcut -------------------------------------------------------------
    if "sc_conv_w" in params:
        # TODO(synk): the strided downsample is a wrapper-side XLA slice; folding
        #             it into the shortcut kernel's index_map would save a pass.
        xs = x_nhwc[:, ::stride, ::stride, :].reshape(M2, Cin)
        xs = _pad_to(xs, (mp2, cin_p)).astype(act_dtype)
        wsc = _pad_to(params["sc_conv_w"].reshape(exp, Cin).T, (cin_p, c3_p))
        res, stsc = matmul_stats(xs, wsc, m_true=M2, tile_m=tm2,
                                 act_dtype=act_dtype)
        ar, br = _bn_scale_shift(stsc, _pad_to(params["sc_bn_gamma"], (c3_p,)),
                                 _pad_to(params["sc_bn_beta"], (c3_p,)), M2)
    else:
        res = x2d                                   # identity: raw input, no BN
        ar = jnp.ones((1, c3_p), jnp.float32)
        br = jnp.zeros((1, c3_p), jnp.float32)

    # ---- bn3 + bn(shortcut) + residual add + relu, all fused ------------------
    out = scale_shift_add_act(y3, a3, b3, res, ar, br, tile_m=tm2,
                              out_dtype=act_dtype)
    out = out[:M2, :exp].reshape(N, Ho, Wo, exp)
    return jnp.transpose(out, (0, 3, 1, 2)).astype(jnp.float32)


# ---------------------------------------------------------------------------
# params + pure-JAX f32 reference (correctness check only)
# ---------------------------------------------------------------------------
def init_bottleneck_params(key, in_planes, planes, stride):
    keys = jax.random.split(key, 12)

    def conv_w(k, cout, cin, kh, kw):
        fan_in = cin * kh * kw
        bound = 1.0 / (fan_in ** 0.5)
        return jax.random.uniform(k, (cout, cin, kh, kw), jnp.float32, -bound, bound)

    def bn_p(kg, kb, c):
        return (1.0 + 0.1 * jax.random.normal(kg, (c,), jnp.float32),
                0.1 * jax.random.normal(kb, (c,), jnp.float32))

    exp = EXPANSION * planes
    g1, b1 = bn_p(keys[3], keys[4], planes)
    g2, b2 = bn_p(keys[5], keys[6], planes)
    g3, b3 = bn_p(keys[7], keys[8], exp)
    params = {
        "conv1_w": conv_w(keys[0], planes, in_planes, 1, 1),
        "bn1_gamma": g1, "bn1_beta": b1,
        "conv2_w": conv_w(keys[1], planes, planes, 3, 3),
        "bn2_gamma": g2, "bn2_beta": b2,
        "conv3_w": conv_w(keys[2], exp, planes, 1, 1),
        "bn3_gamma": g3, "bn3_beta": b3,
    }
    if stride != 1 or in_planes != exp:
        gs, bs = bn_p(keys[10], keys[11], exp)
        params["sc_conv_w"] = conv_w(keys[9], exp, in_planes, 1, 1)
        params["sc_bn_gamma"] = gs
        params["sc_bn_beta"] = bs
    return params


def ref_forward(x, params, stride):
    def conv(x, w, s=1, pad=0):
        return jax.lax.conv_general_dilated(
            x, w, (s, s), [(pad, pad), (pad, pad)],
            dimension_numbers=("NCHW", "OIHW", "NCHW"),
            precision=jax.lax.Precision.HIGHEST)

    def bn(y, g, b):
        mean = jnp.mean(y, axis=(0, 2, 3), keepdims=True)
        var = jnp.mean((y - mean) ** 2, axis=(0, 2, 3), keepdims=True)
        return ((y - mean) * jax.lax.rsqrt(var + BN_EPS)
                * g.reshape(1, -1, 1, 1) + b.reshape(1, -1, 1, 1))

    out = jax.nn.relu(bn(conv(x, params["conv1_w"]),
                         params["bn1_gamma"], params["bn1_beta"]))
    out = jax.nn.relu(bn(conv(out, params["conv2_w"], s=stride, pad=1),
                         params["bn2_gamma"], params["bn2_beta"]))
    out = bn(conv(out, params["conv3_w"]), params["bn3_gamma"], params["bn3_beta"])
    if "sc_conv_w" in params:
        sc = bn(conv(x, params["sc_conv_w"], s=stride),
                params["sc_bn_gamma"], params["sc_bn_beta"])
    else:
        sc = x
    return jax.nn.relu(out + sc)


if __name__ == "__main__":
    key = jax.random.PRNGKey(0)
    kx, kp, kx2, kp2 = jax.random.split(key, 4)

    # --- Config A: projection shortcut, stride 2, bf16 matmul path ------------
    in_planes, planes, stride = 16, 8, 2
    x = jax.random.normal(kx, (2, in_planes, 16, 16), jnp.float32)
    params = init_bottleneck_params(kp, in_planes, planes, stride)
    ref = ref_forward(x, params, stride)

    out_bf16 = jax.block_until_ready(
        jax.jit(partial(bottleneck_forward, stride=stride,
                        act_dtype=jnp.bfloat16))(x, params))
    assert out_bf16.shape == ref.shape == (2, EXPANSION * planes, 8, 8), out_bf16.shape
    err_bf16 = float(jnp.max(jnp.abs(out_bf16 - ref)))
    assert err_bf16 < 4e-1, f"bf16 path max abs err {err_bf16}"

    # --- Config B: identity shortcut, stride 1, f32 path ----------------------
    in_planes2, planes2, stride2 = 32, 8, 1
    x2 = jax.random.normal(kx2, (2, in_planes2, 16, 16), jnp.float32)
    params2 = init_bottleneck_params(kp2, in_planes2, planes2, stride2)
    ref2 = ref_forward(x2, params2, stride2)
    out2 = jax.block_until_ready(
        jax.jit(partial(bottleneck_forward, stride=stride2,
                        act_dtype=jnp.float32))(x2, params2))
    assert out2.shape == ref2.shape == (2, EXPANSION * planes2, 16, 16), out2.shape
    err2 = float(jnp.max(jnp.abs(out2 - ref2)))
    assert err2 < 1e-1, f"identity-shortcut f32 path max abs err {err2}"

    print("KERNEL_OK")
</pallas_src>

<mosaic_0001>
module attributes {stable_mosaic.version = 11 : i64} {
  func.func @_matmul_stats_kernel(%arg0: i32, %arg1: memref<128x128xbf16, #tpu.memory_space<vmem>>, %arg2: memref<128x128xbf16, #tpu.memory_space<vmem>>, %arg3: memref<128x128xbf16, #tpu.memory_space<vmem>>, %arg4: memref<2x128xf32, #tpu.memory_space<vmem>>) attributes {dimension_semantics = [#tpu.dimension_semantics<arbitrary>], iteration_bounds = array<i64: 1>, scalar_prefetch = 0 : i64, scratch_operands = 0 : i64, tpu.core_type = #tpu.core_type<tc>, window_params = [{transform_indices = @transform_0, window_bounds = array<i64: 128, 128>}, {pipeline_mode = #tpu.pipeline_mode<synchronous>, transform_indices = @transform_1, window_bounds = array<i64: 128, 128>}, {transform_indices = @transform_2, window_bounds = array<i64: 128, 128>}, {pipeline_mode = #tpu.pipeline_mode<synchronous>, transform_indices = @transform_3, window_bounds = array<i64: 2, 128>}]} {
    %c0 = arith.constant 0 : index
    %c0_0 = arith.constant 0 : index
    %0 = vector.load %arg1[%c0, %c0_0] : memref<128x128xbf16, #tpu.memory_space<vmem>>, vector<128x128xbf16>
    %c0_1 = arith.constant 0 : index
    %c0_2 = arith.constant 0 : index
    %1 = vector.load %arg2[%c0_1, %c0_2] : memref<128x128xbf16, #tpu.memory_space<vmem>>, vector<128x128xbf16>
    %cst = arith.constant dense<0.000000e+00> : vector<128x128xf32>
    %2 = tpu.matmul %0, %1, %cst {dimension_numbers = #tpu.dot_dimension_numbers<[1], [0], [0], [1], [0, 0, 1, 1], [], []>} : vector<128x128xbf16>, vector<128x128xbf16>, vector<128x128xf32> -> vector<128x128xf32>
    %c0_i32 = arith.constant 0 : i32
    %3 = arith.cmpi eq, %arg0, %c0_i32 : i32
    %4 = arith.extui %3 : i1 to i32
    %c0_i32_3 = arith.constant 0 : i32
    %5 = arith.cmpi ne, %4, %c0_i32_3 : i32
    scf.if %5 {
      %cst_12 = arith.constant 0.000000e+00 : f32
      %17 = vector.broadcast %cst_12 : f32 to vector<2x128xf32>
      %c0_13 = arith.constant 0 : index
      %c0_14 = arith.constant 0 : index
      %18 = vector.load %arg4[%c0_13, %c0_14] : memref<2x128xf32, #tpu.memory_space<vmem>>, vector<2x128xf32>
      tpu.vector_store %arg4[%c0_13, %c0_14], %17 {strides = array<i32>} : memref<2x128xf32, #tpu.memory_space<vmem>>, vector<2x128xf32>,
    } else {
    }
    %cst_4 = arith.constant dense<0.000000e+00> : vector<128xf32>
    %6 = vector.multi_reduction <add>, %2, %cst_4 [0] : vector<128x128xf32> to vector<128xf32>
    %7 = vector.shape_cast %6 : vector<128xf32> to vector<1x128xf32>
    %8 = arith.mulf %2, %2 : vector<128x128xf32>
    %cst_5 = arith.constant dense<0.000000e+00> : vector<128xf32>
    %9 = vector.multi_reduction <add>, %8, %cst_5 [0] : vector<128x128xf32> to vector<128xf32>
    %10 = vector.shape_cast %9 : vector<128xf32> to vector<1x128xf32>
    %c0_6 = arith.constant 0 : index
    %c0_7 = arith.constant 0 : index
    %11 = vector.load %arg4[%c0_6, %c0_7] : memref<2x128xf32, #tpu.memory_space<vmem>>, vector<2x128xf32>
    %12 = tpu.concatenate %7, %10 in 0 : vector<1x128xf32>, vector<1x128xf32> -> vector<2x128xf32>
    %13 = arith.addf %11, %12 : vector<2x128xf32>
    %c0_8 = arith.constant 0 : index
    %c0_9 = arith.constant 0 : index
    %14 = vector.load %arg4[%c0_8, %c0_9] : memref<2x128xf32, #tpu.memory_space<vmem>>, vector<2x128xf32>
    tpu.vector_store %arg4[%c0_8, %c0_9], %13 {strides = array<i32>} : memref<2x128xf32, #tpu.memory_space<vmem>>, vector<2x128xf32>,
    %15 = arith.truncf %2 : vector<128x128xf32> to vector<128x128xbf16>
    %c0_10 = arith.constant 0 : index
    %c0_11 = arith.constant 0 : index
    %16 = vector.load %arg3[%c0_10, %c0_11] : memref<128x128xbf16, #tpu.memory_space<vmem>>, vector<128x128xbf16>
    tpu.vector_store %arg3[%c0_10, %c0_11], %15 {strides = array<i32>} : memref<128x128xbf16, #tpu.memory_space<vmem>>, vector<128x128xbf16>,
    return
  }
  func.func @transform_0(%arg0: i32) -> (i32, i32) {
    %c0_i32 = arith.constant 0 : i32
    %c0_i32_0 = arith.constant 0 : i32
    return %arg0, %c0_i32 : i32, i32
  }
  func.func @transform_1(%arg0: i32) -> (i32, i32) {
    %c0_i32 = arith.constant 0 : i32
    %c0_i32_0 = arith.constant 0 : i32
    %c0_i32_1 = arith.constant 0 : i32
    return %c0_i32, %c0_i32_0 : i32, i32
  }
  func.func @transform_2(%arg0: i32) -> (i32, i32) {
    %c0_i32 = arith.constant 0 : i32
    %c0_i32_0 = arith.constant 0 : i32
    return %arg0, %c0_i32 : i32, i32
  }
  func.func @transform_3(%arg0: i32) -> (i32, i32) {
    %c0_i32 = arith.constant 0 : i32
    %c0_i32_0 = arith.constant 0 : i32
    %c0_i32_1 = arith.constant 0 : i32
    return %c0_i32, %c0_i32_0 : i32, i32
  }
}

module attributes {stable_mosaic.version = 11 : i64} {
  func.func @_matmul_stats_kernel(%arg0: i32, %arg1: memref<512x128xbf16, #tpu.memory_space<vmem>>, %arg2: memref<128x128xbf16, #tpu.memory_space<vmem>>, %arg3: memref<512x128xbf16, #tpu.memory_space<vmem>>, %arg4: memref<2x128xf32, #tpu.memory_space<vmem>>) attributes {dimension_semantics = [#tpu.dimension_semantics<arbitrary>], iteration_bounds = array<i64: 1>, scalar_prefetch = 0 : i64, scratch_operands = 0 : i64, tpu.core_type = #tpu.core_type<tc>, window_params = [{transform_indices = @transform_0, window_bounds = array<i64: 512, 128>}, {pipeline_mode = #tpu.pipeline_mode<synchronous>, transform_indices = @transform_1, window_bounds = array<i64: 128, 128>}, {transform_indices = @transform_2, window_bounds = array<i64: 512, 128>}, {pipeline_mode = #tpu.pipeline_mode<synchronous>, transform_indices = @transform_3, window_bounds = array<i64: 2, 128>}]} {
    %c0 = arith.constant 0 : index
    %c0_0 = arith.constant 0 : index
    %0 = vector.load %arg1[%c0, %c0_0] : memref<512x128xbf16, #tpu.memory_space<vmem>>, vector<512x128xbf16>
    %c0_1 = arith.constant 0 : index
    %c0_2 = arith.constant 0 : index
    %1 = vector.load %arg2[%c0_1, %c0_2] : memref<128x128xbf16, #tpu.memory_space<vmem>>, vector<128x128xbf16>
    %cst = arith.constant dense<0.000000e+00> : vector<512x128xf32>
    %2 = tpu.matmul %0, %1, %cst {dimension_numbers = #tpu.dot_dimension_numbers<[1], [0], [0], [1], [0, 0, 1, 1], [], []>} : vector<512x128xbf16>, vector<128x128xbf16>, vector<512x128xf32> -> vector<512x128xf32>
    %c0_i32 = arith.constant 0 : i32
    %3 = arith.cmpi eq, %arg0, %c0_i32 : i32
    %4 = arith.extui %3 : i1 to i32
    %c0_i32_3 = arith.constant 0 : i32
    %5 = arith.cmpi ne, %4, %c0_i32_3 : i32
    scf.if %5 {
      %cst_12 = arith.constant 0.000000e+00 : f32
      %17 = vector.broadcast %cst_12 : f32 to vector<2x128xf32>
      %c0_13 = arith.constant 0 : index
      %c0_14 = arith.constant 0 : index
      %18 = vector.load %arg4[%c0_13, %c0_14] : memref<2x128xf32, #tpu.memory_space<vmem>>, vector<2x128xf32>
      tpu.vector_store %arg4[%c0_13, %c0_14], %17 {strides = array<i32>} : memref<2x128xf32, #tpu.memory_space<vmem>>, vector<2x128xf32>,
    } else {
    }
    %cst_4 = arith.constant dense<0.000000e+00> : vector<128xf32>
    %6 = vector.multi_reduction <add>, %2, %cst_4 [0] : vector<512x128xf32> to vector<128xf32>
    %7 = vector.shape_cast %6 : vector<128xf32> to vector<1x128xf32>
    %8 = arith.mulf %2, %2 : vector<512x128xf32>
    %cst_5 = arith.constant dense<0.000000e+00> : vector<128xf32>
    %9 = vector.multi_reduction <add>, %8, %cst_5 [0] : vector<512x128xf32> to vector<128xf32>
    %10 = vector.shape_cast %9 : vector<128xf32> to vector<1x128xf32>
    %c0_6 = arith.constant 0 : index
    %c0_7 = arith.constant 0 : index
    %11 = vector.load %arg4[%c0_6, %c0_7] : memref<2x128xf32, #tpu.memory_space<vmem>>, vector<2x128xf32>
    %12 = tpu.concatenate %7, %10 in 0 : vector<1x128xf32>, vector<1x128xf32> -> vector<2x128xf32>
    %13 = arith.addf %11, %12 : vector<2x128xf32>
    %c0_8 = arith.constant 0 : index
    %c0_9 = arith.constant 0 : index
    %14 = vector.load %arg4[%c0_8, %c0_9] : memref<2x128xf32, #tpu.memory_space<vmem>>, vector<2x128xf32>
    tpu.vector_store %arg4[%c0_8, %c0_9], %13 {strides = array<i32>} : memref<2x128xf32, #tpu.memory_space<vmem>>, vector<2x128xf32>,
    %15 = arith.truncf %2 : vector<512x128xf32> to vector<512x128xbf16>
    %c0_10 = arith.constant 0 : index
    %c0_11 = arith.constant 0 : index
    %16 = vector.load %arg3[%c0_10, %c0_11] : memref<512x128xbf16, #tpu.memory_space<vmem>>, vector<512x128xbf16>
    tpu.vector_store %arg3[%c0_10, %c0_11], %15 {strides = array<i32>} : memref<512x128xbf16, #tpu.memory_space<vmem>>, vector<512x128xbf16>,
    return
  }
  func.func @transform_0(%arg0: i32) -> (i32, i32) {
    %c0_i32 = arith.constant 0 : i32
    %c0_i32_0 = arith.constant 0 : i32
    return %arg0, %c0_i32 : i32, i32
  }
  func.func @transform_1(%arg0: i32) -> (i32, i32) {
    %c0_i32 = arith.constant 0 : i32
    %c0_i32_0 = arith.constant 0 : i32
    %c0_i32_1 = arith.constant 0 : i32
    return %c0_i32, %c0_i32_0 : i32, i32
  }
  func.func @transform_2(%arg0: i32) -> (i32, i32) {
    %c0_i32 = arith.constant 0 : i32
    %c0_i32_0 = arith.constant 0 : i32
    return %arg0, %c0_i32 : i32, i32
  }
  func.func @transform_3(%arg0: i32) -> (i32, i32) {
    %c0_i32 = arith.constant 0 : i32
    %c0_i32_0 = arith.constant 0 : i32
    %c0_i32_1 = arith.constant 0 : i32
    return %c0_i32, %c0_i32_0 : i32, i32
  }
}

module attributes {stable_mosaic.version = 11 : i64} {
  func.func @_scale_shift_kernel(%arg0: i32, %arg1: memref<512x128xbf16, #tpu.memory_space<vmem>>, %arg2: memref<1x128xf32, #tpu.memory_space<vmem>>, %arg3: memref<1x128xf32, #tpu.memory_space<vmem>>, %arg4: memref<512x128xbf16, #tpu.memory_space<vmem>>) attributes {dimension_semantics = [#tpu.dimension_semantics<parallel>], iteration_bounds = array<i64: 1>, scalar_prefetch = 0 : i64, scratch_operands = 0 : i64, tpu.core_type = #tpu.core_type<tc>, window_params = [{transform_indices = @transform_0, window_bounds = array<i64: 512, 128>}, {pipeline_mode = #tpu.pipeline_mode<synchronous>, transform_indices = @transform_1, window_bounds = array<i64: 1, 128>}, {pipeline_mode = #tpu.pipeline_mode<synchronous>, transform_indices = @transform_2, window_bounds = array<i64: 1, 128>}, {transform_indices = @transform_3, window_bounds = array<i64: 512, 128>}]} {
    %c0 = arith.constant 0 : index
    %c0_0 = arith.constant 0 : index
    %0 = vector.load %arg1[%c0, %c0_0] : memref<512x128xbf16, #tpu.memory_space<vmem>>, vector<512x128xbf16>
    %1 = arith.extf %0 : vector<512x128xbf16> to vector<512x128xf32>
    %c0_1 = arith.constant 0 : index
    %c0_2 = arith.constant 0 : index
    %2 = vector.load %arg2[%c0_1, %c0_2] : memref<1x128xf32, #tpu.memory_space<vmem>>, vector<1x128xf32>
    %3 = vector.broadcast %2 : vector<1x128xf32> to vector<512x128xf32>
    %4 = arith.mulf %1, %3 : vector<512x128xf32>
    %c0_3 = arith.constant 0 : index
    %c0_4 = arith.constant 0 : index
    %5 = vector.load %arg3[%c0_3, %c0_4] : memref<1x128xf32, #tpu.memory_space<vmem>>, vector<1x128xf32>
    %6 = vector.broadcast %5 : vector<1x128xf32> to vector<512x128xf32>
    %7 = arith.addf %4, %6 : vector<512x128xf32>
    %cst = arith.constant 0.000000e+00 : f32
    %8 = vector.broadcast %cst : f32 to vector<512x128xf32>
    %9 = arith.maximumf %7, %8 : vector<512x128xf32>
    %10 = arith.truncf %9 : vector<512x128xf32> to vector<512x128xbf16>
    %c0_5 = arith.constant 0 : index
    %c0_6 = arith.constant 0 : index
    %11 = vector.load %arg4[%c0_5, %c0_6] : memref<512x128xbf16, #tpu.memory_space<vmem>>, vector<512x128xbf16>
    tpu.vector_store %arg4[%c0_5, %c0_6], %10 {strides = array<i32>} : memref<512x128xbf16, #tpu.memory_space<vmem>>, vector<512x128xbf16>,
    return
  }
  func.func @transform_0(%arg0: i32) -> (i32, i32) {
    %c0_i32 = arith.constant 0 : i32
    %c0_i32_0 = arith.constant 0 : i32
    return %arg0, %c0_i32 : i32, i32
  }
  func.func @transform_1(%arg0: i32) -> (i32, i32) {
    %c0_i32 = arith.constant 0 : i32
    %c0_i32_0 = arith.constant 0 : i32
    %c0_i32_1 = arith.constant 0 : i32
    return %c0_i32, %c0_i32_0 : i32, i32
  }
  func.func @transform_2(%arg0: i32) -> (i32, i32) {
    %c0_i32 = arith.constant 0 : i32
    %c0_i32_0 = arith.constant 0 : i32
    %c0_i32_1 = arith.constant 0 : i32
    return %c0_i32, %c0_i32_0 : i32, i32
  }
  func.func @transform_3(%arg0: i32) -> (i32, i32) {
    %c0_i32 = arith.constant 0 : i32
    %c0_i32_0 = arith.constant 0 : i32
    return %arg0, %c0_i32 : i32, i32
  }
}

module attributes {stable_mosaic.version = 11 : i64} {
  func.func @_scale_shift_add_kernel(%arg0: i32, %arg1: memref<128x128xbf16, #tpu.memory_space<vmem>>, %arg2: memref<1x128xf32, #tpu.memory_space<vmem>>, %arg3: memref<1x128xf32, #tpu.memory_space<vmem>>, %arg4: memref<128x128xbf16, #tpu.memory_space<vmem>>, %arg5: memref<1x128xf32, #tpu.memory_space<vmem>>, %arg6: memref<1x128xf32, #tpu.memory_space<vmem>>, %arg7: memref<128x128xbf16, #tpu.memory_space<vmem>>) attributes {dimension_semantics = [#tpu.dimension_semantics<parallel>], iteration_bounds = array<i64: 1>, scalar_prefetch = 0 : i64, scratch_operands = 0 : i64, tpu.core_type = #tpu.core_type<tc>, window_params = [{transform_indices = @transform_0, window_bounds = array<i64: 128, 128>}, {pipeline_mode = #tpu.pipeline_mode<synchronous>, transform_indices = @transform_1, window_bounds = array<i64: 1, 128>}, {pipeline_mode = #tpu.pipeline_mode<synchronous>, transform_indices = @transform_2, window_bounds = array<i64: 1, 128>}, {transform_indices = @transform_3, window_bounds = array<i64: 128, 128>}, {pipeline_mode = #tpu.pipeline_mode<synchronous>, transform_indices = @transform_4, window_bounds = array<i64: 1, 128>}, {pipeline_mode = #tpu.pipeline_mode<synchronous>, transform_indices = @transform_5, window_bounds = array<i64: 1, 128>}, {transform_indices = @transform_6, window_bounds = array<i64: 128, 128>}]} {
    %c0 = arith.constant 0 : index
    %c0_0 = arith.constant 0 : index
    %0 = vector.load %arg1[%c0, %c0_0] : memref<128x128xbf16, #tpu.memory_space<vmem>>, vector<128x128xbf16>
    %1 = arith.extf %0 : vector<128x128xbf16> to vector<128x128xf32>
    %c0_1 = arith.constant 0 : index
    %c0_2 = arith.constant 0 : index
    %2 = vector.load %arg2[%c0_1, %c0_2] : memref<1x128xf32, #tpu.memory_space<vmem>>, vector<1x128xf32>
    %3 = vector.broadcast %2 : vector<1x128xf32> to vector<128x128xf32>
    %4 = arith.mulf %1, %3 : vector<128x128xf32>
    %c0_3 = arith.constant 0 : index
    %c0_4 = arith.constant 0 : index
    %5 = vector.load %arg3[%c0_3, %c0_4] : memref<1x128xf32, #tpu.memory_space<vmem>>, vector<1x128xf32>
    %6 = vector.broadcast %5 : vector<1x128xf32> to vector<128x128xf32>
    %7 = arith.addf %4, %6 : vector<128x128xf32>
    %c0_5 = arith.constant 0 : index
    %c0_6 = arith.constant 0 : index
    %8 = vector.load %arg4[%c0_5, %c0_6] : memref<128x128xbf16, #tpu.memory_space<vmem>>, vector<128x128xbf16>
    %9 = arith.extf %8 : vector<128x128xbf16> to vector<128x128xf32>
    %c0_7 = arith.constant 0 : index
    %c0_8 = arith.constant 0 : index
    %10 = vector.load %arg5[%c0_7, %c0_8] : memref<1x128xf32, #tpu.memory_space<vmem>>, vector<1x128xf32>
    %11 = vector.broadcast %10 : vector<1x128xf32> to vector<128x128xf32>
    %12 = arith.mulf %9, %11 : vector<128x128xf32>
    %c0_9 = arith.constant 0 : index
    %c0_10 = arith.constant 0 : index
    %13 = vector.load %arg6[%c0_9, %c0_10] : memref<1x128xf32, #tpu.memory_space<vmem>>, vector<1x128xf32>
    %14 = vector.broadcast %13 : vector<1x128xf32> to vector<128x128xf32>
    %15 = arith.addf %12, %14 : vector<128x128xf32>
    %16 = arith.addf %7, %15 : vector<128x128xf32>
    %cst = arith.constant 0.000000e+00 : f32
    %17 = vector.broadcast %cst : f32 to vector<128x128xf32>
    %18 = arith.maximumf %16, %17 : vector<128x128xf32>
    %19 = arith.truncf %18 : vector<128x128xf32> to vector<128x128xbf16>
    %c0_11 = arith.constant 0 : index
    %c0_12 = arith.constant 0 : index
    %20 = vector.load %arg7[%c0_11, %c0_12] : memref<128x128xbf16, #tpu.memory_space<vmem>>, vector<128x128xbf16>
    tpu.vector_store %arg7[%c0_11, %c0_12], %19 {strides = array<i32>} : memref<128x128xbf16, #tpu.memory_space<vmem>>, vector<128x128xbf16>,
    return
  }
  func.func @transform_0(%arg0: i32) -> (i32, i32) {
    %c0_i32 = arith.constant 0 : i32
    %c0_i32_0 = arith.constant 0 : i32
    return %arg0, %c0_i32 : i32, i32
  }
  func.func @transform_1(%arg0: i32) -> (i32, i32) {
    %c0_i32 = arith.constant 0 : i32
    %c0_i32_0 = arith.constant 0 : i32
    %c0_i32_1 = arith.constant 0 : i32
    return %c0_i32, %c0_i32_0 : i32, i32
  }
  func.func @transform_2(%arg0: i32) -> (i32, i32) {
    %c0_i32 = arith.constant 0 : i32
    %c0_i32_0 = arith.constant 0 : i32
    %c0_i32_1 = arith.constant 0 : i32
    return %c0_i32, %c0_i32_0 : i32, i32
  }
  func.func @transform_3(%arg0: i32) -> (i32, i32) {
    %c0_i32 = arith.constant 0 : i32
    %c0_i32_0 = arith.constant 0 : i32
    return %arg0, %c0_i32 : i32, i32
  }
  func.func @transform_4(%arg0: i32) -> (i32, i32) {
    %c0_i32 = arith.constant 0 : i32
    %c0_i32_0 = arith.constant 0 : i32
    %c0_i32_1 = arith.constant 0 : i32
    return %c0_i32, %c0_i32_0 : i32, i32
  }
  func.func @transform_5(%arg0: i32) -> (i32, i32) {
    %c0_i32 = arith.constant 0 : i32
    %c0_i32_0 = arith.constant 0 : i32
    %c0_i32_1 = arith.constant 0 : i32
    return %c0_i32, %c0_i32_0 : i32, i32
  }
  func.func @transform_6(%arg0: i32) -> (i32, i32) {
    %c0_i32 = arith.constant 0 : i32
    %c0_i32_0 = arith.constant 0 : i32
    return %arg0, %c0_i32 : i32, i32
  }
}

module attributes {stable_mosaic.version = 11 : i64} {
  func.func @_conv3x3_stats_kernel(%arg0: i32, %arg1: memref<1x9x8x384xbf16, #tpu.memory_space<vmem>>, %arg2: memref<1x9x8x384xbf16, #tpu.memory_space<vmem>>, %arg3: memref<3x384x128xbf16, #tpu.memory_space<vmem>>, %arg4: memref<1x64x128xbf16, #tpu.memory_space<vmem>>, %arg5: memref<2x128xf32, #tpu.memory_space<vmem>>) attributes {dimension_semantics = [#tpu.dimension_semantics<arbitrary>], iteration_bounds = array<i64: 2>, scalar_prefetch = 0 : i64, scratch_operands = 0 : i64, tpu.core_type = #tpu.core_type<tc>, window_params = [{transform_indices = @transform_0, window_bounds = array<i64: 1, 9, 8, 384>}, {transform_indices = @transform_1, window_bounds = array<i64: 1, 9, 8, 384>}, {pipeline_mode = #tpu.pipeline_mode<synchronous>, transform_indices = @transform_2, window_bounds = array<i64: 3, 384, 128>}, {transform_indices = @transform_3, window_bounds = array<i64: 1, 64, 128>}, {pipeline_mode = #tpu.pipeline_mode<synchronous>, transform_indices = @transform_4, window_bounds = array<i64: 2, 128>}]} {
    %cst = arith.constant 0.000000e+00 : f32
    %0 = vector.broadcast %cst : f32 to vector<64x128xf32>
    %c0 = arith.constant 0 : index
    %c0_0 = arith.constant 0 : index
    %c0_1 = arith.constant 0 : index
    %c0_2 = arith.constant 0 : index
    %1 = vector.load %arg1[%c0, %c0_0, %c0_1, %c0_2] : memref<1x9x8x384xbf16, #tpu.memory_space<vmem>>, vector<1x8x8x384xbf16>
    %2 = vector.shape_cast %1 : vector<1x8x8x384xbf16> to vector<8x8x384xbf16>
    %3 = vector.shape_cast %2 : vector<8x8x384xbf16> to vector<64x384xbf16>
    %c0_3 = arith.constant 0 : index
    %c0_4 = arith.constant 0 : index
    %c0_5 = arith.constant 0 : index
    %4 = vector.load %arg3[%c0_3, %c0_4, %c0_5] : memref<3x384x128xbf16, #tpu.memory_space<vmem>>, vector<1x384x128xbf16>
    %5 = vector.shape_cast %4 : vector<1x384x128xbf16> to vector<384x128xbf16>
    %cst_6 = arith.constant dense<0.000000e+00> : vector<64x128xf32>
    %6 = tpu.matmul %3, %5, %cst_6 {dimension_numbers = #tpu.dot_dimension_numbers<[1], [0], [0], [1], [0, 0, 1, 1], [], []>} : vector<64x384xbf16>, vector<384x128xbf16>, vector<64x128xf32> -> vector<64x128xf32>
    %7 = arith.addf %0, %6 : vector<64x128xf32>
    %c0_7 = arith.constant 0 : index
    %c0_8 = arith.constant 0 : index
    %c0_9 = arith.constant 0 : index
    %c0_10 = arith.constant 0 : index
    %8 = vector.load %arg2[%c0_7, %c0_8, %c0_9, %c0_10] : memref<1x9x8x384xbf16, #tpu.memory_space<vmem>>, vector<1x8x8x384xbf16>
    %9 = vector.shape_cast %8 : vector<1x8x8x384xbf16> to vector<8x8x384xbf16>
    %10 = vector.shape_cast %9 : vector<8x8x384xbf16> to vector<64x384xbf16>
    %c1 = arith.constant 1 : index
    %c0_11 = arith.constant 0 : index
    %c0_12 = arith.constant 0 : index
    %11 = vector.load %arg3[%c1, %c0_11, %c0_12] : memref<3x384x128xbf16, #tpu.memory_space<vmem>>, vector<1x384x128xbf16>
    %12 = vector.shape_cast %11 : vector<1x384x128xbf16> to vector<384x128xbf16>
    %cst_13 = arith.constant dense<0.000000e+00> : vector<64x128xf32>
    %13 = tpu.matmul %10, %12, %cst_13 {dimension_numbers = #tpu.dot_dimension_numbers<[1], [0], [0], [1], [0, 0, 1, 1], [], []>} : vector<64x384xbf16>, vector<384x128xbf16>, vector<64x128xf32> -> vector<64x128xf32>
    %14 = arith.addf %7, %13 : vector<64x128xf32>
    %c0_14 = arith.constant 0 : index
    %c1_15 = arith.constant 1 : index
    %c0_16 = arith.constant 0 : index
    %c0_17 = arith.constant 0 : index
    %15 = vector.load %arg1[%c0_14, %c1_15, %c0_16, %c0_17] : memref<1x9x8x384xbf16, #tpu.memory_space<vmem>>, vector<1x8x8x384xbf16>
    %16 = vector.shape_cast %15 : vector<1x8x8x384xbf16> to vector<8x8x384xbf16>
    %17 = vector.shape_cast %16 : vector<8x8x384xbf16> to vector<64x384xbf16>
    %c2 = arith.constant 2 : index
    %c0_18 = arith.constant 0 : index
    %c0_19 = arith.constant 0 : index
    %18 = vector.load %arg3[%c2, %c0_18, %c0_19] : memref<3x384x128xbf16, #tpu.memory_space<vmem>>, vector<1x384x128xbf16>
    %19 = vector.shape_cast %18 : vector<1x384x128xbf16> to vector<384x128xbf16>
    %cst_20 = arith.constant dense<0.000000e+00> : vector<64x128xf32>
    %20 = tpu.matmul %17, %19, %cst_20 {dimension_numbers = #tpu.dot_dimension_numbers<[1], [0], [0], [1], [0, 0, 1, 1], [], []>} : vector<64x384xbf16>, vector<384x128xbf16>, vector<64x128xf32> -> vector<64x128xf32>
    %21 = arith.addf %14, %20 : vector<64x128xf32>
    %c0_i32 = arith.constant 0 : i32
    %22 = arith.cmpi eq, %arg0, %c0_i32 : i32
    %23 = arith.extui %22 : i1 to i32
    %c0_i32_21 = arith.constant 0 : i32
    %24 = arith.cmpi ne, %23, %c0_i32_21 : i32
    scf.if %24 {
      %cst_31 = arith.constant 0.000000e+00 : f32
      %38 = vector.broadcast %cst_31 : f32 to vector<2x128xf32>
      %c0_32 = arith.constant 0 : index
      %c0_33 = arith.constant 0 : index
      %39 = vector.load %arg5[%c0_32, %c0_33] : memref<2x128xf32, #tpu.memory_space<vmem>>, vector<2x128xf32>
      tpu.vector_store %arg5[%c0_32, %c0_33], %38 {strides = array<i32>} : memref<2x128xf32, #tpu.memory_space<vmem>>, vector<2x128xf32>,
    } else {
    }
    %cst_22 = arith.constant dense<0.000000e+00> : vector<128xf32>
    %25 = vector.multi_reduction <add>, %21, %cst_22 [0] : vector<64x128xf32> to vector<128xf32>
    %26 = vector.shape_cast %25 : vector<128xf32> to vector<1x128xf32>
    %27 = arith.mulf %21, %21 : vector<64x128xf32>
    %cst_23 = arith.constant dense<0.000000e+00> : vector<128xf32>
    %28 = vector.multi_reduction <add>, %27, %cst_23 [0] : vector<64x128xf32> to vector<128xf32>
    %29 = vector.shape_cast %28 : vector<128xf32> to vector<1x128xf32>
    %c0_24 = arith.constant 0 : index
    %c0_25 = arith.constant 0 : index
    %30 = vector.load %arg5[%c0_24, %c0_25] : memref<2x128xf32, #tpu.memory_space<vmem>>, vector<2x128xf32>
    %31 = tpu.concatenate %26, %29 in 0 : vector<1x128xf32>, vector<1x128xf32> -> vector<2x128xf32>
    %32 = arith.addf %30, %31 : vector<2x128xf32>
    %c0_26 = arith.constant 0 : index
    %c0_27 = arith.constant 0 : index
    %33 = vector.load %arg5[%c0_26, %c0_27] : memref<2x128xf32, #tpu.memory_space<vmem>>, vector<2x128xf32>
    tpu.vector_store %arg5[%c0_26, %c0_27], %32 {strides = array<i32>} : memref<2x128xf32, #tpu.memory_space<vmem>>, vector<2x128xf32>,
    %34 = arith.truncf %21 : vector<64x128xf32> to vector<64x128xbf16>
    %c0_28 = arith.constant 0 : index
    %c0_29 = arith.constant 0 : index
    %c0_30 = arith.constant 0 : index
    %35 = vector.load %arg4[%c0_28, %c0_29, %c0_30] : memref<1x64x128xbf16, #tpu.memory_space<vmem>>, vector<1x64x128xbf16>
    %36 = vector.shape_cast %35 : vector<1x64x128xbf16> to vector<64x128xbf16>
    %37 = vector.shape_cast %34 : vector<64x128xbf16> to vector<1x64x128xbf16>
    tpu.vector_store %arg4[%c0_28, %c0_29, %c0_30], %37 {strides = array<i32>} : memref<1x64x128xbf16, #tpu.memory_space<vmem>>, vector<1x64x128xbf16>,
    return
  }
  func.func @transform_0(%arg0: i32) -> (i32, i32, i32, i32) {
    %c0_i32 = arith.constant 0 : i32
    %c0_i32_0 = arith.constant 0 : i32
    %c0_i32_1 = arith.constant 0 : i32
    %c0_i32_2 = arith.constant 0 : i32
    return %arg0, %c0_i32, %c0_i32_0, %c0_i32_1 : i32, i32, i32, i32
  }
  func.func @transform_1(%arg0: i32) -> (i32, i32, i32, i32) {
    %c0_i32 = arith.constant 0 : i32
    %c0_i32_0 = arith.constant 0 : i32
    %c0_i32_1 = arith.constant 0 : i32
    %c0_i32_2 = arith.constant 0 : i32
    return %arg0, %c0_i32, %c0_i32_0, %c0_i32_1 : i32, i32, i32, i32
  }
  func.func @transform_2(%arg0: i32) -> (i32, i32, i32) {
    %c0_i32 = arith.constant 0 : i32
    %c0_i32_0 = arith.constant 0 : i32
    %c0_i32_1 = arith.constant 0 : i32
    %c0_i32_2 = arith.constant 0 : i32
    return %c0_i32, %c0_i32_0, %c0_i32_1 : i32, i32, i32
  }
  func.func @transform_3(%arg0: i32) -> (i32, i32, i32) {
    %c0_i32 = arith.constant 0 : i32
    %c0_i32_0 = arith.constant 0 : i32
    %c0_i32_1 = arith.constant 0 : i32
    return %arg0, %c0_i32, %c0_i32_0 : i32, i32, i32
  }
  func.func @transform_4(%arg0: i32) -> (i32, i32) {
    %c0_i32 = arith.constant 0 : i32
    %c0_i32_0 = arith.constant 0 : i32
    %c0_i32_1 = arith.constant 0 : i32
    return %c0_i32, %c0_i32_0 : i32, i32
  }
}

module attributes {stable_mosaic.version = 11 : i64} {
  func.func @_matmul_stats_kernel(%arg0: i32, %arg1: memref<128x128xbf16, #tpu.memory_space<vmem>>, %arg2: memref<1x128xf32, #tpu.memory_space<vmem>>, %arg3: memref<1x128xf32, #tpu.memory_space<vmem>>, %arg4: memref<128x128xbf16, #tpu.memory_space<vmem>>, %arg5: memref<128x128xbf16, #tpu.memory_space<vmem>>, %arg6: memref<2x128xf32, #tpu.memory_space<vmem>>) attributes {dimension_semantics = [#tpu.dimension_semantics<arbitrary>], iteration_bounds = array<i64: 1>, scalar_prefetch = 0 : i64, scratch_operands = 0 : i64, tpu.core_type = #tpu.core_type<tc>, window_params = [{transform_indices = @transform_0, window_bounds = array<i64: 128, 128>}, {pipeline_mode = #tpu.pipeline_mode<synchronous>, transform_indices = @transform_1, window_bounds = array<i64: 1, 128>}, {pipeline_mode = #tpu.pipeline_mode<synchronous>, transform_indices = @transform_2, window_bounds = array<i64: 1, 128>}, {pipeline_mode = #tpu.pipeline_mode<synchronous>, transform_indices = @transform_3, window_bounds = array<i64: 128, 128>}, {transform_indices = @transform_4, window_bounds = array<i64: 128, 128>}, {pipeline_mode = #tpu.pipeline_mode<synchronous>, transform_indices = @transform_5, window_bounds = array<i64: 2, 128>}]} {
    %c0 = arith.constant 0 : index
    %c0_0 = arith.constant 0 : index
    %0 = vector.load %arg1[%c0, %c0_0] : memref<128x128xbf16, #tpu.memory_space<vmem>>, vector<128x128xbf16>
    %1 = arith.extf %0 : vector<128x128xbf16> to vector<128x128xf32>
    %c0_1 = arith.constant 0 : index
    %c0_2 = arith.constant 0 : index
    %2 = vector.load %arg2[%c0_1, %c0_2] : memref<1x128xf32, #tpu.memory_space<vmem>>, vector<1x128xf32>
    %3 = vector.broadcast %2 : vector<1x128xf32> to vector<128x128xf32>
    %4 = arith.mulf %1, %3 : vector<128x128xf32>
    %c0_3 = arith.constant 0 : index
    %c0_4 = arith.constant 0 : index
    %5 = vector.load %arg3[%c0_3, %c0_4] : memref<1x128xf32, #tpu.memory_space<vmem>>, vector<1x128xf32>
    %6 = vector.broadcast %5 : vector<1x128xf32> to vector<128x128xf32>
    %7 = arith.addf %4, %6 : vector<128x128xf32>
    %cst = arith.constant 0.000000e+00 : f32
    %8 = vector.broadcast %cst : f32 to vector<128x128xf32>
    %9 = arith.maximumf %7, %8 : vector<128x128xf32>
    %10 = arith.truncf %9 : vector<128x128xf32> to vector<128x128xbf16>
    %c0_5 = arith.constant 0 : index
    %c0_6 = arith.constant 0 : index
    %11 = vector.load %arg4[%c0_5, %c0_6] : memref<128x128xbf16, #tpu.memory_space<vmem>>, vector<128x128xbf16>
    %cst_7 = arith.constant dense<0.000000e+00> : vector<128x128xf32>
    %12 = tpu.matmul %10, %11, %cst_7 {dimension_numbers = #tpu.dot_dimension_numbers<[1], [0], [0], [1], [0, 0, 1, 1], [], []>} : vector<128x128xbf16>, vector<128x128xbf16>, vector<128x128xf32> -> vector<128x128xf32>
    %c0_i32 = arith.constant 0 : i32
    %13 = arith.cmpi eq, %arg0, %c0_i32 : i32
    %14 = arith.extui %13 : i1 to i32
    %c0_i32_8 = arith.constant 0 : i32
    %15 = arith.cmpi ne, %14, %c0_i32_8 : i32
    scf.if %15 {
      %cst_17 = arith.constant 0.000000e+00 : f32
      %27 = vector.broadcast %cst_17 : f32 to vector<2x128xf32>
      %c0_18 = arith.constant 0 : index
      %c0_19 = arith.constant 0 : index
      %28 = vector.load %arg6[%c0_18, %c0_19] : memref<2x128xf32, #tpu.memory_space<vmem>>, vector<2x128xf32>
      tpu.vector_store %arg6[%c0_18, %c0_19], %27 {strides = array<i32>} : memref<2x128xf32, #tpu.memory_space<vmem>>, vector<2x128xf32>,
    } else {
    }
    %cst_9 = arith.constant dense<0.000000e+00> : vector<128xf32>
    %16 = vector.multi_reduction <add>, %12, %cst_9 [0] : vector<128x128xf32> to vector<128xf32>
    %17 = vector.shape_cast %16 : vector<128xf32> to vector<1x128xf32>
    %18 = arith.mulf %12, %12 : vector<128x128xf32>
    %cst_10 = arith.constant dense<0.000000e+00> : vector<128xf32>
    %19 = vector.multi_reduction <add>, %18, %cst_10 [0] : vector<128x128xf32> to vector<128xf32>
    %20 = vector.shape_cast %19 : vector<128xf32> to vector<1x128xf32>
    %c0_11 = arith.constant 0 : index
    %c0_12 = arith.constant 0 : index
    %21 = vector.load %arg6[%c0_11, %c0_12] : memref<2x128xf32, #tpu.memory_space<vmem>>, vector<2x128xf32>
    %22 = tpu.concatenate %17, %20 in 0 : vector<1x128xf32>, vector<1x128xf32> -> vector<2x128xf32>
    %23 = arith.addf %21, %22 : vector<2x128xf32>
    %c0_13 = arith.constant 0 : index
    %c0_14 = arith.constant 0 : index
    %24 = vector.load %arg6[%c0_13, %c0_14] : memref<2x128xf32, #tpu.memory_space<vmem>>, vector<2x128xf32>
    tpu.vector_store %arg6[%c0_13, %c0_14], %23 {strides = array<i32>} : memref<2x128xf32, #tpu.memory_space<vmem>>, vector<2x128xf32>,
    %25 = arith.truncf %12 : vector<128x128xf32> to vector<128x128xbf16>
    %c0_15 = arith.constant 0 : index
    %c0_16 = arith.constant 0 : index
    %26 = vector.load %arg5[%c0_15, %c0_16] : memref<128x128xbf16, #tpu.memory_space<vmem>>, vector<128x128xbf16>
    tpu.vector_store %arg5[%c0_15, %c0_16], %25 {strides = array<i32>} : memref<128x128xbf16, #tpu.memory_space<vmem>>, vector<128x128xbf16>,
    return
  }
  func.func @transform_0(%arg0: i32) -> (i32, i32) {
    %c0_i32 = arith.constant 0 : i32
    %c0_i32_0 = arith.constant 0 : i32
    return %arg0, %c0_i32 : i32, i32
  }
  func.func @transform_1(%arg0: i32) -> (i32, i32) {
    %c0_i32 = arith.constant 0 : i32
    %c0_i32_0 = arith.constant 0 : i32
    %c0_i32_1 = arith.constant 0 : i32
    return %c0_i32, %c0_i32_0 : i32, i32
  }
  func.func @transform_2(%arg0: i32) -> (i32, i32) {
    %c0_i32 = arith.constant 0 : i32
    %c0_i32_0 = arith.constant 0 : i32
    %c0_i32_1 = arith.constant 0 : i32
    return %c0_i32, %c0_i32_0 : i32, i32
  }
  func.func @transform_3(%arg0: i32) -> (i32, i32) {
    %c0_i32 = arith.constant 0 : i32
    %c0_i32_0 = arith.constant 0 : i32
    %c0_i32_1 = arith.constant 0 : i32
    return %c0_i32, %c0_i32_0 : i32, i32
  }
  func.func @transform_4(%arg0: i32) -> (i32, i32) {
    %c0_i32 = arith.constant 0 : i32
    %c0_i32_0 = arith.constant 0 : i32
    return %arg0, %c0_i32 : i32, i32
  }
  func.func @transform_5(%arg0: i32) -> (i32, i32) {
    %c0_i32 = arith.constant 0 : i32
    %c0_i32_0 = arith.constant 0 : i32
    %c0_i32_1 = arith.constant 0 : i32
    return %c0_i32, %c0_i32_0 : i32, i32
  }
}

</mosaic_0001>

<bundles_post_ra>
// kernel: bottleneck_forward.10
= control target key start
LH: loop header
LB: loop body
LE: loop exit
PB: predicated region body
PF: predicated region fallthrough
CT: control target
= control target key end

     0   :  { %v571_v16 = vmov 0.0   ;;  %vm303_vm0 = vcmask 1040384   ;;  %s673_s1 = inlined_call_operand.vmem [shape: bf16[128,128], index: 1, kind: input, shape index: {}]   ;;  %s674_s0 = inlined_call_operand.vmem [shape: bf16[128,128], index: 0, kind: input, shape index: {}]   ;;  %s675_s3 = inlined_call_operand.vmem [shape: f32[2,128], index: 3, kind: output, shape index: {1}]   ;;  %s676_s2 = inlined_call_operand.vmem [shape: bf16[128,128], index: 2, kind: output, shape index: {0}]  }
   0x1   :  { %v555_v0 = vld [vmem:[%s673_s1 + $0x38] sm:$0xff]   ;;  %v556_v1 = vld [vmem:[%s673_s1 + $0x30] sm:$0xff]   ;;  %v557_v2 = vld [vmem:[%s673_s1 + $0x28] sm:$0xff]   ;;  %243 = vst [vmem:[%s675_s3] sm:$0x3] %v571_v16 }
   0x2   :  { %506 = vmatprep.subr.bf16.mxu0 %v555_v0  ;;  %538 = vmatprep.subr.bf16.mxu1 %v555_v0  ;;  %v558_v3 = vld [vmem:[%s673_s1 + $0x20] sm:$0xff]   ;;  %v559_v5 = vld [vmem:[%s673_s1 + $0x18] sm:$0xff]   ;;  %v560_v7 = vld [vmem:[%s673_s1 + $0x10] sm:$0xff]  }
   0x3   :  { %507 = vmatpush3.bf16.msra.mxu0 %v555_v0  ;;  %546 = vmatpush3.bf16.msra.mxu1 %v555_v0  ;;  %v563_v4 = vld [vmem:[%s674_s0] sm:$0xff]   ;;  %v561_v8 = vld [vmem:[%s673_s1 + $0x8] sm:$0xff]   ;;  %v565_v12 = vld [vmem:[%s674_s0 + $0x10] sm:$0xff]  }
   0x4   :  { %508 = vmatprep.subr.bf16.mxu0 %v556_v1  ;;  %539 = vmatprep.subr.bf16.mxu1 %v556_v1  ;;  %v567_v6 = vld [vmem:[%s674_s0 + $0x20] sm:$0xff]   ;;  %v564_v10 = vld [vmem:[%s674_s0 + $0x8] sm:$0xff]   ;;  %v569_v13 = vld [vmem:[%s674_s0 + $0x30] sm:$0xff]  }
   0x5   :  { %522 = vmatprep.mubr.bf16.mxu0 %v563_v4  ;;  %530 = vmatprep.mubr.bf16.mxu1 %v567_v6  ;;  %v562_v9 = vld [vmem:[%s673_s1] sm:$0xff]   ;;  %v568_v11 = vld [vmem:[%s674_s0 + $0x28] sm:$0xff]   ;;  %v566_v14 = vld [vmem:[%s674_s0 + $0x18] sm:$0xff]  }
   0x6   :  { %v570_v15 = vld [vmem:[%s674_s0 + $0x38] sm:$0xff]  }
   0x7   :  { %509 = vmatpush3.bf16.msra.mxu0 %v556_v1  ;;  %547 = vmatpush3.bf16.msra.mxu1 %v556_v1 }
   0x8   :  { %510 = vmatprep.subr.bf16.mxu0 %v557_v2  ;;  %540 = vmatprep.subr.bf16.mxu1 %v557_v2 }
   0xb   :  { %511 = vmatpush3.bf16.msra.mxu0 %v557_v2  ;;  %548 = vmatpush3.bf16.msra.mxu1 %v557_v2 }
   0xc   :  { %512 = vmatprep.subr.bf16.mxu0 %v558_v3  ;;  %541 = vmatprep.subr.bf16.mxu1 %v558_v3 }
   0xf   :  { %513 = vmatpush3.bf16.msra.mxu0 %v558_v3  ;;  %549 = vmatpush3.bf16.msra.mxu1 %v558_v3 }
  0x10   :  { %514 = vmatprep.subr.bf16.mxu0 %v559_v5  ;;  %542 = vmatprep.subr.bf16.mxu1 %v559_v5 }
  0x13   :  { %515 = vmatpush3.bf16.msra.mxu0 %v559_v5  ;;  %550 = vmatpush3.bf16.msra.mxu1 %v559_v5 }
  0x14   :  { %516 = vmatprep.subr.bf16.mxu0 %v560_v7  ;;  %543 = vmatprep.subr.bf16.mxu1 %v560_v7 }
  0x17   :  { %517 = vmatpush3.bf16.msra.mxu0 %v560_v7  ;;  %551 = vmatpush3.bf16.msra.mxu1 %v560_v7 }
  0x18   :  { %518 = vmatprep.subr.bf16.mxu0 %v561_v8  ;;  %544 = vmatprep.subr.bf16.mxu1 %v561_v8 }
  0x1b   :  { %519 = vmatpush3.bf16.msra.mxu0 %v561_v8  ;;  %552 = vmatpush3.bf16.msra.mxu1 %v561_v8 }
  0x1c   :  { %520 = vmatprep.subr.bf16.mxu0 %v562_v9  ;;  %545 = vmatprep.subr.bf16.mxu1 %v562_v9 }
  0x1f   :  { %521 = vmatpush3.bf16.msra.mxu0 %v562_v9  ;;  %553 = vmatpush3.bf16.msra.mxu1 %v562_v9 }
  0x22   :  { %523 = vmatmul.mubr.bf16.vlgmr.msra.gmra.mxu0 %v564_v10  ;;  %531 = vmatmul.mubr.bf16.vlgmr.msra.gmra.mxu1 %v568_v11 }
  0x23   :  { %526 = vmatprep.mubr.bf16.mxu0 %v565_v12  ;;  %534 = vmatprep.mubr.bf16.mxu1 %v569_v13 }
  0x2a   :  { %527 = vmatmul.mubr.bf16.gmra.mxu0 %v566_v14  ;;  %535 = vmatmul.mubr.bf16.gmra.mxu1 %v570_v15 }
  0xe2   :  { %v524_v17 = vpop.f32.mrf.mxu0  ;;  %v532_v18 = vpop.f32.mrf.mxu1 }
  0xe3   :  { %v267_v34 = vmul.f32 %v524_v17, %v524_v17  ;;  %v275_v4 = vmul.f32 %v532_v18, %v532_v18 }
  0xe4   :  { %v176_v19 = vpop.f32.mrf.mxu0  ;;  %v208_v20 = vpop.f32.mrf.mxu1 }
  0xe5   :  { %v265_v27 = vmul.f32 %v176_v19, %v176_v19  ;;  %v273_v62 = vmul.f32 %v208_v20, %v208_v20 }
  0xe6   :  { %v525_v21 = vpop.f32.mrf.mxu0  ;;  %v533_v22 = vpop.f32.mrf.mxu1 }
  0xe7   :  { %v451_v23 = vpack.c.bf16 %v525_v21, %v524_v17  ;;  %v471_v24 = vpack.c.bf16 %v533_v22, %v532_v18  ;;  %v268_v39 = vmul.f32 %v525_v21, %v525_v21  ;;  %v276_v7 = vmul.f32 %v533_v22, %v533_v22 }
  0xe8   :  { %v179_v25 = vpop.f32.mrf.mxu0  ;;  %v211_v26 = vpop.f32.mrf.mxu1 }
  0xe9   :  { %483 = vst [vmem:[%s676_s2 + $0x8] sm:$0xff] %v451_v23   ;;  %v244_v28 = vadd.f32 %v179_v25, %v176_v19  ;;  %v266_v29 = vmul.f32 %v179_v25, %v179_v25  ;;  %v446_v30 = vpack.c.bf16 %v179_v25, %v176_v19  ;;  %487 = vst [vmem:[%s676_s2 + $0x28] sm:$0xff] %v471_v24  }
  0xea   :  { %v528_v31 = vpop.f32.mrf.mxu0  ;;  %v466_v32 = vpack.c.bf16 %v211_v26, %v208_v20  ;;  %v536_v33 = vpop.f32.mrf.mxu1  ;;  %v274_v2 = vmul.f32 %v211_v26, %v211_v26 }
  0xeb   :  { %v245_v35 = vadd.f32 %v524_v17, %v244_v28  ;;  %v281_v36 = vadd.f32 %v266_v29, %v265_v27  ;;  %447 = vst [vmem:[%s676_s2] sm:$0xff] %v446_v30   ;;  %v271_v56 = vmul.f32 %v528_v31, %v528_v31  ;;  %v279_v16 = vmul.f32 %v536_v33, %v536_v33 }
  0xec   :  { %v192_v37 = vpop.f32.mrf.mxu0  ;;  %486 = vst [vmem:[%s676_s2 + $0x20] sm:$0xff] %v466_v32   ;;  %v224_v38 = vpop.f32.mrf.mxu1 }
  0xed   :  { %v282_v40 = vadd.f32 %v281_v36, %v267_v34  ;;  %v246_v41 = vadd.f32 %v525_v21, %v245_v35  ;;  %v269_v45 = vmul.f32 %v192_v37, %v192_v37  ;;  %v277_v11 = vmul.f32 %v224_v38, %v224_v38 }
  0xee   :  { %v529_v42 = vpop.f32.mrf.mxu0  ;;  %v537_v43 = vpop.f32.mrf.mxu1 }
  0xef   :  { %v247_v44 = vadd.f32 %v246_v41, %v192_v37  ;;  %v283_v46 = vadd.f32 %v282_v40, %v268_v39  ;;  %v461_v47 = vpack.c.bf16 %v529_v42, %v528_v31  ;;  %v481_v49 = vpack.c.bf16 %v537_v43, %v536_v33 }
  0xf0   :  { %v195_v48 = vpop.f32.mrf.mxu0  ;;  %v227_v50 = vpop.f32.mrf.mxu1  ;;  %v272_v59 = vmul.f32 %v529_v42, %v529_v42  ;;  %v280_v21 = vmul.f32 %v537_v43, %v537_v43 }
  0xf1   :  { %v284_v51 = vadd.f32 %v283_v46, %v269_v45  ;;  %485 = vst [vmem:[%s676_s2 + $0x18] sm:$0xff] %v461_v47   ;;  %v248_v52 = vadd.f32 %v247_v44, %v195_v48  ;;  %v270_v53 = vmul.f32 %v195_v48, %v195_v48  ;;  %v456_v54 = vpack.c.bf16 %v195_v48, %v192_v37 }
  0xf2   :  { %489 = vst [vmem:[%s676_s2 + $0x38] sm:$0xff] %v481_v49   ;;  %v476_v55 = vpack.c.bf16 %v227_v50, %v224_v38  ;;  %v278_v15 = vmul.f32 %v227_v50, %v227_v50 }
  0xf3   :  { %v249_v57 = vadd.f32 %v528_v31, %v248_v52  ;;  %v285_v58 = vadd.f32 %v284_v51, %v270_v53  ;;  %484 = vst [vmem:[%s676_s2 + $0x10] sm:$0xff] %v456_v54  }
  0xf4   :  { %488 = vst [vmem:[%s676_s2 + $0x30] sm:$0xff] %v476_v55  }
  0xf5   :  { %v250_v60 = vadd.f32 %v529_v42, %v249_v57  ;;  %v286_v61 = vadd.f32 %v285_v58, %v271_v56 }
  0xf7   :  { %v287_v63 = vadd.f32 %v286_v61, %v272_v59  ;;  %v251_v0 = vadd.f32 %v250_v60, %v208_v20 }
  0xf9   :  { %v252_v1 = vadd.f32 %v251_v0, %v211_v26  ;;  %v288_v3 = vadd.f32 %v287_v63, %v273_v62 }
  0xfb   :  { %v253_v5 = vadd.f32 %v532_v18, %v252_v1  ;;  %v289_v6 = vadd.f32 %v288_v3, %v274_v2 }
  0xfd   :  { %v290_v8 = vadd.f32 %v289_v6, %v275_v4  ;;  %v254_v9 = vadd.f32 %v533_v22, %v253_v5 }
  0xff   :  { %v255_v10 = vadd.f32 %v254_v9, %v224_v38  ;;  %v291_v12 = vadd.f32 %v290_v8, %v276_v7 }
 0x101   :  { %v292_v13 = vadd.f32 %v291_v12, %v277_v11  ;;  %v256_v14 = vadd.f32 %v255_v10, %v227_v50 }
 0x103   :  { %v257_v17 = vadd.f32 %v536_v33, %v256_v14  ;;  %v293_v19 = vadd.f32 %v292_v13, %v278_v15  ;;  %v302_v33 = vld [vmem:[%s675_s3] sm:$0x3] }
 0x105   :  { %v258_v20 = vadd.f32 %v537_v43, %v257_v17  ;;  %v294_v23 = vadd.f32 %v293_v19, %v279_v16 }
 0x107   :  { %v259_v24 = vrot.slane %v258_v20, 4  ;;  %v295_v25 = vadd.f32 %v294_v23, %v280_v21 }
 0x109   :  { %v260_v26 = vadd.f32 %v259_v24, %v258_v20  ;;  %v296_v18 = vrot.slane %v295_v25, 4 }
 0x10b   :  { %v261_v27 = vrot.slane %v260_v26, 2  ;;  %v297_v28 = vadd.f32 %v296_v18, %v295_v25 }
 0x10d   :  { %v262_v29 = vadd.f32 %v261_v27, %v260_v26  ;;  %v298_v22 = vrot.slane %v297_v28, 2 }
 0x10f   :  { %v263_v30 = vrot.slane %v262_v29, 1  ;;  %v299_v31 = vadd.f32 %v298_v22, %v297_v28 }
 0x111   :  { %v300_v32 = vrot.slane %v299_v31, 1  ;;  %v264_v34 = vadd.f32 %v263_v30, %v262_v29 }
 0x113   :  { %v301_v35 = vadd.f32 %v300_v32, %v299_v31 }
 0x115   :  { %v304_v36 = vsel %vm303_vm0, %v264_v34, %v301_v35 }
 0x116   :  { %v305_v37 = vadd.f32 %v304_v36, %v302_v33 }
 0x118   :  { %306 = vst [vmem:[%s675_s3] sm:$0x3] %v305_v37 }

// kernel: bottleneck_forward.6
= control target key start
LH: loop header
LB: loop body
LE: loop exit
PB: predicated region body
PF: predicated region fallthrough
CT: control target
= control target key end

     0   :  { %v1699_v42 = vmov 0.0   ;;  %vm831_vm0 = vcmask 1040384   ;;  %s2137_s1 = inlined_call_operand.vmem [shape: bf16[128,128], index: 1, kind: input, shape index: {}]   ;;  %s2138_s0 = inlined_call_operand.vmem [shape: bf16[512,128], index: 0, kind: input, shape index: {}]   ;;  %s2139_s3 = inlined_call_operand.vmem [shape: f32[2,128], index: 3, kind: output, shape index: {1}]   ;;  %s2140_s2 = inlined_call_operand.vmem [shape: bf16[512,128], index: 2, kind: output, shape index: {0}]  }
   0x1   :  { %v1659_v0 = vld [vmem:[%s2137_s1 + $0x38] sm:$0xff]   ;;  %v1660_v1 = vld [vmem:[%s2137_s1 + $0x30] sm:$0xff]   ;;  %v1661_v2 = vld [vmem:[%s2137_s1 + $0x28] sm:$0xff]   ;;  %627 = vst [vmem:[%s2139_s3] sm:$0x3] %v1699_v42 }
   0x2   :  { %1562 = vmatprep.subr.bf16.mxu0 %v1659_v0  ;;  %1642 = vmatprep.subr.bf16.mxu1 %v1659_v0  ;;  %v1662_v3 = vld [vmem:[%s2137_s1 + $0x20] sm:$0xff]   ;;  %v1663_v5 = vld [vmem:[%s2137_s1 + $0x18] sm:$0xff]   ;;  %v1664_v6 = vld [vmem:[%s2137_s1 + $0x10] sm:$0xff]  }
   0x3   :  { %1563 = vmatpush3.bf16.msra.mxu0 %v1659_v0  ;;  %1650 = vmatpush3.bf16.msra.mxu1 %v1659_v0  ;;  %v1667_v4 = vld [vmem:[%s2138_s0] sm:$0xff]   ;;  %v1665_v7 = vld [vmem:[%s2137_s1 + $0x8] sm:$0xff]   ;;  %v1669_v11 = vld [vmem:[%s2138_s0 + $0x10] sm:$0xff]  }
   0x4   :  { %1564 = vmatprep.subr.bf16.mxu0 %v1660_v1  ;;  %1643 = vmatprep.subr.bf16.mxu1 %v1660_v1  ;;  %v1666_v8 = vld [vmem:[%s2137_s1] sm:$0xff]   ;;  %v1668_v10 = vld [vmem:[%s2138_s0 + $0x8] sm:$0xff]   ;;  %v1685_v13 = vld [vmem:[%s2138_s0 + $0x90] sm:$0xff]  }
   0x5   :  { %1578 = vmatprep.mubr.bf16.mxu0 %v1667_v4  ;;  %v1683_v9 = vld [vmem:[%s2138_s0 + $0x80] sm:$0xff]   ;;  %v1684_v12 = vld [vmem:[%s2138_s0 + $0x88] sm:$0xff]   ;;  %v1670_v14 = vld [vmem:[%s2138_s0 + $0x18] sm:$0xff]  }
   0x6   :  { %1610 = vmatprep.mubr.bf16.mxu1 %v1683_v9  ;;  %v1671_v15 = vld [vmem:[%s2138_s0 + $0x20] sm:$0xff]   ;;  %v1686_v16 = vld [vmem:[%s2138_s0 + $0x98] sm:$0xff]   ;;  %v1672_v18 = vld [vmem:[%s2138_s0 + $0x28] sm:$0xff]  }
   0x7   :  { %1565 = vmatpush3.bf16.msra.mxu0 %v1660_v1  ;;  %1651 = vmatpush3.bf16.msra.mxu1 %v1660_v1  ;;  %v1687_v17 = vld [vmem:[%s2138_s0 + $0xa0] sm:$0xff]   ;;  %v1688_v19 = vld [vmem:[%s2138_s0 + $0xa8] sm:$0xff]   ;;  %v1673_v20 = vld [vmem:[%s2138_s0 + $0x30] sm:$0xff]  }
   0x8   :  { %1566 = vmatprep.subr.bf16.mxu0 %v1661_v2  ;;  %1644 = vmatprep.subr.bf16.mxu1 %v1661_v2  ;;  %v1689_v21 = vld [vmem:[%s2138_s0 + $0xb0] sm:$0xff]   ;;  %v1674_v22 = vld [vmem:[%s2138_s0 + $0x38] sm:$0xff]   ;;  %v1675_v24 = vld [vmem:[%s2138_s0 + $0x40] sm:$0xff]  }
   0x9   :  { %v1690_v23 = vld [vmem:[%s2138_s0 + $0xb8] sm:$0xff]   ;;  %v1691_v25 = vld [vmem:[%s2138_s0 + $0xc0] sm:$0xff]   ;;  %v1676_v26 = vld [vmem:[%s2138_s0 + $0x48] sm:$0xff]  }
   0xa   :  { %v1692_v27 = vld [vmem:[%s2138_s0 + $0xc8] sm:$0xff]   ;;  %v1677_v28 = vld [vmem:[%s2138_s0 + $0x50] sm:$0xff]   ;;  %v1678_v30 = vld [vmem:[%s2138_s0 + $0x58] sm:$0xff]  }
   0xb   :  { %1567 = vmatpush3.bf16.msra.mxu0 %v1661_v2  ;;  %1652 = vmatpush3.bf16.msra.mxu1 %v1661_v2  ;;  %v1693_v29 = vld [vmem:[%s2138_s0 + $0xd0] sm:$0xff]   ;;  %v1694_v31 = vld [vmem:[%s2138_s0 + $0xd8] sm:$0xff]   ;;  %v1679_v32 = vld [vmem:[%s2138_s0 + $0x60] sm:$0xff]  }
   0xc   :  { %1568 = vmatprep.subr.bf16.mxu0 %v1662_v3  ;;  %1645 = vmatprep.subr.bf16.mxu1 %v1662_v3  ;;  %v1695_v33 = vld [vmem:[%s2138_s0 + $0xe0] sm:$0xff]   ;;  %v1680_v34 = vld [vmem:[%s2138_s0 + $0x68] sm:$0xff]   ;;  %v1681_v36 = vld [vmem:[%s2138_s0 + $0x70] sm:$0xff]  }
   0xd   :  { %v1696_v35 = vld [vmem:[%s2138_s0 + $0xe8] sm:$0xff]   ;;  %v1697_v37 = vld [vmem:[%s2138_s0 + $0xf0] sm:$0xff]   ;;  %v1682_v38 = vld [vmem:[%s2138_s0 + $0x78] sm:$0xff]  }
   0xe   :  { %v1698_v39 = vld [vmem:[%s2138_s0 + $0xf8] sm:$0xff]  }
   0xf   :  { %1569 = vmatpush3.bf16.msra.mxu0 %v1662_v3  ;;  %1653 = vmatpush3.bf16.msra.mxu1 %v1662_v3 }
  0x10   :  { %1570 = vmatprep.subr.bf16.mxu0 %v1663_v5  ;;  %1646 = vmatprep.subr.bf16.mxu1 %v1663_v5 }
  0x13   :  { %1571 = vmatpush3.bf16.msra.mxu0 %v1663_v5  ;;  %1654 = vmatpush3.bf16.msra.mxu1 %v1663_v5 }
  0x14   :  { %1572 = vmatprep.subr.bf16.mxu0 %v1664_v6  ;;  %1647 = vmatprep.subr.bf16.mxu1 %v1664_v6 }
  0x17   :  { %1573 = vmatpush3.bf16.msra.mxu0 %v1664_v6  ;;  %1655 = vmatpush3.bf16.msra.mxu1 %v1664_v6 }
  0x18   :  { %1574 = vmatprep.subr.bf16.mxu0 %v1665_v7  ;;  %1648 = vmatprep.subr.bf16.mxu1 %v1665_v7 }
  0x1b   :  { %1575 = vmatpush3.bf16.msra.mxu0 %v1665_v7  ;;  %1656 = vmatpush3.bf16.msra.mxu1 %v1665_v7 }
  0x1c   :  { %1576 = vmatprep.subr.bf16.mxu0 %v1666_v8  ;;  %1649 = vmatprep.subr.bf16.mxu1 %v1666_v8 }
  0x1f   :  { %1577 = vmatpush3.bf16.msra.mxu0 %v1666_v8  ;;  %1657 = vmatpush3.bf16.msra.mxu1 %v1666_v8 }
  0x22   :  { %1579 = vmatmul.mubr.bf16.vlgmr.msra.gmra.mxu0 %v1668_v10  ;;  %1611 = vmatmul.mubr.bf16.vlgmr.msra.gmra.mxu1 %v1684_v12 }
  0x23   :  { %1582 = vmatprep.mubr.bf16.mxu0 %v1669_v11  ;;  %1614 = vmatprep.mubr.bf16.mxu1 %v1685_v13 }
  0x2a   :  { %1583 = vmatmul.mubr.bf16.gmra.mxu0 %v1670_v14  ;;  %1615 = vmatmul.mubr.bf16.gmra.mxu1 %v1686_v16 }
  0x2b   :  { %1586 = vmatprep.mubr.bf16.mxu0 %v1671_v15  ;;  %1618 = vmatprep.mubr.bf16.mxu1 %v1687_v17 }
  0x32   :  { %1587 = vmatmul.mubr.bf16.gmra.mxu0 %v1672_v18  ;;  %1619 = vmatmul.mubr.bf16.gmra.mxu1 %v1688_v19 }
  0x33   :  { %1590 = vmatprep.mubr.bf16.mxu0 %v1673_v20  ;;  %1622 = vmatprep.mubr.bf16.mxu1 %v1689_v21 }
  0x3a   :  { %1591 = vmatmul.mubr.bf16.gmra.mxu0 %v1674_v22  ;;  %1623 = vmatmul.mubr.bf16.gmra.mxu1 %v1690_v23 }
  0x3b   :  { %1594 = vmatprep.mubr.bf16.mxu0 %v1675_v24  ;;  %1626 = vmatprep.mubr.bf16.mxu1 %v1691_v25 }
  0x42   :  { %1595 = vmatmul.mubr.bf16.gmra.mxu0 %v1676_v26  ;;  %1627 = vmatmul.mubr.bf16.gmra.mxu1 %v1692_v27 }
  0x43   :  { %1598 = vmatprep.mubr.bf16.mxu0 %v1677_v28  ;;  %1630 = vmatprep.mubr.bf16.mxu1 %v1693_v29 }
  0x4a   :  { %1599 = vmatmul.mubr.bf16.gmra.mxu0 %v1678_v30  ;;  %1631 = vmatmul.mubr.bf16.gmra.mxu1 %v1694_v31 }
  0x4b   :  { %1602 = vmatprep.mubr.bf16.mxu0 %v1679_v32  ;;  %1634 = vmatprep.mubr.bf16.mxu1 %v1695_v33 }
  0x52   :  { %1603 = vmatmul.mubr.bf16.gmra.mxu0 %v1680_v34  ;;  %1635 = vmatmul.mubr.bf16.gmra.mxu1 %v1696_v35 }
  0x53   :  { %1606 = vmatprep.mubr.bf16.mxu0 %v1681_v36  ;;  %1638 = vmatprep.mubr.bf16.mxu1 %v1697_v37 }
  0x5a   :  { %1607 = vmatmul.mubr.bf16.gmra.mxu0 %v1682_v38  ;;  %1639 = vmatmul.mubr.bf16.gmra.mxu1 %v1698_v39 }
  0xe2   :  { %v1580_v40 = vpop.f32.mrf.mxu0  ;;  %v1840_v41 = vpop.f32.mrf.mxu1 }
  0xe3   :  { %v699_v58 = vmul.f32 %v1580_v40, %v1580_v40 }
  0xe4   :  { %v368_v43 = vpop.f32.mrf.mxu0  ;;  %v1845_v44 = vpop.f32.mrf.mxu1 }
  0xe5   :  { %v697_v51 = vmul.f32 %v368_v43, %v368_v43 }
  0xe6   :  { %v1581_v45 = vpop.f32.mrf.mxu0  ;;  %v1847_v46 = vpop.f32.mrf.mxu1 }
  0xe7   :  { %v1339_v47 = vpack.c.bf16 %v1581_v45, %v1580_v40  ;;  %v1419_v48 = vpack.c.bf16 %v1847_v46, %v1840_v41  ;;  %v700_v63 = vmul.f32 %v1581_v45, %v1581_v45 }
  0xe8   :  { %v371_v49 = vpop.f32.mrf.mxu0  ;;  %v1851_v50 = vpop.f32.mrf.mxu1 }
  0xe9   :  { %1491 = vst [vmem:[%s2140_s2 + $0x8] sm:$0xff] %v1339_v47   ;;  %v628_v52 = vadd.f32 %v371_v49, %v368_v43  ;;  %v698_v53 = vmul.f32 %v371_v49, %v371_v49  ;;  %v1334_v54 = vpack.c.bf16 %v371_v49, %v368_v43  ;;  %1507 = vst [vmem:[%s2140_s2 + $0x88] sm:$0xff] %v1419_v48  }
  0xea   :  { %v1584_v55 = vpop.f32.mrf.mxu0  ;;  %v1414_v56 = vpack.c.bf16 %v1851_v50, %v1845_v44  ;;  %v1861_v57 = vpop.f32.mrf.mxu1 }
  0xeb   :  { %v629_v59 = vadd.f32 %v1580_v40, %v628_v52  ;;  %v761_v60 = vadd.f32 %v698_v53, %v697_v51  ;;  %1335 = vst [vmem:[%s2140_s2] sm:$0xff] %v1334_v54   ;;  %v703_v18 = vmul.f32 %v1584_v55, %v1584_v55 }
  0xec   :  { %v384_v61 = vpop.f32.mrf.mxu0  ;;  %1506 = vst [vmem:[%s2140_s2 + $0x80] sm:$0xff] %v1414_v56   ;;  %v1869_v62 = vpop.f32.mrf.mxu1 }
  0xed   :  { %v762_v0 = vadd.f32 %v761_v60, %v699_v58  ;;  %v630_v1 = vadd.f32 %v1581_v45, %v629_v59  ;;  %v701_v5 = vmul.f32 %v384_v61, %v384_v61 }
  0xee   :  { %v1585_v2 = vpop.f32.mrf.mxu0  ;;  %v1871_v3 = vpop.f32.mrf.mxu1 }
  0xef   :  { %v631_v4 = vadd.f32 %v630_v1, %v384_v61  ;;  %v763_v6 = vadd.f32 %v762_v0, %v700_v63  ;;  %v1349_v7 = vpack.c.bf16 %v1585_v2, %v1584_v55  ;;  %v1429_v9 = vpack.c.bf16 %v1871_v3, %v1861_v57 }
  0xf0   :  { %v387_v8 = vpop.f32.mrf.mxu0  ;;  %v1875_v10 = vpop.f32.mrf.mxu1  ;;  %v704_v23 = vmul.f32 %v1585_v2, %v1585_v2 }
  0xf1   :  { %v764_v11 = vadd.f32 %v763_v6, %v701_v5  ;;  %1493 = vst [vmem:[%s2140_s2 + $0x18] sm:$0xff] %v1349_v7   ;;  %v632_v12 = vadd.f32 %v631_v4, %v387_v8  ;;  %v702_v13 = vmul.f32 %v387_v8, %v387_v8  ;;  %v1344_v14 = vpack.c.bf16 %v387_v8, %v384_v61 }
  0xf2   :  { %v1588_v15 = vpop.f32.mrf.mxu0  ;;  %1509 = vst [vmem:[%s2140_s2 + $0x98] sm:$0xff] %v1429_v9   ;;  %v1424_v16 = vpack.c.bf16 %v1875_v10, %v1869_v62  ;;  %v1885_v17 = vpop.f32.mrf.mxu1 }
  0xf3   :  { %v633_v19 = vadd.f32 %v1584_v55, %v632_v12  ;;  %v765_v20 = vadd.f32 %v764_v11, %v702_v13  ;;  %1492 = vst [vmem:[%s2140_s2 + $0x10] sm:$0xff] %v1344_v14   ;;  %v707_v43 = vmul.f32 %v1588_v15, %v1588_v15 }
  0xf4   :  { %v400_v21 = vpop.f32.mrf.mxu0  ;;  %1508 = vst [vmem:[%s2140_s2 + $0x90] sm:$0xff] %v1424_v16   ;;  %v1893_v22 = vpop.f32.mrf.mxu1 }
  0xf5   :  { %v766_v24 = vadd.f32 %v765_v20, %v703_v18  ;;  %v634_v25 = vadd.f32 %v1585_v2, %v633_v19  ;;  %v705_v29 = vmul.f32 %v400_v21, %v400_v21 }
  0xf6   :  { %v1589_v26 = vpop.f32.mrf.mxu0  ;;  %v1895_v27 = vpop.f32.mrf.mxu1 }
  0xf7   :  { %v635_v28 = vadd.f32 %v634_v25, %v400_v21  ;;  %v767_v30 = vadd.f32 %v766_v24, %v704_v23  ;;  %v1359_v31 = vpack.c.bf16 %v1589_v26, %v1588_v15  ;;  %v1439_v33 = vpack.c.bf16 %v1895_v27, %v1885_v17 }
  0xf8   :  { %v403_v32 = vpop.f32.mrf.mxu0  ;;  %v1899_v34 = vpop.f32.mrf.mxu1  ;;  %v708_v51 = vmul.f32 %v1589_v26, %v1589_v26 }
  0xf9   :  { %v768_v35 = vadd.f32 %v767_v30, %v705_v29  ;;  %1495 = vst [vmem:[%s2140_s2 + $0x28] sm:$0xff] %v1359_v31   ;;  %v636_v36 = vadd.f32 %v635_v28, %v403_v32  ;;  %v706_v37 = vmul.f32 %v403_v32, %v403_v32  ;;  %v1354_v38 = vpack.c.bf16 %v403_v32, %v400_v21 }
  0xfa   :  { %v1592_v39 = vpop.f32.mrf.mxu0  ;;  %1511 = vst [vmem:[%s2140_s2 + $0xa8] sm:$0xff] %v1439_v33   ;;  %v1434_v40 = vpack.c.bf16 %v1899_v34, %v1893_v22  ;;  %v1909_v42 = vpop.f32.mrf.mxu1 }
  0xfb   :  { %v637_v45 = vadd.f32 %v1588_v15, %v636_v36  ;;  %v769_v47 = vadd.f32 %v768_v35, %v706_v37  ;;  %1494 = vst [vmem:[%s2140_s2 + $0x20] sm:$0xff] %v1354_v38   ;;  %v711_v9 = vmul.f32 %v1592_v39, %v1592_v39 }
  0xfc   :  { %v416_v48 = vpop.f32.mrf.mxu0  ;;  %1510 = vst [vmem:[%s2140_s2 + $0xa0] sm:$0xff] %v1434_v40   ;;  %v1917_v49 = vpop.f32.mrf.mxu1 }
  0xfd   :  { %v770_v52 = vadd.f32 %v769_v47, %v707_v43  ;;  %v638_v53 = vadd.f32 %v1589_v26, %v637_v45  ;;  %v709_v58 = vmul.f32 %v416_v48, %v416_v48 }
  0xfe   :  { %v1593_v54 = vpop.f32.mrf.mxu0  ;;  %v1919_v55 = vpop.f32.mrf.mxu1 }
  0xff   :  { %v639_v56 = vadd.f32 %v638_v53, %v416_v48  ;;  %v771_v59 = vadd.f32 %v770_v52, %v708_v51  ;;  %v1369_v60 = vpack.c.bf16 %v1593_v54, %v1592_v39  ;;  %v1449_v63 = vpack.c.bf16 %v1919_v55, %v1909_v42 }
 0x100   :  { %v419_v61 = vpop.f32.mrf.mxu0  ;;  %v1923_v0 = vpop.f32.mrf.mxu1  ;;  %v712_v15 = vmul.f32 %v1593_v54, %v1593_v54 }
 0x101   :  { %v772_v1 = vadd.f32 %v771_v59, %v709_v58  ;;  %1497 = vst [vmem:[%s2140_s2 + $0x38] sm:$0xff] %v1369_v60   ;;  %v640_v2 = vadd.f32 %v639_v56, %v419_v61  ;;  %v710_v4 = vmul.f32 %v419_v61, %v419_v61  ;;  %v1364_v5 = vpack.c.bf16 %v419_v61, %v416_v48 }
 0x102   :  { %v1596_v6 = vpop.f32.mrf.mxu0  ;;  %1513 = vst [vmem:[%s2140_s2 + $0xb8] sm:$0xff] %v1449_v63   ;;  %v1444_v7 = vpack.c.bf16 %v1923_v0, %v1917_v49  ;;  %v1933_v8 = vpop.f32.mrf.mxu1 }
 0x103   :  { %v641_v11 = vadd.f32 %v1592_v39, %v640_v2  ;;  %v773_v12 = vadd.f32 %v772_v1, %v710_v4  ;;  %1496 = vst [vmem:[%s2140_s2 + $0x30] sm:$0xff] %v1364_v5   ;;  %v715_v38 = vmul.f32 %v1596_v6, %v1596_v6 }
 0x104   :  { %v432_v13 = vpop.f32.mrf.mxu0  ;;  %1512 = vst [vmem:[%s2140_s2 + $0xb0] sm:$0xff] %v1444_v7   ;;  %v1941_v14 = vpop.f32.mrf.mxu1 }
 0x105   :  { %v774_v16 = vadd.f32 %v773_v12, %v711_v9  ;;  %v642_v18 = vadd.f32 %v1593_v54, %v641_v11  ;;  %v713_v23 = vmul.f32 %v432_v13, %v432_v13 }
 0x106   :  { %v1597_v19 = vpop.f32.mrf.mxu0  ;;  %v1943_v20 = vpop.f32.mrf.mxu1 }
 0x107   :  { %v643_v21 = vadd.f32 %v642_v18, %v432_v13  ;;  %v775_v24 = vadd.f32 %v774_v16, %v712_v15  ;;  %v1379_v25 = vpack.c.bf16 %v1597_v19, %v1596_v6  ;;  %v1459_v28 = vpack.c.bf16 %v1943_v20, %v1933_v8 }
 0x108   :  { %v435_v26 = vpop.f32.mrf.mxu0  ;;  %v1947_v29 = vpop.f32.mrf.mxu1  ;;  %v716_v47 = vmul.f32 %v1597_v19, %v1597_v19 }
 0x109   :  { %v776_v30 = vadd.f32 %v775_v24, %v713_v23  ;;  %1499 = vst [vmem:[%s2140_s2 + $0x48] sm:$0xff] %v1379_v25   ;;  %v644_v31 = vadd.f32 %v643_v21, %v435_v26  ;;  %v714_v32 = vmul.f32 %v435_v26, %v435_v26  ;;  %v1374_v33 = vpack.c.bf16 %v435_v26, %v432_v13 }
 0x10a   :  { %v1600_v35 = vpop.f32.mrf.mxu0  ;;  %1515 = vst [vmem:[%s2140_s2 + $0xc8] sm:$0xff] %v1459_v28   ;;  %v1454_v36 = vpack.c.bf16 %v1947_v29, %v1941_v14  ;;  %v1957_v37 = vpop.f32.mrf.mxu1 }
 0x10b   :  { %v645_v39 = vadd.f32 %v1596_v6, %v644_v31  ;;  %v777_v40 = vadd.f32 %v776_v30, %v714_v32  ;;  %1498 = vst [vmem:[%s2140_s2 + $0x40] sm:$0xff] %v1374_v33   ;;  %v719_v11 = vmul.f32 %v1600_v35, %v1600_v35 }
 0x10c   :  { %v448_v43 = vpop.f32.mrf.mxu0  ;;  %1514 = vst [vmem:[%s2140_s2 + $0xc0] sm:$0xff] %v1454_v36   ;;  %v1965_v45 = vpop.f32.mrf.mxu1 }
 0x10d   :  { %v778_v48 = vadd.f32 %v777_v40, %v715_v38  ;;  %v646_v51 = vadd.f32 %v1597_v19, %v645_v39  ;;  %v717_v56 = vmul.f32 %v448_v43, %v448_v43 }
 0x10e   :  { %v1601_v52 = vpop.f32.mrf.mxu0  ;;  %v1967_v53 = vpop.f32.mrf.mxu1 }
 0x10f   :  { %v647_v54 = vadd.f32 %v646_v51, %v448_v43  ;;  %v779_v58 = vadd.f32 %v778_v48, %v716_v47  ;;  %v1389_v59 = vpack.c.bf16 %v1601_v52, %v1600_v35  ;;  %v1469_v61 = vpack.c.bf16 %v1967_v53, %v1957_v37 }
 0x110   :  { %v451_v60 = vpop.f32.mrf.mxu0  ;;  %v1971_v63 = vpop.f32.mrf.mxu1  ;;  %v720_v18 = vmul.f32 %v1601_v52, %v1601_v52 }
 0x111   :  { %v780_v1 = vadd.f32 %v779_v58, %v717_v56  ;;  %1501 = vst [vmem:[%s2140_s2 + $0x58] sm:$0xff] %v1389_v59   ;;  %v648_v2 = vadd.f32 %v647_v54, %v451_v60  ;;  %v718_v4 = vmul.f32 %v451_v60, %v451_v60  ;;  %v1384_v5 = vpack.c.bf16 %v451_v60, %v448_v43 }
 0x112   :  { %v1604_v6 = vpop.f32.mrf.mxu0  ;;  %1517 = vst [vmem:[%s2140_s2 + $0xd8] sm:$0xff] %v1469_v61   ;;  %v1464_v7 = vpack.c.bf16 %v1971_v63, %v1965_v45  ;;  %v1981_v9 = vpop.f32.mrf.mxu1 }
 0x113   :  { %v649_v12 = vadd.f32 %v1600_v35, %v648_v2  ;;  %v781_v13 = vadd.f32 %v780_v1, %v718_v4  ;;  %1500 = vst [vmem:[%s2140_s2 + $0x50] sm:$0xff] %v1384_v5   ;;  %v723_v48 = vmul.f32 %v1604_v6, %v1604_v6 }
 0x114   :  { %v464_v15 = vpop.f32.mrf.mxu0  ;;  %1516 = vst [vmem:[%s2140_s2 + $0xd0] sm:$0xff] %v1464_v7   ;;  %v1989_v16 = vpop.f32.mrf.mxu1 }
 0x115   :  { %v782_v19 = vadd.f32 %v781_v13, %v719_v11  ;;  %v650_v21 = vadd.f32 %v1601_v52, %v649_v12  ;;  %v721_v26 = vmul.f32 %v464_v15, %v464_v15 }
 0x116   :  { %v1605_v23 = vpop.f32.mrf.mxu0  ;;  %v1991_v24 = vpop.f32.mrf.mxu1 }
 0x117   :  { %v651_v25 = vadd.f32 %v650_v21, %v464_v15  ;;  %v783_v28 = vadd.f32 %v782_v19, %v720_v18  ;;  %v1399_v30 = vpack.c.bf16 %v1605_v23, %v1604_v6  ;;  %v1479_v32 = vpack.c.bf16 %v1991_v24, %v1981_v9 }
 0x118   :  { %v467_v31 = vpop.f32.mrf.mxu0  ;;  %v1995_v33 = vpop.f32.mrf.mxu1  ;;  %v724_v58 = vmul.f32 %v1605_v23, %v1605_v23 }
 0x119   :  { %v784_v35 = vadd.f32 %v783_v28, %v721_v26  ;;  %1503 = vst [vmem:[%s2140_s2 + $0x68] sm:$0xff] %v1399_v30   ;;  %v652_v36 = vadd.f32 %v651_v25, %v467_v31  ;;  %v722_v38 = vmul.f32 %v467_v31, %v467_v31  ;;  %v1394_v39 = vpack.c.bf16 %v467_v31, %v464_v15 }
 0x11a   :  { %v1608_v40 = vpop.f32.mrf.mxu0  ;;  %1519 = vst [vmem:[%s2140_s2 + $0xe8] sm:$0xff] %v1479_v32   ;;  %v1474_v43 = vpack.c.bf16 %v1995_v33, %v1989_v16  ;;  %v2005_v47 = vpop.f32.mrf.mxu1  ;;  %v729_v32 = vmul.f32 %v1845_v44, %v1845_v44 }
 0x11b   :  { %v653_v51 = vadd.f32 %v1604_v6, %v652_v36  ;;  %v785_v52 = vadd.f32 %v784_v35, %v722_v38  ;;  %1502 = vst [vmem:[%s2140_s2 + $0x60] sm:$0xff] %v1394_v39   ;;  %v730_v39 = vmul.f32 %v1851_v50, %v1851_v50 }
 0x11c   :  { %v480_v54 = vpop.f32.mrf.mxu0  ;;  %1518 = vst [vmem:[%s2140_s2 + $0xe0] sm:$0xff] %v1474_v43   ;;  %v2013_v56 = vpop.f32.mrf.mxu1  ;;  %v731_v43 = vmul.f32 %v1840_v41, %v1840_v41 }
 0x11d   :  { %v786_v59 = vadd.f32 %v785_v52, %v723_v48  ;;  %v654_v60 = vadd.f32 %v1605_v23, %v653_v51  ;;  %v725_v4 = vmul.f32 %v480_v54, %v480_v54  ;;  %v727_v23 = vmul.f32 %v1608_v40, %v1608_v40 }
 0x11e   :  { %v1609_v61 = vpop.f32.mrf.mxu0  ;;  %v2015_v1 = vpop.f32.mrf.mxu1  ;;  %v732_v52 = vmul.f32 %v1847_v46, %v1847_v46 }
 0x11f   :  { %v655_v2 = vadd.f32 %v654_v60, %v480_v54  ;;  %v787_v5 = vadd.f32 %v786_v59, %v724_v58  ;;  %v1409_v6 = vpack.c.bf16 %v1609_v61, %v1608_v40  ;;  %v1489_v11 = vpack.c.bf16 %v2015_v1, %v2005_v47 }
 0x120   :  { %v483_v7 = vpop.f32.mrf.mxu0  ;;  %v2019_v12 = vpop.f32.mrf.mxu1  ;;  %v728_v28 = vmul.f32 %v1609_v61, %v1609_v61  ;;  %v733_v59 = vmul.f32 %v1869_v62, %v1869_v62 }
 0x121   :  { %v788_v13 = vadd.f32 %v787_v5, %v725_v4  ;;  %1505 = vst [vmem:[%s2140_s2 + $0x78] sm:$0xff] %v1409_v6   ;;  %v656_v15 = vadd.f32 %v655_v2, %v483_v7  ;;  %v726_v18 = vmul.f32 %v483_v7, %v483_v7  ;;  %v1404_v19 = vpack.c.bf16 %v483_v7, %v480_v54 }
 0x122   :  { %1521 = vst [vmem:[%s2140_s2 + $0xf8] sm:$0xff] %v1489_v11   ;;  %v1484_v21 = vpack.c.bf16 %v2019_v12, %v2013_v56  ;;  %v734_v2 = vmul.f32 %v1875_v10, %v1875_v10  ;;  %v737_v11 = vmul.f32 %v1893_v22, %v1893_v22 }
 0x123   :  { %v657_v25 = vadd.f32 %v1608_v40, %v656_v15  ;;  %v789_v26 = vadd.f32 %v788_v13, %v726_v18  ;;  %1504 = vst [vmem:[%s2140_s2 + $0x70] sm:$0xff] %v1404_v19   ;;  %v738_v18 = vmul.f32 %v1899_v34, %v1899_v34 }
 0x124   :  { %1520 = vst [vmem:[%s2140_s2 + $0xf0] sm:$0xff] %v1484_v21  }
 0x125   :  { %v658_v30 = vadd.f32 %v1609_v61, %v657_v25  ;;  %v790_v31 = vadd.f32 %v789_v26, %v727_v23  ;;  %v741_v26 = vmul.f32 %v1917_v49, %v1917_v49 }
 0x127   :  { %v791_v35 = vadd.f32 %v790_v31, %v728_v28  ;;  %v659_v36 = vadd.f32 %v658_v30, %v1845_v44  ;;  %v742_v31 = vmul.f32 %v1923_v0, %v1923_v0 }
 0x129   :  { %v660_v38 = vadd.f32 %v659_v36, %v1851_v50  ;;  %v792_v40 = vadd.f32 %v791_v35, %v729_v32 }
 0x12b   :  { %v661_v48 = vadd.f32 %v1840_v41, %v660_v38  ;;  %v793_v51 = vadd.f32 %v792_v40, %v730_v39  ;;  %v735_v41 = vmul.f32 %v1861_v57, %v1861_v57  ;;  %v745_v39 = vmul.f32 %v1941_v14, %v1941_v14 }
 0x12d   :  { %v794_v54 = vadd.f32 %v793_v51, %v731_v43  ;;  %v662_v58 = vadd.f32 %v1847_v46, %v661_v48  ;;  %v736_v46 = vmul.f32 %v1871_v3, %v1871_v3  ;;  %v746_v48 = vmul.f32 %v1947_v29, %v1947_v29 }
 0x12f   :  { %v663_v44 = vadd.f32 %v662_v58, %v1869_v62  ;;  %v795_v60 = vadd.f32 %v794_v54, %v732_v52 }
 0x131   :  { %v796_v50 = vadd.f32 %v795_v60, %v733_v59  ;;  %v664_v61 = vadd.f32 %v663_v44, %v1875_v10  ;;  %v749_v44 = vmul.f32 %v1965_v45, %v1965_v45 }
 0x133   :  { %v665_v4 = vadd.f32 %v1861_v57, %v664_v61  ;;  %v797_v5 = vadd.f32 %v796_v50, %v734_v2  ;;  %v739_v57 = vmul.f32 %v1885_v17, %v1885_v17  ;;  %v750_v50 = vmul.f32 %v1971_v63, %v1971_v63 }
 0x135   :  { %v798_v6 = vadd.f32 %v797_v5, %v735_v41  ;;  %v666_v7 = vadd.f32 %v1871_v3, %v665_v4  ;;  %v740_v3 = vmul.f32 %v1895_v27, %v1895_v27  ;;  %v753_v5 = vmul.f32 %v1989_v16, %v1989_v16 }
 0x137   :  { %v667_v62 = vadd.f32 %v666_v7, %v1893_v22  ;;  %v799_v13 = vadd.f32 %v798_v6, %v736_v46  ;;  %v754_v7 = vmul.f32 %v1995_v33, %v1995_v33 }
 0x139   :  { %v800_v15 = vadd.f32 %v799_v13, %v737_v11  ;;  %v668_v10 = vadd.f32 %v667_v62, %v1899_v34 }
 0x13b   :  { %v669_v19 = vadd.f32 %v1885_v17, %v668_v10  ;;  %v801_v21 = vadd.f32 %v800_v15, %v738_v18  ;;  %v743_v17 = vmul.f32 %v1909_v42, %v1909_v42  ;;  %v757_v10 = vmul.f32 %v2013_v56, %v2013_v56 }
 0x13d   :  { %v802_v23 = vadd.f32 %v801_v21, %v739_v57  ;;  %v670_v25 = vadd.f32 %v1895_v27, %v669_v19  ;;  %v744_v27 = vmul.f32 %v1919_v55, %v1919_v55  ;;  %v758_v19 = vmul.f32 %v2019_v12, %v2019_v12 }
 0x13f   :  { %v671_v22 = vadd.f32 %v670_v25, %v1917_v49  ;;  %v803_v28 = vadd.f32 %v802_v23, %v740_v3 }
 0x141   :  { %v804_v30 = vadd.f32 %v803_v28, %v741_v26  ;;  %v672_v34 = vadd.f32 %v671_v22, %v1923_v0 }
 0x143   :  { %v673_v32 = vadd.f32 %v1909_v42, %v672_v34  ;;  %v805_v35 = vadd.f32 %v804_v30, %v742_v31  ;;  %v747_v42 = vmul.f32 %v1933_v8, %v1933_v8 }
 0x145   :  { %v806_v36 = vadd.f32 %v805_v35, %v743_v17  ;;  %v674_v38 = vadd.f32 %v1919_v55, %v673_v32  ;;  %v748_v55 = vmul.f32 %v1943_v20, %v1943_v20 }
 0x147   :  { %v675_v49 = vadd.f32 %v674_v38, %v1941_v14  ;;  %v807_v40 = vadd.f32 %v806_v36, %v744_v27  ;;  %v830_v36 = vld [vmem:[%s2139_s3] sm:$0x3] }
 0x149   :  { %v808_v43 = vadd.f32 %v807_v40, %v745_v39  ;;  %v676_v0 = vadd.f32 %v675_v49, %v1947_v29 }
 0x14b   :  { %v677_v51 = vadd.f32 %v1933_v8, %v676_v0  ;;  %v809_v52 = vadd.f32 %v808_v43, %v746_v48  ;;  %v751_v8 = vmul.f32 %v1957_v37, %v1957_v37 }
 0x14d   :  { %v810_v54 = vadd.f32 %v809_v52, %v747_v42  ;;  %v678_v58 = vadd.f32 %v1943_v20, %v677_v51  ;;  %v752_v20 = vmul.f32 %v1967_v53, %v1967_v53 }
 0x14f   :  { %v679_v14 = vadd.f32 %v678_v58, %v1965_v45  ;;  %v811_v59 = vadd.f32 %v810_v54, %v748_v55 }
 0x151   :  { %v812_v60 = vadd.f32 %v811_v59, %v749_v44  ;;  %v680_v29 = vadd.f32 %v679_v14, %v1971_v63 }
 0x153   :  { %v681_v61 = vadd.f32 %v1957_v37, %v680_v29  ;;  %v813_v2 = vadd.f32 %v812_v60, %v750_v50  ;;  %v755_v37 = vmul.f32 %v1981_v9, %v1981_v9 }
 0x155   :  { %v814_v41 = vadd.f32 %v813_v2, %v751_v8  ;;  %v682_v4 = vadd.f32 %v1967_v53, %v681_v61  ;;  %v756_v53 = vmul.f32 %v1991_v24, %v1991_v24 }
 0x157   :  { %v683_v45 = vadd.f32 %v682_v4, %v1989_v16  ;;  %v815_v46 = vadd.f32 %v814_v41, %v752_v20 }
 0x159   :  { %v816_v6 = vadd.f32 %v815_v46, %v753_v5  ;;  %v684_v63 = vadd.f32 %v683_v45, %v1995_v33 }
 0x15b   :  { %v685_v62 = vadd.f32 %v1981_v9, %v684_v63  ;;  %v817_v11 = vadd.f32 %v816_v6, %v754_v7  ;;  %v759_v9 = vmul.f32 %v2005_v47, %v2005_v47 }
 0x15d   :  { %v818_v13 = vadd.f32 %v817_v11, %v755_v37  ;;  %v686_v15 = vadd.f32 %v1991_v24, %v685_v62  ;;  %v760_v24 = vmul.f32 %v2015_v1, %v2015_v1 }
 0x15f   :  { %v687_v16 = vadd.f32 %v686_v15, %v2013_v56  ;;  %v819_v18 = vadd.f32 %v818_v13, %v756_v53 }
 0x161   :  { %v820_v57 = vadd.f32 %v819_v18, %v757_v10  ;;  %v688_v33 = vadd.f32 %v687_v16, %v2019_v12 }
 0x163   :  { %v689_v21 = vadd.f32 %v2005_v47, %v688_v33  ;;  %v821_v3 = vadd.f32 %v820_v57, %v758_v19 }
 0x165   :  { %v690_v23 = vadd.f32 %v2015_v1, %v689_v21  ;;  %v822_v25 = vadd.f32 %v821_v3, %v759_v9 }
 0x167   :  { %v691_v56 = vrot.slane %v690_v23, 4  ;;  %v823_v22 = vadd.f32 %v822_v25, %v760_v24 }
 0x169   :  { %v692_v26 = vadd.f32 %v691_v56, %v690_v23  ;;  %v824_v28 = vrot.slane %v823_v22, 4 }
 0x16b   :  { %v693_v30 = vrot.slane %v692_v26, 2  ;;  %v825_v34 = vadd.f32 %v824_v28, %v823_v22 }
 0x16d   :  { %v694_v31 = vadd.f32 %v693_v30, %v692_v26  ;;  %v826_v12 = vrot.slane %v825_v34, 2 }
 0x16f   :  { %v695_v17 = vrot.slane %v694_v31, 1  ;;  %v827_v32 = vadd.f32 %v826_v12, %v825_v34 }
 0x171   :  { %v828_v35 = vrot.slane %v827_v32, 1  ;;  %v696_v47 = vadd.f32 %v695_v17, %v694_v31 }
 0x173   :  { %v829_v27 = vadd.f32 %v828_v35, %v827_v32 }
 0x175   :  { %v832_v1 = vsel %vm831_vm0, %v696_v47, %v829_v27 }
 0x176   :  { %v833_v38 = vadd.f32 %v832_v1, %v830_v36 }
 0x178   :  { %834 = vst [vmem:[%s2139_s3] sm:$0x3] %v833_v38 }

// kernel: bottleneck_forward.7
= control target key start
LH: loop header
LB: loop body
LE: loop exit
PB: predicated region body
PF: predicated region fallthrough
CT: control target
= control target key end

     0   :  { %s1502_s0 = inlined_call_operand.vmem [shape: bf16[512,128], index: 0, kind: input, shape index: {}]   ;;  %s1503_s1 = inlined_call_operand.vmem [shape: f32[1,128], index: 1, kind: input, shape index: {}]   ;;  %s1504_s2 = inlined_call_operand.vmem [shape: f32[1,128], index: 2, kind: input, shape index: {}]   ;;  %s1505_s3 = inlined_call_operand.vmem [shape: bf16[512,128], index: 3, kind: output, shape index: {}]  }
   0x1   :  { %v803_v0 = vld [vmem:[%s1502_s0] sm:$0xff]   ;;  %v1090_v4 = vld [vmem:[%s1502_s0 + $0x8] sm:$0xff]   ;;  %v1091_v5 = vld [vmem:[%s1502_s0 + $0x10] sm:$0xff]  }
   0x2   :  { %v1178_v1 = vld [vmem:[%s1503_s1] ss:$0 sm:$0xff]  ;;  %v804_v2 = vunpack.c.l.bf16 %v803_v0  ;;  %v805_v3 = vunpack.c.h.bf16 %v803_v0  ;;  %v1092_v6 = vld [vmem:[%s1502_s0 + $0x18] sm:$0xff]   ;;  %v808_v8 = vunpack.c.l.bf16 %v1090_v4  ;;  %v809_v9 = vunpack.c.h.bf16 %v1090_v4  ;;  %v1094_v33 = vld [vmem:[%s1502_s0 + $0x28] sm:$0xff]  }
   0x3   :  { %v1192_v7 = vld [vmem:[%s1504_s2] ss:$0 sm:$0xff]  ;;  %v812_v10 = vunpack.c.l.bf16 %v1091_v5  ;;  %v813_v11 = vunpack.c.h.bf16 %v1091_v5  ;;  %v816_v14 = vunpack.c.l.bf16 %v1092_v6  ;;  %v817_v15 = vunpack.c.h.bf16 %v1092_v6  ;;  %v1095_v38 = vld [vmem:[%s1502_s0 + $0x30] sm:$0xff]   ;;  %v1096_v43 = vld [vmem:[%s1502_s0 + $0x38] sm:$0xff]  }
   0x4   :  { %v149_v12 = vmul.f32 %v804_v2, %v1178_v1  ;;  %v150_v13 = vmul.f32 %v805_v3, %v1178_v1  ;;  %v151_v16 = vmul.f32 %v808_v8, %v1178_v1  ;;  %v152_v17 = vmul.f32 %v809_v9, %v1178_v1  ;;  %v1093_v28 = vld [vmem:[%s1502_s0 + $0x20] sm:$0xff]  }
   0x5   :  { %v153_v18 = vmul.f32 %v812_v10, %v1178_v1  ;;  %v154_v19 = vmul.f32 %v813_v11, %v1178_v1  ;;  %v155_v22 = vmul.f32 %v816_v14, %v1178_v1  ;;  %v156_v23 = vmul.f32 %v817_v15, %v1178_v1  ;;  %v1097_v0 = vld [vmem:[%s1502_s0 + $0x40] sm:$0xff]   ;;  %v1098_v11 = vld [vmem:[%s1502_s0 + $0x48] sm:$0xff]  }
   0x6   :  { %v220_v20 = vadd.f32 %v1192_v7, %v149_v12  ;;  %v221_v21 = vadd.f32 %v1192_v7, %v150_v13  ;;  %v222_v24 = vadd.f32 %v1192_v7, %v151_v16  ;;  %v223_v25 = vadd.f32 %v1192_v7, %v152_v17  ;;  %v1099_v16 = vld [vmem:[%s1502_s0 + $0x50] sm:$0xff]  }
   0x7   :  { %v224_v26 = vadd.f32 %v1192_v7, %v153_v18  ;;  %v225_v27 = vadd.f32 %v1192_v7, %v154_v19  ;;  %v226_v31 = vadd.f32 %v1192_v7, %v155_v22  ;;  %v227_v32 = vadd.f32 %v1192_v7, %v156_v23 }
   0x8   :  { %v284_v29 = vmax.f32 %v220_v20, 0.0  ;;  %v285_v30 = vmax.f32 %v221_v21, 0.0  ;;  %v286_v34 = vmax.f32 %v222_v24, 0.0  ;;  %v287_v35 = vmax.f32 %v223_v25, 0.0  ;;  %v1100_v25 = vld [vmem:[%s1502_s0 + $0x58] sm:$0xff]  }
   0x9   :  { %v288_v36 = vmax.f32 %v224_v26, 0.0  ;;  %v289_v37 = vmax.f32 %v225_v27, 0.0  ;;  %v290_v40 = vmax.f32 %v226_v31, 0.0  ;;  %v291_v41 = vmax.f32 %v227_v32, 0.0 }
   0xa   :  { %v933_v39 = vpack.c.bf16 %v285_v30, %v284_v29  ;;  %v820_v42 = vunpack.c.l.bf16 %v1093_v28  ;;  %v938_v44 = vpack.c.bf16 %v287_v35, %v286_v34  ;;  %v821_v46 = vunpack.c.h.bf16 %v1093_v28 }
   0xb   :  { %v943_v45 = vpack.c.bf16 %v289_v37, %v288_v36  ;;  %v824_v47 = vunpack.c.l.bf16 %v1094_v33  ;;  %v948_v48 = vpack.c.bf16 %v291_v41, %v290_v40  ;;  %v825_v50 = vunpack.c.h.bf16 %v1094_v33 }
   0xc   :  { %934 = vst [vmem:[%s1505_s3] sm:$0xff] %v933_v39   ;;  %v157_v49 = vmul.f32 %v820_v42, %v1178_v1  ;;  %v828_v51 = vunpack.c.l.bf16 %v1095_v38  ;;  %1121 = vst [vmem:[%s1505_s3 + $0x8] sm:$0xff] %v938_v44   ;;  %v158_v52 = vmul.f32 %v821_v46, %v1178_v1  ;;  %v829_v54 = vunpack.c.h.bf16 %v1095_v38  ;;  %v1101_v38 = vld [vmem:[%s1502_s0 + $0x60] sm:$0xff]  }
   0xd   :  { %1122 = vst [vmem:[%s1505_s3 + $0x10] sm:$0xff] %v943_v45   ;;  %v159_v53 = vmul.f32 %v824_v47, %v1178_v1  ;;  %v832_v55 = vunpack.c.l.bf16 %v1096_v43  ;;  %1123 = vst [vmem:[%s1505_s3 + $0x18] sm:$0xff] %v948_v48   ;;  %v160_v57 = vmul.f32 %v825_v50, %v1178_v1  ;;  %v833_v59 = vunpack.c.h.bf16 %v1096_v43 }
   0xe   :  { %v228_v56 = vadd.f32 %v1192_v7, %v157_v49  ;;  %v161_v58 = vmul.f32 %v828_v51, %v1178_v1  ;;  %v229_v60 = vadd.f32 %v1192_v7, %v158_v52  ;;  %v162_v62 = vmul.f32 %v829_v54, %v1178_v1  ;;  %v1102_v51 = vld [vmem:[%s1502_s0 + $0x68] sm:$0xff]  }
   0xf   :  { %v230_v61 = vadd.f32 %v1192_v7, %v159_v53  ;;  %v163_v63 = vmul.f32 %v832_v55, %v1178_v1  ;;  %v231_v3 = vadd.f32 %v1192_v7, %v160_v57  ;;  %v164_v5 = vmul.f32 %v833_v59, %v1178_v1 }
  0x10   :  { %v292_v2 = vmax.f32 %v228_v56, 0.0  ;;  %v232_v4 = vadd.f32 %v1192_v7, %v161_v58  ;;  %v293_v6 = vmax.f32 %v229_v60, 0.0  ;;  %v233_v9 = vadd.f32 %v1192_v7, %v162_v62  ;;  %v1103_v60 = vld [vmem:[%s1502_s0 + $0x70] sm:$0xff]  }
  0x11   :  { %v294_v8 = vmax.f32 %v230_v61, 0.0  ;;  %v234_v10 = vadd.f32 %v1192_v7, %v163_v63  ;;  %v295_v12 = vmax.f32 %v231_v3, 0.0  ;;  %v235_v14 = vadd.f32 %v1192_v7, %v164_v5 }
  0x12   :  { %v296_v13 = vmax.f32 %v232_v4, 0.0  ;;  %v836_v15 = vunpack.c.l.bf16 %v1097_v0  ;;  %v953_v17 = vpack.c.bf16 %v293_v6, %v292_v2  ;;  %v297_v18 = vmax.f32 %v233_v9, 0.0  ;;  %v1104_v2 = vld [vmem:[%s1502_s0 + $0x78] sm:$0xff]  }
  0x13   :  { %v298_v19 = vmax.f32 %v234_v10, 0.0  ;;  %v837_v20 = vunpack.c.h.bf16 %v1097_v0  ;;  %v958_v21 = vpack.c.bf16 %v295_v12, %v294_v8  ;;  %v299_v22 = vmax.f32 %v235_v14, 0.0  ;;  %v1105_v12 = vld [vmem:[%s1502_s0 + $0x80] sm:$0xff]  }
  0x14   :  { %v165_v23 = vmul.f32 %v836_v15, %v1178_v1  ;;  %v840_v24 = vunpack.c.l.bf16 %v1098_v11  ;;  %1124 = vst [vmem:[%s1505_s3 + $0x20] sm:$0xff] %v953_v17   ;;  %v963_v26 = vpack.c.bf16 %v297_v18, %v296_v13  ;;  %v841_v28 = vunpack.c.h.bf16 %v1098_v11 }
  0x15   :  { %v166_v27 = vmul.f32 %v837_v20, %v1178_v1  ;;  %v844_v29 = vunpack.c.l.bf16 %v1099_v16  ;;  %1125 = vst [vmem:[%s1505_s3 + $0x28] sm:$0xff] %v958_v21   ;;  %v968_v30 = vpack.c.bf16 %v299_v22, %v298_v19  ;;  %v845_v33 = vunpack.c.h.bf16 %v1099_v16 }
  0x16   :  { %v236_v31 = vadd.f32 %v1192_v7, %v165_v23  ;;  %v167_v32 = vmul.f32 %v840_v24, %v1178_v1  ;;  %1126 = vst [vmem:[%s1505_s3 + $0x30] sm:$0xff] %v963_v26   ;;  %v168_v35 = vmul.f32 %v841_v28, %v1178_v1  ;;  %v848_v37 = vunpack.c.l.bf16 %v1100_v25 }
  0x17   :  { %v237_v34 = vadd.f32 %v1192_v7, %v166_v27  ;;  %v169_v36 = vmul.f32 %v844_v29, %v1178_v1  ;;  %1127 = vst [vmem:[%s1505_s3 + $0x38] sm:$0xff] %v968_v30   ;;  %v170_v41 = vmul.f32 %v845_v33, %v1178_v1  ;;  %v849_v42 = vunpack.c.h.bf16 %v1100_v25  ;;  %v1106_v29 = vld [vmem:[%s1502_s0 + $0x88] sm:$0xff]  }
  0x18   :  { %v300_v39 = vmax.f32 %v236_v31, 0.0  ;;  %v238_v40 = vadd.f32 %v1192_v7, %v167_v32  ;;  %v239_v44 = vadd.f32 %v1192_v7, %v168_v35  ;;  %v171_v46 = vmul.f32 %v848_v37, %v1178_v1 }
  0x19   :  { %v301_v43 = vmax.f32 %v237_v34, 0.0  ;;  %v240_v45 = vadd.f32 %v1192_v7, %v169_v36  ;;  %v241_v48 = vadd.f32 %v1192_v7, %v170_v41  ;;  %v172_v49 = vmul.f32 %v849_v42, %v1178_v1  ;;  %v1107_v34 = vld [vmem:[%s1502_s0 + $0x90] sm:$0xff]  }
  0x1a   :  { %v302_v47 = vmax.f32 %v238_v40, 0.0  ;;  %v852_v50 = vunpack.c.l.bf16 %v1101_v38  ;;  %v303_v53 = vmax.f32 %v239_v44, 0.0  ;;  %v242_v55 = vadd.f32 %v1192_v7, %v171_v46 }
  0x1b   :  { %v973_v52 = vpack.c.bf16 %v301_v43, %v300_v39  ;;  %v304_v54 = vmax.f32 %v240_v45, 0.0  ;;  %v305_v56 = vmax.f32 %v241_v48, 0.0  ;;  %v243_v57 = vadd.f32 %v1192_v7, %v172_v49  ;;  %v1108_v43 = vld [vmem:[%s1502_s0 + $0x98] sm:$0xff]  }
  0x1c   :  { %v853_v58 = vunpack.c.h.bf16 %v1101_v38  ;;  %v173_v59 = vmul.f32 %v852_v50, %v1178_v1  ;;  %v978_v61 = vpack.c.bf16 %v303_v53, %v302_v47  ;;  %v306_v62 = vmax.f32 %v242_v55, 0.0 }
  0x1d   :  { %1128 = vst [vmem:[%s1505_s3 + $0x40] sm:$0xff] %v973_v52   ;;  %v856_v63 = vunpack.c.l.bf16 %v1102_v51  ;;  %v857_v0 = vunpack.c.h.bf16 %v1102_v51  ;;  %v983_v3 = vpack.c.bf16 %v305_v56, %v304_v54  ;;  %v307_v4 = vmax.f32 %v243_v57, 0.0  ;;  %v1109_v56 = vld [vmem:[%s1502_s0 + $0xa0] sm:$0xff]  }
  0x1e   :  { %v174_v5 = vmul.f32 %v853_v58, %v1178_v1  ;;  %v244_v6 = vadd.f32 %v1192_v7, %v173_v59  ;;  %1129 = vst [vmem:[%s1505_s3 + $0x48] sm:$0xff] %v978_v61   ;;  %v860_v10 = vunpack.c.l.bf16 %v1103_v60  ;;  %v861_v11 = vunpack.c.h.bf16 %v1103_v60 }
  0x1f   :  { %v175_v8 = vmul.f32 %v856_v63, %v1178_v1  ;;  %v176_v9 = vmul.f32 %v857_v0, %v1178_v1  ;;  %1130 = vst [vmem:[%s1505_s3 + $0x50] sm:$0xff] %v983_v3   ;;  %v988_v13 = vpack.c.bf16 %v307_v4, %v306_v62  ;;  %v864_v16 = vunpack.c.l.bf16 %v1104_v2 }
  0x20   :  { %v245_v14 = vadd.f32 %v1192_v7, %v174_v5  ;;  %v308_v15 = vmax.f32 %v244_v6, 0.0  ;;  %v177_v19 = vmul.f32 %v860_v10, %v1178_v1  ;;  %v178_v20 = vmul.f32 %v861_v11, %v1178_v1 }
  0x21   :  { %v246_v17 = vadd.f32 %v1192_v7, %v175_v8  ;;  %v247_v18 = vadd.f32 %v1192_v7, %v176_v9  ;;  %1131 = vst [vmem:[%s1505_s3 + $0x58] sm:$0xff] %v988_v13   ;;  %v865_v22 = vunpack.c.h.bf16 %v1104_v2  ;;  %v179_v23 = vmul.f32 %v864_v16, %v1178_v1  ;;  %v1110_v2 = vld [vmem:[%s1502_s0 + $0xa8] sm:$0xff]   ;;  %v1111_v16 = vld [vmem:[%s1502_s0 + $0xb0] sm:$0xff]  }
  0x22   :  { %v309_v21 = vmax.f32 %v245_v14, 0.0  ;;  %v868_v24 = vunpack.c.l.bf16 %v1105_v12  ;;  %v248_v27 = vadd.f32 %v1192_v7, %v177_v19  ;;  %v249_v28 = vadd.f32 %v1192_v7, %v178_v20 }
  0x23   :  { %v310_v25 = vmax.f32 %v246_v17, 0.0  ;;  %v311_v26 = vmax.f32 %v247_v18, 0.0  ;;  %v180_v31 = vmul.f32 %v865_v22, %v1178_v1  ;;  %v250_v32 = vadd.f32 %v1192_v7, %v179_v23 }
  0x24   :  { %v993_v30 = vpack.c.bf16 %v309_v21, %v308_v15  ;;  %v869_v33 = vunpack.c.h.bf16 %v1105_v12  ;;  %v312_v36 = vmax.f32 %v248_v27, 0.0  ;;  %v313_v37 = vmax.f32 %v249_v28, 0.0  ;;  %v1112_v21 = vld [vmem:[%s1502_s0 + $0xb8] sm:$0xff]  }
  0x25   :  { %v998_v35 = vpack.c.bf16 %v311_v26, %v310_v25  ;;  %v181_v38 = vmul.f32 %v868_v24, %v1178_v1  ;;  %v251_v39 = vadd.f32 %v1192_v7, %v180_v31  ;;  %v314_v40 = vmax.f32 %v250_v32, 0.0 }
  0x26   :  { %1132 = vst [vmem:[%s1505_s3 + $0x60] sm:$0xff] %v993_v30   ;;  %v182_v41 = vmul.f32 %v869_v33, %v1178_v1  ;;  %v872_v42 = vunpack.c.l.bf16 %v1106_v29  ;;  %v1003_v44 = vpack.c.bf16 %v313_v37, %v312_v36  ;;  %v873_v46 = vunpack.c.h.bf16 %v1106_v29 }
  0x27   :  { %1133 = vst [vmem:[%s1505_s3 + $0x68] sm:$0xff] %v998_v35   ;;  %v252_v45 = vadd.f32 %v1192_v7, %v181_v38  ;;  %v876_v47 = vunpack.c.l.bf16 %v1107_v34  ;;  %v315_v48 = vmax.f32 %v251_v39, 0.0  ;;  %v877_v51 = vunpack.c.h.bf16 %v1107_v34  ;;  %v1113_v34 = vld [vmem:[%s1502_s0 + $0xc0] sm:$0xff]  }
  0x28   :  { %v253_v49 = vadd.f32 %v1192_v7, %v182_v41  ;;  %v183_v50 = vmul.f32 %v872_v42, %v1178_v1  ;;  %1134 = vst [vmem:[%s1505_s3 + $0x70] sm:$0xff] %v1003_v44   ;;  %v184_v53 = vmul.f32 %v873_v46, %v1178_v1  ;;  %v880_v55 = vunpack.c.l.bf16 %v1108_v43 }
  0x29   :  { %v316_v52 = vmax.f32 %v252_v45, 0.0  ;;  %v185_v54 = vmul.f32 %v876_v47, %v1178_v1  ;;  %v1008_v57 = vpack.c.bf16 %v315_v48, %v314_v40  ;;  %v186_v60 = vmul.f32 %v877_v51, %v1178_v1  ;;  %v1114_v47 = vld [vmem:[%s1502_s0 + $0xc8] sm:$0xff]  }
  0x2a   :  { %v317_v58 = vmax.f32 %v253_v49, 0.0  ;;  %v254_v59 = vadd.f32 %v1192_v7, %v183_v50  ;;  %v255_v61 = vadd.f32 %v1192_v7, %v184_v53  ;;  %v881_v63 = vunpack.c.h.bf16 %v1108_v43 }
  0x2b   :  { %v256_v62 = vadd.f32 %v1192_v7, %v185_v54  ;;  %v187_v0 = vmul.f32 %v880_v55, %v1178_v1  ;;  %1135 = vst [vmem:[%s1505_s3 + $0x78] sm:$0xff] %v1008_v57   ;;  %v257_v5 = vadd.f32 %v1192_v7, %v186_v60  ;;  %v884_v6 = vunpack.c.l.bf16 %v1109_v56 }
  0x2c   :  { %v1013_v3 = vpack.c.bf16 %v317_v58, %v316_v52  ;;  %v318_v4 = vmax.f32 %v254_v59, 0.0  ;;  %v319_v8 = vmax.f32 %v255_v61, 0.0  ;;  %v188_v10 = vmul.f32 %v881_v63, %v1178_v1  ;;  %v1115_v52 = vld [vmem:[%s1502_s0 + $0xd0] sm:$0xff]   ;;  %v1116_v61 = vld [vmem:[%s1502_s0 + $0xd8] sm:$0xff]  }
  0x2d   :  { %v320_v9 = vmax.f32 %v256_v62, 0.0  ;;  %v258_v11 = vadd.f32 %v1192_v7, %v187_v0  ;;  %v321_v12 = vmax.f32 %v257_v5, 0.0  ;;  %v885_v13 = vunpack.c.h.bf16 %v1109_v56 }
  0x2e   :  { %1136 = vst [vmem:[%s1505_s3 + $0x80] sm:$0xff] %v1013_v3   ;;  %v189_v14 = vmul.f32 %v884_v6, %v1178_v1  ;;  %v888_v15 = vunpack.c.l.bf16 %v1110_v2  ;;  %v1018_v17 = vpack.c.bf16 %v319_v8, %v318_v4  ;;  %v259_v18 = vadd.f32 %v1192_v7, %v188_v10 }
  0x2f   :  { %v322_v19 = vmax.f32 %v258_v11, 0.0  ;;  %v889_v20 = vunpack.c.h.bf16 %v1110_v2  ;;  %v1023_v22 = vpack.c.bf16 %v321_v12, %v320_v9  ;;  %v190_v23 = vmul.f32 %v885_v13, %v1178_v1  ;;  %v1117_v12 = vld [vmem:[%s1502_s0 + $0xe0] sm:$0xff]  }
  0x30   :  { %v260_v24 = vadd.f32 %v1192_v7, %v189_v14  ;;  %v191_v25 = vmul.f32 %v888_v15, %v1178_v1  ;;  %1137 = vst [vmem:[%s1505_s3 + $0x88] sm:$0xff] %v1018_v17   ;;  %v323_v26 = vmax.f32 %v259_v18, 0.0  ;;  %v892_v28 = vunpack.c.l.bf16 %v1111_v16 }
  0x31   :  { %v192_v27 = vmul.f32 %v889_v20, %v1178_v1  ;;  %v893_v29 = vunpack.c.h.bf16 %v1111_v16  ;;  %1138 = vst [vmem:[%s1505_s3 + $0x90] sm:$0xff] %v1023_v22   ;;  %v261_v30 = vadd.f32 %v1192_v7, %v190_v23  ;;  %v896_v33 = vunpack.c.l.bf16 %v1112_v21 }
  0x32   :  { %v324_v31 = vmax.f32 %v260_v24, 0.0  ;;  %v262_v32 = vadd.f32 %v1192_v7, %v191_v25  ;;  %v1028_v35 = vpack.c.bf16 %v323_v26, %v322_v19  ;;  %v193_v37 = vmul.f32 %v892_v28, %v1178_v1 }
  0x33   :  { %v263_v36 = vadd.f32 %v1192_v7, %v192_v27  ;;  %v194_v38 = vmul.f32 %v893_v29, %v1178_v1  ;;  %v325_v39 = vmax.f32 %v261_v30, 0.0  ;;  %v897_v41 = vunpack.c.h.bf16 %v1112_v21  ;;  %v1118_v21 = vld [vmem:[%s1502_s0 + $0xe8] sm:$0xff]  }
  0x34   :  { %v326_v40 = vmax.f32 %v262_v32, 0.0  ;;  %v195_v42 = vmul.f32 %v896_v33, %v1178_v1  ;;  %1139 = vst [vmem:[%s1505_s3 + $0x98] sm:$0xff] %v1028_v35   ;;  %v264_v44 = vadd.f32 %v1192_v7, %v193_v37  ;;  %v900_v46 = vunpack.c.l.bf16 %v1113_v34 }
  0x35   :  { %v327_v43 = vmax.f32 %v263_v36, 0.0  ;;  %v265_v45 = vadd.f32 %v1192_v7, %v194_v38  ;;  %v1033_v48 = vpack.c.bf16 %v325_v39, %v324_v31  ;;  %v196_v49 = vmul.f32 %v897_v41, %v1178_v1  ;;  %v1120_v39 = vld [vmem:[%s1502_s0 + $0xf8] sm:$0xff]  }
  0x36   :  { %v266_v50 = vadd.f32 %v1192_v7, %v195_v42  ;;  %v901_v51 = vunpack.c.h.bf16 %v1113_v34  ;;  %v328_v54 = vmax.f32 %v264_v44, 0.0  ;;  %v197_v56 = vmul.f32 %v900_v46, %v1178_v1  ;;  %v1119_v34 = vld [vmem:[%s1502_s0 + $0xf0] sm:$0xff]  }
  0x37   :  { %v1038_v53 = vpack.c.bf16 %v327_v43, %v326_v40  ;;  %v329_v55 = vmax.f32 %v265_v45, 0.0  ;;  %1140 = vst [vmem:[%s1505_s3 + $0xa0] sm:$0xff] %v1033_v48   ;;  %v267_v57 = vadd.f32 %v1192_v7, %v196_v49  ;;  %v904_v60 = vunpack.c.l.bf16 %v1114_v47 }
  0x38   :  { %v330_v58 = vmax.f32 %v266_v50, 0.0  ;;  %v198_v59 = vmul.f32 %v901_v51, %v1178_v1  ;;  %v268_v63 = vadd.f32 %v1192_v7, %v197_v56  ;;  %v905_v0 = vunpack.c.h.bf16 %v1114_v47 }
  0x39   :  { %1141 = vst [vmem:[%s1505_s3 + $0xa8] sm:$0xff] %v1038_v53   ;;  %v1043_v62 = vpack.c.bf16 %v329_v55, %v328_v54  ;;  %v908_v2 = vunpack.c.l.bf16 %v1115_v52  ;;  %v331_v3 = vmax.f32 %v267_v57, 0.0  ;;  %v199_v5 = vmul.f32 %v904_v60, %v1178_v1 }
  0x3a   :  { %v269_v4 = vadd.f32 %v1192_v7, %v198_v59  ;;  %v909_v6 = vunpack.c.h.bf16 %v1115_v52  ;;  %v332_v8 = vmax.f32 %v268_v63, 0.0  ;;  %v200_v9 = vmul.f32 %v905_v0, %v1178_v1 }
  0x3b   :  { %1142 = vst [vmem:[%s1505_s3 + $0xb0] sm:$0xff] %v1043_v62   ;;  %v201_v10 = vmul.f32 %v908_v2, %v1178_v1  ;;  %v912_v11 = vunpack.c.l.bf16 %v1116_v61  ;;  %v1048_v13 = vpack.c.bf16 %v331_v3, %v330_v58  ;;  %v270_v15 = vadd.f32 %v1192_v7, %v199_v5 }
  0x3c   :  { %v333_v14 = vmax.f32 %v269_v4, 0.0  ;;  %v202_v16 = vmul.f32 %v909_v6, %v1178_v1  ;;  %v271_v17 = vadd.f32 %v1192_v7, %v200_v9  ;;  %v913_v19 = vunpack.c.h.bf16 %v1116_v61 }
  0x3d   :  { %v272_v18 = vadd.f32 %v1192_v7, %v201_v10  ;;  %v203_v20 = vmul.f32 %v912_v11, %v1178_v1  ;;  %1143 = vst [vmem:[%s1505_s3 + $0xb8] sm:$0xff] %v1048_v13   ;;  %v334_v23 = vmax.f32 %v270_v15, 0.0  ;;  %v916_v25 = vunpack.c.l.bf16 %v1117_v12 }
  0x3e   :  { %v1053_v22 = vpack.c.bf16 %v333_v14, %v332_v8  ;;  %v273_v24 = vadd.f32 %v1192_v7, %v202_v16  ;;  %v335_v26 = vmax.f32 %v271_v17, 0.0  ;;  %v204_v28 = vmul.f32 %v913_v19, %v1178_v1 }
  0x3f   :  { %v336_v27 = vmax.f32 %v272_v18, 0.0  ;;  %v274_v29 = vadd.f32 %v1192_v7, %v203_v20  ;;  %v917_v31 = vunpack.c.h.bf16 %v1117_v12  ;;  %v205_v32 = vmul.f32 %v916_v25, %v1178_v1 }
  0x40   :  { %1144 = vst [vmem:[%s1505_s3 + $0xc0] sm:$0xff] %v1053_v22   ;;  %v337_v30 = vmax.f32 %v273_v24, 0.0  ;;  %v920_v33 = vunpack.c.l.bf16 %v1118_v21  ;;  %v1058_v35 = vpack.c.bf16 %v335_v26, %v334_v23  ;;  %v275_v36 = vadd.f32 %v1192_v7, %v204_v28 }
  0x41   :  { %v338_v37 = vmax.f32 %v274_v29, 0.0  ;;  %v921_v38 = vunpack.c.h.bf16 %v1118_v21  ;;  %v206_v41 = vmul.f32 %v917_v31, %v1178_v1  ;;  %v276_v42 = vadd.f32 %v1192_v7, %v205_v32 }
  0x42   :  { %v1063_v40 = vpack.c.bf16 %v337_v30, %v336_v27  ;;  %v207_v43 = vmul.f32 %v920_v33, %v1178_v1  ;;  %1145 = vst [vmem:[%s1505_s3 + $0xc8] sm:$0xff] %v1058_v35   ;;  %v339_v44 = vmax.f32 %v275_v36, 0.0  ;;  %v924_v46 = vunpack.c.l.bf16 %v1119_v34 }
  0x43   :  { %v208_v45 = vmul.f32 %v921_v38, %v1178_v1  ;;  %v925_v47 = vunpack.c.h.bf16 %v1119_v34  ;;  %v277_v48 = vadd.f32 %v1192_v7, %v206_v41  ;;  %v340_v49 = vmax.f32 %v276_v42, 0.0 }
  0x44   :  { %1146 = vst [vmem:[%s1505_s3 + $0xd0] sm:$0xff] %v1063_v40   ;;  %v278_v50 = vadd.f32 %v1192_v7, %v207_v43  ;;  %v928_v51 = vunpack.c.l.bf16 %v1120_v39  ;;  %v1068_v52 = vpack.c.bf16 %v339_v44, %v338_v37  ;;  %v209_v54 = vmul.f32 %v924_v46, %v1178_v1 }
  0x45   :  { %v279_v53 = vadd.f32 %v1192_v7, %v208_v45  ;;  %v210_v55 = vmul.f32 %v925_v47, %v1178_v1  ;;  %v341_v56 = vmax.f32 %v277_v48, 0.0  ;;  %v929_v58 = vunpack.c.h.bf16 %v1120_v39 }
  0x46   :  { %v342_v57 = vmax.f32 %v278_v50, 0.0  ;;  %v211_v59 = vmul.f32 %v928_v51, %v1178_v1  ;;  %1147 = vst [vmem:[%s1505_s3 + $0xd8] sm:$0xff] %v1068_v52   ;;  %v280_v61 = vadd.f32 %v1192_v7, %v209_v54 }
  0x47   :  { %v343_v60 = vmax.f32 %v279_v53, 0.0  ;;  %v281_v62 = vadd.f32 %v1192_v7, %v210_v55  ;;  %v1073_v63 = vpack.c.bf16 %v341_v56, %v340_v49  ;;  %v212_v0 = vmul.f32 %v929_v58, %v1178_v1 }
  0x48   :  { %v282_v2 = vadd.f32 %v1192_v7, %v211_v59  ;;  %v344_v4 = vmax.f32 %v280_v61, 0.0 }
  0x49   :  { %v1078_v3 = vpack.c.bf16 %v343_v60, %v342_v57  ;;  %v345_v5 = vmax.f32 %v281_v62, 0.0  ;;  %1148 = vst [vmem:[%s1505_s3 + $0xe0] sm:$0xff] %v1073_v63   ;;  %v283_v6 = vadd.f32 %v1192_v7, %v212_v0 }
  0x4a   :  { %v346_v8 = vmax.f32 %v282_v2, 0.0 }
  0x4b   :  { %1149 = vst [vmem:[%s1505_s3 + $0xe8] sm:$0xff] %v1078_v3   ;;  %v1083_v9 = vpack.c.bf16 %v345_v5, %v344_v4  ;;  %v347_v10 = vmax.f32 %v283_v6, 0.0 }
  0x4d   :  { %1150 = vst [vmem:[%s1505_s3 + $0xf0] sm:$0xff] %v1083_v9   ;;  %v1088_v1 = vpack.c.bf16 %v347_v10, %v346_v8 }
  0x4f   :  { %1151 = vst [vmem:[%s1505_s3 + $0xf8] sm:$0xff] %v1088_v1  }

// kernel: bottleneck_forward.11
= control target key start
LH: loop header
LB: loop body
LE: loop exit
PB: predicated region body
PF: predicated region fallthrough
CT: control target
= control target key end

     0   :  { %s647_s0 = inlined_call_operand.vmem [shape: bf16[128,128], index: 0, kind: input, shape index: {}]   ;;  %s648_s1 = inlined_call_operand.vmem [shape: f32[1,128], index: 1, kind: input, shape index: {}]   ;;  %s649_s2 = inlined_call_operand.vmem [shape: f32[1,128], index: 2, kind: input, shape index: {}]   ;;  %s650_s3 = inlined_call_operand.vmem [shape: bf16[128,128], index: 3, kind: input, shape index: {}]   ;;  %s651_s4 = inlined_call_operand.vmem [shape: f32[1,128], index: 4, kind: input, shape index: {}]   ;;  %s652_s5 = inlined_call_operand.vmem [shape: f32[1,128], index: 5, kind: input, shape index: {}]   ;;  %s653_s6 = inlined_call_operand.vmem [shape: bf16[128,128], index: 6, kind: output, shape index: {}]  }
   0x1   :  { %v332_v0 = vld [vmem:[%s647_s0] sm:$0xff]   ;;  %v435_v9 = vld [vmem:[%s647_s0 + $0x8] sm:$0xff]   ;;  %v436_v20 = vld [vmem:[%s647_s0 + $0x10] sm:$0xff]  }
   0x2   :  { %v497_v1 = vld [vmem:[%s648_s1] ss:$0 sm:$0xff]  ;;  %v333_v2 = vunpack.c.l.bf16 %v332_v0  ;;  %v334_v3 = vunpack.c.h.bf16 %v332_v0  ;;  %v442_v10 = vld [vmem:[%s650_s3 + $0x8] sm:$0xff]   ;;  %v337_v14 = vunpack.c.l.bf16 %v435_v9  ;;  %v338_v15 = vunpack.c.h.bf16 %v435_v9  ;;  %v443_v29 = vld [vmem:[%s650_s3 + $0x10] sm:$0xff]  }
   0x3   :  { %v364_v4 = vld [vmem:[%s650_s3] sm:$0xff]   ;;  %v369_v18 = vunpack.c.l.bf16 %v442_v10  ;;  %v370_v19 = vunpack.c.h.bf16 %v442_v10  ;;  %v341_v32 = vunpack.c.l.bf16 %v436_v20  ;;  %v342_v33 = vunpack.c.h.bf16 %v436_v20  ;;  %v437_v42 = vld [vmem:[%s647_s0 + $0x18] sm:$0xff]  }
   0x4   :  { %v505_v5 = vld [vmem:[%s651_s4] ss:$0 sm:$0xff]  ;;  %v365_v7 = vunpack.c.l.bf16 %v364_v4  ;;  %v366_v8 = vunpack.c.h.bf16 %v364_v4  ;;  %v62_v11 = vmul.f32 %v333_v2, %v497_v1  ;;  %v63_v12 = vmul.f32 %v334_v3, %v497_v1  ;;  %v444_v47 = vld [vmem:[%s650_s3 + $0x18] sm:$0xff]  }
   0x5   :  { %v510_v6 = vld [vmem:[%s649_s2] ss:$0 sm:$0xff]  ;;  %v64_v23 = vmul.f32 %v337_v14, %v497_v1  ;;  %v65_v24 = vmul.f32 %v338_v15, %v497_v1  ;;  %v142_v27 = vmul.f32 %v369_v18, %v505_v5  ;;  %v143_v28 = vmul.f32 %v370_v19, %v505_v5  ;;  %v439_v14 = vld [vmem:[%s647_s0 + $0x28] sm:$0xff]  }
   0x6   :  { %v523_v13 = vld [vmem:[%s652_s5] ss:$0 sm:$0xff]  ;;  %v140_v16 = vmul.f32 %v365_v7, %v505_v5  ;;  %v141_v17 = vmul.f32 %v366_v8, %v505_v5  ;;  %v85_v21 = vadd.f32 %v510_v6, %v62_v11  ;;  %v86_v22 = vadd.f32 %v510_v6, %v63_v12 }
   0x7   :  { %v87_v30 = vadd.f32 %v510_v6, %v64_v23  ;;  %v88_v31 = vadd.f32 %v510_v6, %v65_v24  ;;  %v165_v36 = vadd.f32 %v523_v13, %v142_v27  ;;  %v166_v37 = vadd.f32 %v523_v13, %v143_v28  ;;  %v438_v52 = vld [vmem:[%s647_s0 + $0x20] sm:$0xff]   ;;  %v446_v23 = vld [vmem:[%s650_s3 + $0x28] sm:$0xff]  }
   0x8   :  { %v163_v25 = vadd.f32 %v523_v13, %v140_v16  ;;  %v164_v26 = vadd.f32 %v523_v13, %v141_v17  ;;  %v66_v38 = vmul.f32 %v341_v32, %v497_v1  ;;  %v67_v39 = vmul.f32 %v342_v33, %v497_v1  ;;  %v445_v8 = vld [vmem:[%s650_s3 + $0x20] sm:$0xff]   ;;  %v440_v32 = vld [vmem:[%s647_s0 + $0x30] sm:$0xff]  }
   0x9   :  { %v373_v40 = vunpack.c.l.bf16 %v443_v29  ;;  %v374_v41 = vunpack.c.h.bf16 %v443_v29  ;;  %v181_v45 = vadd.f32 %v165_v36, %v87_v30  ;;  %v182_v46 = vadd.f32 %v166_v37, %v88_v31 }
   0xa   :  { %v179_v34 = vadd.f32 %v163_v25, %v85_v21  ;;  %v180_v35 = vadd.f32 %v164_v26, %v86_v22  ;;  %v89_v48 = vadd.f32 %v510_v6, %v66_v38  ;;  %v90_v49 = vadd.f32 %v510_v6, %v67_v39 }
   0xb   :  { %v144_v50 = vmul.f32 %v373_v40, %v505_v5  ;;  %v145_v51 = vmul.f32 %v374_v41, %v505_v5  ;;  %v197_v54 = vmax.f32 %v181_v45, 0.0  ;;  %v198_v55 = vmax.f32 %v182_v46, 0.0  ;;  %v447_v45 = vld [vmem:[%s650_s3 + $0x30] sm:$0xff]  }
   0xc   :  { %v195_v43 = vmax.f32 %v179_v34, 0.0  ;;  %v196_v44 = vmax.f32 %v180_v35, 0.0  ;;  %v345_v56 = vunpack.c.l.bf16 %v437_v42  ;;  %v346_v59 = vunpack.c.h.bf16 %v437_v42 }
   0xd   :  { %v167_v57 = vadd.f32 %v523_v13, %v144_v50  ;;  %v168_v58 = vadd.f32 %v523_v13, %v145_v51  ;;  %v377_v60 = vunpack.c.l.bf16 %v444_v47  ;;  %v403_v61 = vpack.c.bf16 %v198_v55, %v197_v54  ;;  %v441_v54 = vld [vmem:[%s647_s0 + $0x38] sm:$0xff]  }
   0xe   :  { %v398_v53 = vpack.c.bf16 %v196_v44, %v195_v43  ;;  %v68_v62 = vmul.f32 %v345_v56, %v497_v1  ;;  %v378_v63 = vunpack.c.h.bf16 %v444_v47  ;;  %v349_v0 = vunpack.c.l.bf16 %v438_v52 }
   0xf   :  { %v183_v2 = vadd.f32 %v167_v57, %v89_v48  ;;  %v184_v3 = vadd.f32 %v168_v58, %v90_v49  ;;  %v69_v4 = vmul.f32 %v346_v59, %v497_v1  ;;  %v146_v7 = vmul.f32 %v377_v60, %v505_v5  ;;  %449 = vst [vmem:[%s653_s6 + $0x8] sm:$0xff] %v403_v61  }
  0x10   :  { %399 = vst [vmem:[%s653_s6] sm:$0xff] %v398_v53   ;;  %v91_v9 = vadd.f32 %v510_v6, %v68_v62  ;;  %v147_v10 = vmul.f32 %v378_v63, %v505_v5  ;;  %v350_v11 = vunpack.c.h.bf16 %v438_v52  ;;  %v70_v12 = vmul.f32 %v349_v0, %v497_v1 }
  0x11   :  { %v199_v15 = vmax.f32 %v183_v2, 0.0  ;;  %v200_v16 = vmax.f32 %v184_v3, 0.0  ;;  %v92_v17 = vadd.f32 %v510_v6, %v69_v4  ;;  %v169_v18 = vadd.f32 %v523_v13, %v146_v7  ;;  %v448_v4 = vld [vmem:[%s650_s3 + $0x38] sm:$0xff]  }
  0x12   :  { %v170_v19 = vadd.f32 %v523_v13, %v147_v10  ;;  %v71_v20 = vmul.f32 %v350_v11, %v497_v1  ;;  %v93_v21 = vadd.f32 %v510_v6, %v70_v12  ;;  %v381_v22 = vunpack.c.l.bf16 %v445_v8 }
  0x13   :  { %v408_v24 = vpack.c.bf16 %v200_v16, %v199_v15  ;;  %v185_v25 = vadd.f32 %v169_v18, %v91_v9  ;;  %v382_v26 = vunpack.c.h.bf16 %v445_v8  ;;  %v353_v27 = vunpack.c.l.bf16 %v439_v14 }
  0x14   :  { %v186_v28 = vadd.f32 %v170_v19, %v92_v17  ;;  %v94_v29 = vadd.f32 %v510_v6, %v71_v20  ;;  %v148_v30 = vmul.f32 %v381_v22, %v505_v5  ;;  %v354_v31 = vunpack.c.h.bf16 %v439_v14 }
  0x15   :  { %450 = vst [vmem:[%s653_s6 + $0x10] sm:$0xff] %v408_v24   ;;  %v201_v33 = vmax.f32 %v185_v25, 0.0  ;;  %v149_v34 = vmul.f32 %v382_v26, %v505_v5  ;;  %v72_v35 = vmul.f32 %v353_v27, %v497_v1  ;;  %v385_v36 = vunpack.c.l.bf16 %v446_v23 }
  0x16   :  { %v202_v37 = vmax.f32 %v186_v28, 0.0  ;;  %v171_v38 = vadd.f32 %v523_v13, %v148_v30  ;;  %v73_v39 = vmul.f32 %v354_v31, %v497_v1  ;;  %v386_v40 = vunpack.c.h.bf16 %v446_v23 }
  0x17   :  { %v172_v41 = vadd.f32 %v523_v13, %v149_v34  ;;  %v95_v42 = vadd.f32 %v510_v6, %v72_v35  ;;  %v150_v43 = vmul.f32 %v385_v36, %v505_v5  ;;  %v357_v44 = vunpack.c.l.bf16 %v440_v32 }
  0x18   :  { %v413_v46 = vpack.c.bf16 %v202_v37, %v201_v33  ;;  %v187_v47 = vadd.f32 %v171_v38, %v93_v21  ;;  %v96_v48 = vadd.f32 %v510_v6, %v73_v39  ;;  %v151_v49 = vmul.f32 %v386_v40, %v505_v5 }
  0x19   :  { %v188_v50 = vadd.f32 %v172_v41, %v94_v29  ;;  %v173_v51 = vadd.f32 %v523_v13, %v150_v43  ;;  %v358_v52 = vunpack.c.h.bf16 %v440_v32  ;;  %v74_v53 = vmul.f32 %v357_v44, %v497_v1 }
  0x1a   :  { %451 = vst [vmem:[%s653_s6 + $0x18] sm:$0xff] %v413_v46   ;;  %v203_v55 = vmax.f32 %v187_v47, 0.0  ;;  %v174_v56 = vadd.f32 %v523_v13, %v151_v49  ;;  %v389_v57 = vunpack.c.l.bf16 %v447_v45  ;;  %v390_v58 = vunpack.c.h.bf16 %v447_v45 }
  0x1b   :  { %v204_v59 = vmax.f32 %v188_v50, 0.0  ;;  %v189_v60 = vadd.f32 %v173_v51, %v95_v42  ;;  %v75_v61 = vmul.f32 %v358_v52, %v497_v1  ;;  %v97_v62 = vadd.f32 %v510_v6, %v74_v53 }
  0x1c   :  { %v190_v63 = vadd.f32 %v174_v56, %v96_v48  ;;  %v152_v0 = vmul.f32 %v389_v57, %v505_v5  ;;  %v153_v2 = vmul.f32 %v390_v58, %v505_v5  ;;  %v361_v3 = vunpack.c.l.bf16 %v441_v54 }
  0x1d   :  { %v418_v7 = vpack.c.bf16 %v204_v59, %v203_v55  ;;  %v205_v8 = vmax.f32 %v189_v60, 0.0  ;;  %v98_v9 = vadd.f32 %v510_v6, %v75_v61  ;;  %v362_v10 = vunpack.c.h.bf16 %v441_v54 }
  0x1e   :  { %v206_v11 = vmax.f32 %v190_v63, 0.0  ;;  %v175_v12 = vadd.f32 %v523_v13, %v152_v0  ;;  %v176_v14 = vadd.f32 %v523_v13, %v153_v2  ;;  %v76_v15 = vmul.f32 %v361_v3, %v497_v1 }
  0x1f   :  { %452 = vst [vmem:[%s653_s6 + $0x20] sm:$0xff] %v418_v7   ;;  %v77_v16 = vmul.f32 %v362_v10, %v497_v1  ;;  %v393_v17 = vunpack.c.l.bf16 %v448_v4  ;;  %v394_v18 = vunpack.c.h.bf16 %v448_v4 }
  0x20   :  { %v423_v19 = vpack.c.bf16 %v206_v11, %v205_v8  ;;  %v191_v20 = vadd.f32 %v175_v12, %v97_v62  ;;  %v192_v21 = vadd.f32 %v176_v14, %v98_v9  ;;  %v99_v22 = vadd.f32 %v510_v6, %v76_v15 }
  0x21   :  { %v100_v23 = vadd.f32 %v510_v6, %v77_v16  ;;  %v154_v24 = vmul.f32 %v393_v17, %v505_v5  ;;  %v155_v25 = vmul.f32 %v394_v18, %v505_v5 }
  0x22   :  { %453 = vst [vmem:[%s653_s6 + $0x28] sm:$0xff] %v423_v19   ;;  %v207_v26 = vmax.f32 %v191_v20, 0.0  ;;  %v208_v27 = vmax.f32 %v192_v21, 0.0 }
  0x23   :  { %v177_v1 = vadd.f32 %v523_v13, %v154_v24  ;;  %v178_v28 = vadd.f32 %v523_v13, %v155_v25 }
  0x24   :  { %v428_v29 = vpack.c.bf16 %v208_v27, %v207_v26 }
  0x25   :  { %v193_v30 = vadd.f32 %v177_v1, %v99_v22  ;;  %v194_v31 = vadd.f32 %v178_v28, %v100_v23 }
  0x26   :  { %454 = vst [vmem:[%s653_s6 + $0x30] sm:$0xff] %v428_v29  }
  0x27   :  { %v209_v6 = vmax.f32 %v193_v30, 0.0  ;;  %v210_v32 = vmax.f32 %v194_v31, 0.0 }
  0x29   :  { %v433_v5 = vpack.c.bf16 %v210_v32, %v209_v6 }
  0x2b   :  { %455 = vst [vmem:[%s653_s6 + $0x38] sm:$0xff] %v433_v5  }

// kernel: bottleneck_forward.9
= control target key start
LH: loop header
LB: loop body
LE: loop exit
PB: predicated region body
PF: predicated region fallthrough
CT: control target
= control target key end

     0   :  { %vm347_vm0 = vcmask 1040384   ;;  %s794_s3 = inlined_call_operand.vmem [shape: bf16[128,128], index: 3, kind: input, shape index: {}]   ;;  %s795_s0 = inlined_call_operand.vmem [shape: bf16[128,128], index: 0, kind: input, shape index: {}]   ;;  %s796_s1 = inlined_call_operand.vmem [shape: f32[1,128], index: 1, kind: input, shape index: {}]   ;;  %s797_s2 = inlined_call_operand.vmem [shape: f32[1,128], index: 2, kind: input, shape index: {}]   ;;  %s798_s5 = inlined_call_operand.vmem [shape: f32[2,128], index: 5, kind: output, shape index: {1}]   ;;  %s799_s4 = inlined_call_operand.vmem [shape: bf16[128,128], index: 4, kind: output, shape index: {0}]  }
   0x1   :  { %v632_v0 = vld [vmem:[%s794_s3 + $0x38] sm:$0xff]   ;;  %v633_v1 = vld [vmem:[%s794_s3 + $0x30] sm:$0xff]   ;;  %v634_v2 = vld [vmem:[%s794_s3 + $0x28] sm:$0xff]  }
   0x2   :  { %583 = vmatprep.subr.bf16.mxu0 %v632_v0  ;;  %615 = vmatprep.subr.bf16.mxu1 %v632_v0  ;;  %v635_v3 = vld [vmem:[%s794_s3 + $0x20] sm:$0xff]   ;;  %v553_v8 = vld [vmem:[%s795_s0 + $0x8] sm:$0xff]   ;;  %v554_v9 = vld [vmem:[%s795_s0 + $0x10] sm:$0xff]  }
   0x3   :  { %584 = vmatpush3.bf16.msra.mxu0 %v632_v0  ;;  %623 = vmatpush3.bf16.msra.mxu1 %v632_v0  ;;  %v482_v4 = vld [vmem:[%s795_s0] sm:$0xff]   ;;  %v487_v11 = vunpack.c.l.bf16 %v553_v8  ;;  %v488_v14 = vunpack.c.h.bf16 %v553_v8  ;;  %v636_v16 = vld [vmem:[%s794_s3 + $0x18] sm:$0xff]   ;;  %v491_v17 = vunpack.c.l.bf16 %v554_v9  ;;  %v492_v21 = vunpack.c.h.bf16 %v554_v9  ;;  %v557_v27 = vld [vmem:[%s795_s0 + $0x28] sm:$0xff]  }
   0x4   :  { %585 = vmatprep.subr.bf16.mxu0 %v633_v1  ;;  %616 = vmatprep.subr.bf16.mxu1 %v633_v1  ;;  %v689_v5 = vld [vmem:[%s796_s1] ss:$0 sm:$0xff]  ;;  %v483_v6 = vunpack.c.l.bf16 %v482_v4  ;;  %v484_v7 = vunpack.c.h.bf16 %v482_v4  ;;  %v555_v22 = vld [vmem:[%s795_s0 + $0x18] sm:$0xff]   ;;  %v637_v28 = vld [vmem:[%s794_s3 + $0x10] sm:$0xff]   ;;  %v503_v38 = vunpack.c.l.bf16 %v557_v27  ;;  %v504_v42 = vunpack.c.h.bf16 %v557_v27 }
   0x5   :  { %v700_v10 = vld [vmem:[%s797_s2] ss:$0 sm:$0xff]  ;;  %v61_v20 = vmul.f32 %v487_v11, %v689_v5  ;;  %v62_v26 = vmul.f32 %v488_v14, %v689_v5  ;;  %v63_v29 = vmul.f32 %v491_v17, %v689_v5  ;;  %v558_v30 = vld [vmem:[%s795_s0 + $0x30] sm:$0xff]   ;;  %v495_v32 = vunpack.c.l.bf16 %v555_v22  ;;  %v559_v39 = vld [vmem:[%s795_s0 + $0x38] sm:$0xff]  }
   0x6   :  { %v59_v12 = vmul.f32 %v483_v6, %v689_v5  ;;  %v60_v13 = vmul.f32 %v484_v7, %v689_v5  ;;  %v556_v15 = vld [vmem:[%s795_s0 + $0x20] sm:$0xff]   ;;  %v496_v33 = vunpack.c.h.bf16 %v555_v22  ;;  %v64_v36 = vmul.f32 %v492_v21, %v689_v5  ;;  %v638_v44 = vld [vmem:[%s794_s3 + $0x8] sm:$0xff]  }
   0x7   :  { %586 = vmatpush3.bf16.msra.mxu0 %v633_v1  ;;  %624 = vmatpush3.bf16.msra.mxu1 %v633_v1  ;;  %v499_v23 = vunpack.c.l.bf16 %v556_v15  ;;  %v500_v34 = vunpack.c.h.bf16 %v556_v15  ;;  %v84_v35 = vadd.f32 %v700_v10, %v61_v20  ;;  %v85_v40 = vadd.f32 %v700_v10, %v62_v26  ;;  %v639_v61 = vld [vmem:[%s794_s3] sm:$0xff]  }
   0x8   :  { %587 = vmatprep.subr.bf16.mxu0 %v634_v2  ;;  %617 = vmatprep.subr.bf16.mxu1 %v634_v2  ;;  %v82_v18 = vadd.f32 %v700_v10, %v59_v12  ;;  %v83_v19 = vadd.f32 %v700_v10, %v60_v13  ;;  %v507_v43 = vunpack.c.l.bf16 %v558_v30  ;;  %v86_v45 = vadd.f32 %v700_v10, %v63_v29 }
   0x9   :  { %v67_v37 = vmul.f32 %v499_v23, %v689_v5  ;;  %v68_v41 = vmul.f32 %v500_v34, %v689_v5  ;;  %v69_v47 = vmul.f32 %v503_v38, %v689_v5  ;;  %v508_v48 = vunpack.c.h.bf16 %v558_v30 }
   0xa   :  { %v98_v24 = vmax.f32 %v82_v18, 0.0  ;;  %v99_v25 = vmax.f32 %v83_v19, 0.0  ;;  %v70_v50 = vmul.f32 %v504_v42, %v689_v5  ;;  %v71_v51 = vmul.f32 %v507_v43, %v689_v5 }
   0xb   :  { %588 = vmatpush3.bf16.msra.mxu0 %v634_v2  ;;  %625 = vmatpush3.bf16.msra.mxu1 %v634_v2  ;;  %v90_v46 = vadd.f32 %v700_v10, %v67_v37  ;;  %v91_v49 = vadd.f32 %v700_v10, %v68_v41  ;;  %v511_v52 = vunpack.c.l.bf16 %v559_v39  ;;  %v92_v54 = vadd.f32 %v700_v10, %v69_v47 }
   0xc   :  { %589 = vmatprep.subr.bf16.mxu0 %v635_v3  ;;  %618 = vmatprep.subr.bf16.mxu1 %v635_v3  ;;  %v114_v31 = vpack.c.bf16 %v99_v25, %v98_v24  ;;  %v72_v55 = vmul.f32 %v508_v48, %v689_v5  ;;  %v512_v56 = vunpack.c.h.bf16 %v559_v39  ;;  %v87_v57 = vadd.f32 %v700_v10, %v64_v36 }
   0xd   :  { %v106_v53 = vmax.f32 %v90_v46, 0.0  ;;  %v107_v58 = vmax.f32 %v91_v49, 0.0  ;;  %v93_v59 = vadd.f32 %v700_v10, %v70_v50  ;;  %v94_v60 = vadd.f32 %v700_v10, %v71_v51 }
   0xe   :  { %599 = vmatprep.mubr.bf16.mxu0 %v114_v31  ;;  %v65_v62 = vmul.f32 %v495_v32, %v689_v5  ;;  %v95_v63 = vadd.f32 %v700_v10, %v72_v55  ;;  %v100_v0 = vmax.f32 %v84_v35, 0.0  ;;  %v101_v1 = vmax.f32 %v85_v40, 0.0 }
   0xf   :  { %590 = vmatpush3.bf16.msra.mxu0 %v635_v3  ;;  %626 = vmatpush3.bf16.msra.mxu1 %v635_v3  ;;  %v66_v2 = vmul.f32 %v496_v33, %v689_v5  ;;  %v118_v3 = vpack.c.bf16 %v107_v58, %v106_v53  ;;  %v108_v4 = vmax.f32 %v92_v54, 0.0  ;;  %v109_v6 = vmax.f32 %v93_v59, 0.0 }
  0x10   :  { %591 = vmatprep.subr.bf16.mxu0 %v636_v16  ;;  %619 = vmatprep.subr.bf16.mxu1 %v636_v16  ;;  %v73_v7 = vmul.f32 %v511_v52, %v689_v5  ;;  %v74_v8 = vmul.f32 %v512_v56, %v689_v5  ;;  %v102_v9 = vmax.f32 %v86_v45, 0.0  ;;  %v103_v11 = vmax.f32 %v87_v57, 0.0 }
  0x11   :  { %v110_v12 = vmax.f32 %v94_v60, 0.0  ;;  %v111_v13 = vmax.f32 %v95_v63, 0.0  ;;  %v88_v14 = vadd.f32 %v700_v10, %v65_v62  ;;  %v89_v15 = vadd.f32 %v700_v10, %v66_v2  ;;  %607 = vmatprep.mubr.bf16.mxu1 %v118_v3 }
  0x12   :  { %v119_v17 = vpack.c.bf16 %v109_v6, %v108_v4  ;;  %v96_v18 = vadd.f32 %v700_v10, %v73_v7  ;;  %v97_v19 = vadd.f32 %v700_v10, %v74_v8  ;;  %v116_v5 = vpack.c.bf16 %v103_v11, %v102_v9 }
  0x13   :  { %592 = vmatpush3.bf16.msra.mxu0 %v636_v16  ;;  %627 = vmatpush3.bf16.msra.mxu1 %v636_v16  ;;  %v115_v16 = vpack.c.bf16 %v101_v1, %v100_v0  ;;  %v120_v20 = vpack.c.bf16 %v111_v13, %v110_v12  ;;  %v104_v21 = vmax.f32 %v88_v14, 0.0  ;;  %v105_v22 = vmax.f32 %v89_v15, 0.0 }
  0x14   :  { %593 = vmatprep.subr.bf16.mxu0 %v637_v28  ;;  %620 = vmatprep.subr.bf16.mxu1 %v637_v28  ;;  %v112_v23 = vmax.f32 %v96_v18, 0.0  ;;  %v113_v24 = vmax.f32 %v97_v19, 0.0  ;;  %v640_v27 = vmov 0.0  }
  0x15   :  { %v117_v25 = vpack.c.bf16 %v105_v22, %v104_v21  ;;  %287 = vst [vmem:[%s798_s5] sm:$0x3] %v640_v27 }
  0x16   :  { %v121_v26 = vpack.c.bf16 %v113_v24, %v112_v23 }
  0x17   :  { %594 = vmatpush3.bf16.msra.mxu0 %v637_v28  ;;  %628 = vmatpush3.bf16.msra.mxu1 %v637_v28 }
  0x18   :  { %595 = vmatprep.subr.bf16.mxu0 %v638_v44  ;;  %621 = vmatprep.subr.bf16.mxu1 %v638_v44 }
  0x1b   :  { %596 = vmatpush3.bf16.msra.mxu0 %v638_v44  ;;  %629 = vmatpush3.bf16.msra.mxu1 %v638_v44 }
  0x1c   :  { %597 = vmatprep.subr.bf16.mxu0 %v639_v61  ;;  %622 = vmatprep.subr.bf16.mxu1 %v639_v61 }
  0x1f   :  { %598 = vmatpush3.bf16.msra.mxu0 %v639_v61  ;;  %630 = vmatpush3.bf16.msra.mxu1 %v639_v61 }
  0x22   :  { %600 = vmatmul.mubr.bf16.vlgmr.msra.gmra.mxu0 %v115_v16  ;;  %608 = vmatmul.mubr.bf16.vlgmr.msra.gmra.mxu1 %v119_v17 }
  0x23   :  { %603 = vmatprep.mubr.bf16.mxu0 %v116_v5  ;;  %611 = vmatprep.mubr.bf16.mxu1 %v120_v20 }
  0x2a   :  { %604 = vmatmul.mubr.bf16.gmra.mxu0 %v117_v25  ;;  %612 = vmatmul.mubr.bf16.gmra.mxu1 %v121_v26 }
  0xe2   :  { %v601_v10 = vpop.f32.mrf.mxu0  ;;  %v609_v28 = vpop.f32.mrf.mxu1 }
  0xe3   :  { %v311_v44 = vmul.f32 %v601_v10, %v601_v10  ;;  %v319_v16 = vmul.f32 %v609_v28, %v609_v28 }
  0xe4   :  { %v220_v29 = vpop.f32.mrf.mxu0  ;;  %v252_v30 = vpop.f32.mrf.mxu1 }
  0xe5   :  { %v309_v37 = vmul.f32 %v220_v29, %v220_v29  ;;  %v317_v9 = vmul.f32 %v252_v30, %v252_v30 }
  0xe6   :  { %v602_v31 = vpop.f32.mrf.mxu0  ;;  %v610_v32 = vpop.f32.mrf.mxu1 }
  0xe7   :  { %v521_v33 = vpack.c.bf16 %v602_v31, %v601_v10  ;;  %v541_v34 = vpack.c.bf16 %v610_v32, %v609_v28  ;;  %v312_v49 = vmul.f32 %v602_v31, %v602_v31  ;;  %v320_v19 = vmul.f32 %v610_v32, %v610_v32 }
  0xe8   :  { %v223_v35 = vpop.f32.mrf.mxu0  ;;  %v255_v36 = vpop.f32.mrf.mxu1 }
  0xe9   :  { %560 = vst [vmem:[%s799_s4 + $0x8] sm:$0xff] %v521_v33   ;;  %v288_v38 = vadd.f32 %v223_v35, %v220_v29  ;;  %v310_v39 = vmul.f32 %v223_v35, %v223_v35  ;;  %v516_v40 = vpack.c.bf16 %v223_v35, %v220_v29  ;;  %564 = vst [vmem:[%s799_s4 + $0x28] sm:$0xff] %v541_v34  }
  0xea   :  { %v605_v41 = vpop.f32.mrf.mxu0  ;;  %v536_v42 = vpack.c.bf16 %v255_v36, %v252_v30  ;;  %v613_v43 = vpop.f32.mrf.mxu1  ;;  %v318_v14 = vmul.f32 %v255_v36, %v255_v36 }
  0xeb   :  { %v289_v45 = vadd.f32 %v601_v10, %v288_v38  ;;  %v325_v46 = vadd.f32 %v310_v39, %v309_v37  ;;  %517 = vst [vmem:[%s799_s4] sm:$0xff] %v516_v40   ;;  %v315_v2 = vmul.f32 %v605_v41, %v605_v41  ;;  %v323_v27 = vmul.f32 %v613_v43, %v613_v43 }
  0xec   :  { %v236_v47 = vpop.f32.mrf.mxu0  ;;  %563 = vst [vmem:[%s799_s4 + $0x20] sm:$0xff] %v536_v42   ;;  %v268_v48 = vpop.f32.mrf.mxu1 }
  0xed   :  { %v326_v50 = vadd.f32 %v325_v46, %v311_v44  ;;  %v290_v51 = vadd.f32 %v602_v31, %v289_v45  ;;  %v313_v55 = vmul.f32 %v236_v47, %v236_v47  ;;  %v321_v22 = vmul.f32 %v268_v48, %v268_v48 }
  0xee   :  { %v606_v52 = vpop.f32.mrf.mxu0  ;;  %v614_v53 = vpop.f32.mrf.mxu1 }
  0xef   :  { %v291_v54 = vadd.f32 %v290_v51, %v236_v47  ;;  %v327_v56 = vadd.f32 %v326_v50, %v312_v49  ;;  %v531_v57 = vpack.c.bf16 %v606_v52, %v605_v41  ;;  %v551_v59 = vpack.c.bf16 %v614_v53, %v613_v43 }
  0xf0   :  { %v239_v58 = vpop.f32.mrf.mxu0  ;;  %v271_v60 = vpop.f32.mrf.mxu1  ;;  %v316_v6 = vmul.f32 %v606_v52, %v606_v52  ;;  %v324_v31 = vmul.f32 %v614_v53, %v614_v53 }
  0xf1   :  { %v328_v61 = vadd.f32 %v327_v56, %v313_v55  ;;  %562 = vst [vmem:[%s799_s4 + $0x18] sm:$0xff] %v531_v57   ;;  %v292_v62 = vadd.f32 %v291_v54, %v239_v58  ;;  %v314_v63 = vmul.f32 %v239_v58, %v239_v58  ;;  %v526_v0 = vpack.c.bf16 %v239_v58, %v236_v47 }
  0xf2   :  { %566 = vst [vmem:[%s799_s4 + $0x38] sm:$0xff] %v551_v59   ;;  %v546_v1 = vpack.c.bf16 %v271_v60, %v268_v48  ;;  %v322_v26 = vmul.f32 %v271_v60, %v271_v60 }
  0xf3   :  { %v293_v3 = vadd.f32 %v605_v41, %v292_v62  ;;  %v329_v4 = vadd.f32 %v328_v61, %v314_v63  ;;  %561 = vst [vmem:[%s799_s4 + $0x10] sm:$0xff] %v526_v0  }
  0xf4   :  { %565 = vst [vmem:[%s799_s4 + $0x30] sm:$0xff] %v546_v1  }
  0xf5   :  { %v294_v7 = vadd.f32 %v606_v52, %v293_v3  ;;  %v330_v8 = vadd.f32 %v329_v4, %v315_v2 }
  0xf7   :  { %v331_v11 = vadd.f32 %v330_v8, %v316_v6  ;;  %v295_v12 = vadd.f32 %v294_v7, %v252_v30 }
  0xf9   :  { %v296_v13 = vadd.f32 %v295_v12, %v255_v36  ;;  %v332_v15 = vadd.f32 %v331_v11, %v317_v9 }
  0xfb   :  { %v297_v17 = vadd.f32 %v609_v28, %v296_v13  ;;  %v333_v18 = vadd.f32 %v332_v15, %v318_v14 }
  0xfd   :  { %v334_v5 = vadd.f32 %v333_v18, %v319_v16  ;;  %v298_v20 = vadd.f32 %v610_v32, %v297_v17 }
  0xff   :  { %v299_v21 = vadd.f32 %v298_v20, %v268_v48  ;;  %v335_v23 = vadd.f32 %v334_v5, %v320_v19 }
 0x101   :  { %v336_v24 = vadd.f32 %v335_v23, %v321_v22  ;;  %v300_v25 = vadd.f32 %v299_v21, %v271_v60 }
 0x103   :  { %v301_v10 = vadd.f32 %v613_v43, %v300_v25  ;;  %v337_v29 = vadd.f32 %v336_v24, %v322_v26  ;;  %v346_v43 = vld [vmem:[%s798_s5] sm:$0x3] }
 0x105   :  { %v302_v30 = vadd.f32 %v614_v53, %v301_v10  ;;  %v338_v33 = vadd.f32 %v337_v29, %v323_v27 }
 0x107   :  { %v303_v34 = vrot.slane %v302_v30, 4  ;;  %v339_v35 = vadd.f32 %v338_v33, %v324_v31 }
 0x109   :  { %v304_v36 = vadd.f32 %v303_v34, %v302_v30  ;;  %v340_v28 = vrot.slane %v339_v35, 4 }
 0x10b   :  { %v305_v37 = vrot.slane %v304_v36, 2  ;;  %v341_v38 = vadd.f32 %v340_v28, %v339_v35 }
 0x10d   :  { %v306_v39 = vadd.f32 %v305_v37, %v304_v36  ;;  %v342_v32 = vrot.slane %v341_v38, 2 }
 0x10f   :  { %v307_v40 = vrot.slane %v306_v39, 1  ;;  %v343_v41 = vadd.f32 %v342_v32, %v341_v38 }
 0x111   :  { %v344_v42 = vrot.slane %v343_v41, 1  ;;  %v308_v44 = vadd.f32 %v307_v40, %v306_v39 }
 0x113   :  { %v345_v45 = vadd.f32 %v344_v42, %v343_v41 }
 0x115   :  { %v348_v46 = vsel %vm347_vm0, %v308_v44, %v345_v45 }
 0x116   :  { %v349_v47 = vadd.f32 %v348_v46, %v346_v43 }
 0x118   :  { %350 = vst [vmem:[%s798_s5] sm:$0x3] %v349_v47 }

// kernel: bottleneck_forward.8
= control target key start
LH: loop header
LB: loop body
LE: loop exit
PB: predicated region body
PF: predicated region fallthrough
CT: control target
= control target key end

     0   :  { %s2247_s15 = smov 0   ;;  %s2640_s0 = inlined_call_operand.vmem [shape: bf16[2,9,8,384], index: 0, kind: input, shape index: {}]   ;;  %s2641_s1 = inlined_call_operand.vmem [shape: bf16[2,9,8,384], index: 1, kind: input, shape index: {}]   ;;  %s2642_s2 = inlined_call_operand.vmem [shape: bf16[3,384,128], index: 2, kind: input, shape index: {}]   ;;  %s2643_s3 = inlined_call_operand.vmem [shape: bf16[2,64,128], index: 3, kind: output, shape index: {0}]   ;;  %s2644_s4 = inlined_call_operand.vmem [shape: f32[2,128], index: 4, kind: output, shape index: {1}]  }
   0x1 LB: > { %s2253_s16 = sadd.s32 4294967295, %s2219_s15   ;;  %p1595_p0 = scmp.ge.s32.totalorder %s2219_s15, 1  ;;  %s2219_s15 = sphi %s2247_s15, %s15_s15  }
   0x2   : > { %p170_p1 = scmp.lt.s32.totalorder %s2219_s15, 3 }
   0x4   : > { %p171_p2 = pnand %p1595_p0, %p170_p1 }
   0x5   : > { %p201_p3 = scmp.lt.s32.totalorder (!%p171_p2), %s2253_s16, 1  ;;  %p1820_p4 = scmp.ne.s32.totalorder (!%p171_p2), %s2253_s16, 0 }
   0x6   : > { %174 = sbr.rel (%p171_p2) target bundleno = 370 (0x172), region = 32 }
   0xb   : > { %v2101_v0 = vld [vmem:[%s2642_s2 + $0x138] sm:$0xff]   ;;  %v2104_v3 = vld [vmem:[%s2642_s2 + $0x130] sm:$0xff]   ;;  %s2271_s25 = scalar_select %p201_p3, %s2253_s16, 1  ;;  %v2107_v6 = vld [vmem:[%s2642_s2 + $0x128] sm:$0xff]  }
   0xc   : > { %v2102_v1 = vld [vmem:[%s2642_s2 + $0xf8] sm:$0xff]   ;;  %1863 = vmatprep.subr.bf16.mxu0 %v2101_v0  ;;  %v2105_v4 = vld [vmem:[%s2642_s2 + $0xf0] sm:$0xff]   ;;  %v2108_v7 = vld [vmem:[%s2642_s2 + $0xe8] sm:$0xff]  }
   0xd   : > { %v2103_v2 = vld [vmem:[%s2642_s2 + $0x178] sm:$0xff]   ;;  %1864 = vmatpush3.bf16.msra.mxu0 %v2102_v1  ;;  %v2106_v5 = vld [vmem:[%s2642_s2 + $0x170] sm:$0xff]   ;;  %s1831_s30 = sshll.u32 %s2271_s25, 5  ;;  %v2109_v8 = vld [vmem:[%s2642_s2 + $0x168] sm:$0xff]   ;;  %s2091_s7 = smul.u32 108, %s2271_s25 }
   0xe   : > { %2019 = vmatprep.subr.bf16.mxu1 %v2103_v2  ;;  %1865 = vmatprep.subr.bf16.mxu0 %v2104_v3  ;;  %s2289_s11 = scalar_lea.vmem %s2643_s3, %s1831_s30  ;;  %v2110_v9 = vld [vmem:[%s2642_s2 + $0x120] sm:$0xff]   ;;  %v2113_v12 = vld [vmem:[%s2642_s2 + $0x118] sm:$0xff]   ;;  %v2116_v15 = vld [vmem:[%s2642_s2 + $0x110] sm:$0xff]  }
   0xf   : > { %2020 = vmatpush3.bf16.msra.mxu1 %v2103_v2  ;;  %v2111_v10 = vld [vmem:[%s2642_s2 + $0xe0] sm:$0xff]   ;;  %v2115_v13 = vld [vmem:[%s2642_s2 + $0x158] sm:$0xff]   ;;  %v2118_v16 = vld [vmem:[%s2642_s2 + $0x150] sm:$0xff]   ;;  %s2333_s19 = scalar_lea.vmem %s2641_s1, %s2091_s7  ;;  %s2421_s29 = scalar_lea.vmem %s2640_s0, %s2091_s7 }
  0x10   : > { %2021 = vmatprep.subr.bf16.mxu1 %v2106_v5  ;;  %v2112_v11 = vld [vmem:[%s2642_s2 + $0x160] sm:$0xff]   ;;  %v2114_v14 = vld [vmem:[%s2642_s2 + $0xd8] sm:$0xff]   ;;  %v2117_v17 = vld [vmem:[%s2642_s2 + $0xd0] sm:$0xff]  }
  0x11   : > { %1866 = vmatpush3.bf16.msra.mxu0 %v2105_v4  ;;  %v2119_v18 = vld [vmem:[%s2642_s2 + $0x108] sm:$0xff]   ;;  %v2122_v21 = vld [vmem:[%s2642_s2 + $0x100] sm:$0xff]   ;;  %v2128_v27 = vld [vmem:[%s2642_s2 + $0x78] sm:$0xff]  }
  0x12   : > { %1867 = vmatprep.subr.bf16.mxu0 %v2107_v6  ;;  %v2121_v19 = vld [vmem:[%s2642_s2 + $0x148] sm:$0xff]   ;;  %v2123_v22 = vld [vmem:[%s2642_s2 + $0xc0] sm:$0xff]   ;;  %v2130_v28 = vld [vmem:[%s2642_s2 + $0x38] sm:$0xff]  }
  0x13   : > { %2022 = vmatpush3.bf16.msra.mxu1 %v2106_v5  ;;  %v2120_v20 = vld [vmem:[%s2642_s2 + $0xc8] sm:$0xff]   ;;  %v2127_v23 = vld [vmem:[%s2333_s19 + $0x4] ss:$12 sps:$4 sm:$0xff]   ;;  %v2132_v29 = vld [vmem:[%s2642_s2 + $0xb8] sm:$0xff]  }
  0x14   : > { %2023 = vmatprep.subr.bf16.mxu1 %v2109_v8  ;;  %v2124_v24 = vld [vmem:[%s2642_s2 + $0x140] sm:$0xff]   ;;  %586 = vmatprep.mubr.bf16.mxu0 %v2127_v23  ;;  %v2129_v25 = vld [vmem:[%s2333_s19 + $0x8] ss:$12 sps:$4 sm:$0xff]   ;;  %v2147_v44 = vld [vmem:[%s2333_s19 + $0x30] ss:$12 sps:$4 sm:$0xff]  }
  0x15   : > { %1868 = vmatpush3.bf16.msra.mxu0 %v2108_v7  ;;  %v2125_v26 = vld [vmem:[%s2333_s19] ss:$12 sps:$4 sm:$0xff]   ;;  %2035 = vmatprep.mubr.bf16.mxu1 %v2129_v25  ;;  %v2133_v31 = vld [vmem:[%s2642_s2 + $0x70] sm:$0xff]   ;;  %v2136_v33 = vld [vmem:[%s2333_s19 + $0x1c] ss:$12 sps:$4 sm:$0xff]  }
  0x16   : > { %1869 = vmatprep.subr.bf16.mxu0 %v2110_v9  ;;  %v2131_v30 = vld [vmem:[%s2333_s19 + $0x20] ss:$12 sps:$4 sm:$0xff]   ;;  %v2135_v32 = vld [vmem:[%s2642_s2 + $0xb0] sm:$0xff]   ;;  %v2138_v36 = vld [vmem:[%s2333_s19 + $0x18] ss:$12 sps:$4 sm:$0xff]  }
  0x17   : > { %2024 = vmatpush3.bf16.msra.mxu1 %v2109_v8  ;;  %v2134_v34 = vld [vmem:[%s2642_s2 + $0x30] sm:$0xff]   ;;  %v2139_v35 = vld [vmem:[%s2642_s2 + $0x68] sm:$0xff]   ;;  %v2142_v39 = vld [vmem:[%s2642_s2 + $0x60] sm:$0xff]  }
  0x18   : > { %2025 = vmatprep.subr.bf16.mxu1 %v2112_v11  ;;  %v2141_v37 = vld [vmem:[%s2642_s2 + $0xa8] sm:$0xff]   ;;  %v2143_v40 = vld [vmem:[%s2642_s2 + $0x20] sm:$0xff]   ;;  %v2148_v45 = vld [vmem:[%s2642_s2 + $0x58] sm:$0xff]  }
  0x19   : > { %1870 = vmatpush3.bf16.msra.mxu0 %v2111_v10  ;;  %v2140_v38 = vld [vmem:[%s2642_s2 + $0x28] sm:$0xff]   ;;  %v2145_v41 = vld [vmem:[%s2333_s19 + $0x34] ss:$12 sps:$4 sm:$0xff]   ;;  %v2149_v43 = vld [vmem:[%s2333_s19 + $0x38] ss:$12 sps:$4 sm:$0xff]  }
  0x1a   : > { %1871 = vmatprep.subr.bf16.mxu0 %v2113_v12  ;;  %v2144_v42 = vld [vmem:[%s2642_s2 + $0xa0] sm:$0xff]   ;;  %v2151_v46 = vld [vmem:[%s2333_s19 + $0x50] ss:$12 sps:$4 sm:$0xff]   ;;  %v2156_v51 = vld [vmem:[%s2333_s19 + $0x4c] ss:$12 sps:$4 sm:$0xff]  }
  0x1b   : > { %2026 = vmatpush3.bf16.msra.mxu1 %v2112_v11  ;;  %v2152_v47 = vld [vmem:[%s2642_s2 + $0x98] sm:$0xff]   ;;  %v2153_v49 = vld [vmem:[%s2642_s2 + $0x50] sm:$0xff]   ;;  %v2159_v53 = vld [vmem:[%s2642_s2 + $0x48] sm:$0xff]  }
  0x1c   : > { %2027 = vmatprep.subr.bf16.mxu1 %v2115_v13  ;;  %v2150_v48 = vld [vmem:[%s2642_s2 + $0x18] sm:$0xff]   ;;  %v2155_v50 = vld [vmem:[%s2642_s2 + $0x90] sm:$0xff]   ;;  %v2161_v55 = vld [vmem:[%s2642_s2 + $0x88] sm:$0xff]  }
  0x1d   : > { %1872 = vmatpush3.bf16.msra.mxu0 %v2114_v14  ;;  %v2154_v52 = vld [vmem:[%s2642_s2 + $0x10] sm:$0xff]   ;;  %v2160_v56 = vld [vmem:[%s2642_s2 + $0x8] sm:$0xff]   ;;  %v2162_v57 = vld [vmem:[%s2642_s2 + $0x40] sm:$0xff]  }
  0x1e   : > { %1873 = vmatprep.subr.bf16.mxu0 %v2116_v15  ;;  %v2158_v54 = vld [vmem:[%s2333_s19 + $0x48] ss:$12 sps:$4 sm:$0xff]   ;;  %v2163_v58 = vld [vmem:[%s2642_s2] sm:$0xff]   ;;  %v2437_v60 = vld [vmem:[%s2421_s29 + $0xc] sm:$0xff] }
  0x1f   : > { %2028 = vmatpush3.bf16.msra.mxu1 %v2115_v13  ;;  %v217_v59 = vld [vmem:[%s2421_s29] sm:$0xff]  ;;  %v2167_v63 = vld [vmem:[%s2642_s2 + $0x1f8] sm:$0xff]   ;;  %v2169_v0 = vld [vmem:[%s2421_s29 + $0x8] ss:$12 sps:$4 sm:$0xff]  }
  0x20   : > { %2029 = vmatprep.subr.bf16.mxu1 %v2118_v16  ;;  %v2164_v61 = vld [vmem:[%s2642_s2 + $0x80] sm:$0xff]   ;;  %v1685_v62 = vcombine.high %v217_v59, %v2437_v60  ;;  %v2168_v1 = vld [vmem:[%s2642_s2 + $0x1b8] sm:$0xff]   ;;  %v1684_v2 = vcombine.low %v217_v59, %v2437_v60  ;;  %v2172_v5 = vld [vmem:[%s2642_s2 + $0x1f0] sm:$0xff]  }
  0x21   : > { %1874 = vmatpush3.bf16.msra.mxu0 %v2117_v17  ;;  %v2170_v3 = vld [vmem:[%s2642_s2 + $0x238] sm:$0xff]   ;;  %v2171_v4 = vld [vmem:[%s2421_s29 + $0x20] ss:$12 sps:$4 sm:$0xff]   ;;  %v2174_v6 = vld [vmem:[%s2642_s2 + $0x230] sm:$0xff]  }
  0x22   : > { %1875 = vmatprep.subr.bf16.mxu0 %v2119_v18  ;;  %v2462_v7 = vld [vmem:[%s2421_s29 + $0x18] sm:$0xff]  ;;  %v2465_v8 = vld [vmem:[%s2421_s29 + $0x24] sm:$0xff]  ;;  %v2173_v9 = vld [vmem:[%s2642_s2 + $0x1b0] sm:$0xff]  }
  0x23   : > { %2030 = vmatpush3.bf16.msra.mxu1 %v2118_v16  ;;  %v1688_v10 = vcombine.high %v2462_v7, %v2465_v8  ;;  %v2177_v11 = vld [vmem:[%s2642_s2 + $0x1e8] sm:$0xff]   ;;  %v1687_v12 = vcombine.low %v2462_v7, %v2465_v8  ;;  %v2180_v15 = vld [vmem:[%s2642_s2 + $0x1e0] sm:$0xff]   ;;  %v2487_v16 = vld [vmem:[%s2421_s29 + $0x30] sm:$0xff] }
  0x24   : > { %2031 = vmatprep.subr.bf16.mxu1 %v2121_v19  ;;  %v2179_v13 = vld [vmem:[%s2642_s2 + $0x228] sm:$0xff]   ;;  %v2181_v17 = vld [vmem:[%s2642_s2 + $0x1a0] sm:$0xff]   ;;  %v2189_v25 = vld [vmem:[%s2421_s29 + $0x50] ss:$12 sps:$4 sm:$0xff]  }
  0x25   : > { %1876 = vmatpush3.bf16.msra.mxu0 %v2120_v20  ;;  %v2178_v14 = vld [vmem:[%s2642_s2 + $0x1a8] sm:$0xff]   ;;  %v2493_v18 = vld [vmem:[%s2421_s29 + $0x3c] sm:$0xff]  ;;  %v2188_v23 = vld [vmem:[%s2421_s29 + $0x38] ss:$12 sps:$4 sm:$0xff]  }
  0x26   : > { %1877 = vmatprep.subr.bf16.mxu0 %v2122_v21  ;;  %v1691_v20 = vcombine.high %v2487_v16, %v2493_v18  ;;  %v2185_v21 = vld [vmem:[%s2642_s2 + $0x1d8] sm:$0xff]  }
  0x27   : > { %2032 = vmatpush3.bf16.msra.mxu1 %v2121_v19  ;;  %v2182_v19 = vld [vmem:[%s2642_s2 + $0x220] sm:$0xff]  }
  0x28   : > { %2033 = vmatprep.subr.bf16.mxu1 %v2124_v24 }
  0x29   : > { %1878 = vmatpush3.bf16.msra.mxu0 %v2123_v22  ;;  %v2187_v22 = vld [vmem:[%s2642_s2 + $0x218] sm:$0xff]  }
  0x2a   : > { %1915 = vmatprep.subr.bf16.mxu0 %v2128_v27  ;;  %v2190_v27 = vld [vmem:[%s2642_s2 + $0x1d0] sm:$0xff]  }
  0x2b   : > { %2034 = vmatpush3.bf16.msra.mxu1 %v2124_v24  ;;  %v1690_v24 = vcombine.low %v2487_v16, %v2493_v18 }
  0x2c   : > { %587 = vmatmul.mubr.bf16.vlgmr.msra.gmra.mxu0 %v2125_v26  ;;  %2043 = vmatprep.subr.bf16.mxu1 %v2132_v29  ;;  %v2186_v26 = vld [vmem:[%s2642_s2 + $0x198] sm:$0xff]  }
  0x2d   : > { %1916 = vmatpush3.bf16.msra.mxu0 %v2130_v28  ;;  %594 = vmatprep.mubr.bf16.mxu0 %v2136_v33  ;;  %v229_v28 = vld [vmem:[%s2421_s29 + $0x48] sm:$0xff] }
  0x2e   : > { %2036 = vmatmul.mubr.bf16.vlgmr.msra.gmra.mxu1 %v2131_v30  ;;  %1917 = vmatprep.subr.bf16.mxu0 %v2133_v31  ;;  %v2192_v30 = vld [vmem:[%s2642_s2 + $0x210] sm:$0xff]   ;;  %v2195_v33 = vld [vmem:[%s2642_s2 + $0x1c8] sm:$0xff]  }
  0x2f   : > { %2044 = vmatpush3.bf16.msra.mxu1 %v2132_v29  ;;  %2039 = vmatprep.mubr.bf16.mxu1 %v2149_v43  ;;  %v231_v29 = vld [vmem:[%s2421_s29 + $0x54] sm:$0xff]  ;;  %v1788_v43 = vcombine.high %v2465_v8, %v2487_v16 }
  0x30   : > { %2045 = vmatprep.subr.bf16.mxu1 %v2135_v32  ;;  %v1694_v31 = vcombine.high %v229_v28, %v231_v29 }
  0x31   : > { %1918 = vmatpush3.bf16.msra.mxu0 %v2134_v34  ;;  %v2196_v34 = vld [vmem:[%s2642_s2 + $0x188] sm:$0xff]  }
  0x32   : > { %1919 = vmatprep.subr.bf16.mxu0 %v2139_v35  ;;  %v1693_v35 = vcombine.low %v229_v28, %v231_v29 }
  0x33   : > { %2046 = vmatpush3.bf16.msra.mxu1 %v2135_v32  ;;  %v2191_v32 = vld [vmem:[%s2642_s2 + $0x190] sm:$0xff]  }
  0x34   : > { %595 = vmatmul.mubr.bf16.gmra.mxu0 %v2138_v36  ;;  %2047 = vmatprep.subr.bf16.mxu1 %v2141_v37  ;;  %v2197_v36 = vld [vmem:[%s2642_s2 + $0x208] sm:$0xff]  }
  0x35   : > { %1920 = vmatpush3.bf16.msra.mxu0 %v2140_v38  ;;  %602 = vmatprep.mubr.bf16.mxu0 %v2145_v41  ;;  %v1785_v38 = vcombine.high %v2437_v60, %v2462_v7  ;;  %v2199_v41 = vld [vmem:[%s2642_s2 + $0x180] sm:$0xff]  }
  0x36   : > { %1921 = vmatprep.subr.bf16.mxu0 %v2142_v39  ;;  %2040 = vmatmul.mubr.bf16.gmra.mxu1 %v2151_v46  ;;  %v2203_v39 = vld [vmem:[%s2421_s29 + $0x14] ss:$12 sps:$4 sm:$0xff]   ;;  %v1787_v46 = vcombine.low %v2465_v8, %v2487_v16 }
  0x37   : > { %2048 = vmatpush3.bf16.msra.mxu1 %v2141_v37  ;;  %2059 = vmatprep.mubr.bf16.mxu1 %v2169_v0  ;;  %v2198_v37 = vld [vmem:[%s2642_s2 + $0x1c0] sm:$0xff]  }
  0x38   : > { %2049 = vmatprep.subr.bf16.mxu1 %v2144_v42 }
  0x39   : > { %1922 = vmatpush3.bf16.msra.mxu0 %v2143_v40  ;;  %v2200_v40 = vld [vmem:[%s2642_s2 + $0x200] sm:$0xff]  }
  0x3a   : > { %1923 = vmatprep.subr.bf16.mxu0 %v2148_v45  ;;  %v2209_v45 = vld [vmem:[%s2421_s29 + $0x44] ss:$12 sps:$4 sm:$0xff]  }
  0x3b   : > { %2050 = vmatpush3.bf16.msra.mxu1 %v2144_v42  ;;  %v1784_v42 = vcombine.low %v2437_v60, %v2462_v7 }
  0x3c   : > { %603 = vmatmul.mubr.bf16.gmra.mxu0 %v2147_v44  ;;  %2051 = vmatprep.subr.bf16.mxu1 %v2152_v47  ;;  %v2204_v44 = vld [vmem:[%s2421_s29 + $0x2c] ss:$12 sps:$4 sm:$0xff]  }
  0x3d   : > { %1924 = vmatpush3.bf16.msra.mxu0 %v2150_v48  ;;  %610 = vmatprep.mubr.bf16.mxu0 %v2156_v51  ;;  %v2210_v48 = vld [vmem:[%s2421_s29 + $0x5c] ss:$12 sps:$4 sm:$0xff]  }
  0x3e   : > { %1925 = vmatprep.subr.bf16.mxu0 %v2153_v49  ;;  %v1734_v49 = vld [vmem:[%s2421_s29 + $0x60] sm:$0xff] }
  0x3f   : > { %2052 = vmatpush3.bf16.msra.mxu1 %v2152_v47  ;;  %v1791_v47 = vcombine.high %v2493_v18, %v229_v28  ;;  %v1794_v51 = vcombine.high %v231_v29, %v1734_v49 }
  0x40   : > { %2053 = vmatprep.subr.bf16.mxu1 %v2155_v50 }
  0x41   : > { %1926 = vmatpush3.bf16.msra.mxu0 %v2154_v52  ;;  %v1793_v52 = vcombine.low %v231_v29, %v1734_v49 }
  0x42   : > { %1927 = vmatprep.subr.bf16.mxu0 %v2159_v53 }
  0x43   : > { %2054 = vmatpush3.bf16.msra.mxu1 %v2155_v50  ;;  %v1790_v50 = vcombine.low %v2493_v18, %v229_v28 }
  0x44   : > { %611 = vmatmul.mubr.bf16.gmra.mxu0 %v2158_v54  ;;  %2055 = vmatprep.subr.bf16.mxu1 %v2161_v55 }
  0x45   : > { %1928 = vmatpush3.bf16.msra.mxu0 %v2160_v56  ;;  %924 = vmatprep.mubr.bf16.mxu0 %v1685_v62 }
  0x46   : > { %1929 = vmatprep.subr.bf16.mxu0 %v2162_v57 }
  0x47   : > { %2056 = vmatpush3.bf16.msra.mxu1 %v2161_v55 }
  0x48   : > { %2057 = vmatprep.subr.bf16.mxu1 %v2164_v61 }
  0x49   : > { %1930 = vmatpush3.bf16.msra.mxu0 %v2163_v58 }
  0x4a   : > { %1967 = vmatprep.subr.bf16.mxu0 %v2167_v63 }
  0x4b   : > { %2058 = vmatpush3.bf16.msra.mxu1 %v2164_v61 }
  0x4c   : > { %925 = vmatmul.mubr.bf16.vlgmr.msra.gmra.mxu0 %v1684_v2  ;;  %2067 = vmatprep.subr.bf16.mxu1 %v2170_v3 }
  0x4d   : > { %1968 = vmatpush3.bf16.msra.mxu0 %v2168_v1  ;;  %932 = vmatprep.mubr.bf16.mxu0 %v1688_v10 }
  0x4e   : > { %2060 = vmatmul.mubr.bf16.vlgmr.msra.gmra.mxu1 %v2171_v4  ;;  %1969 = vmatprep.subr.bf16.mxu0 %v2172_v5 }
  0x4f   : > { %2068 = vmatpush3.bf16.msra.mxu1 %v2170_v3  ;;  %2063 = vmatprep.mubr.bf16.mxu1 %v2188_v23 }
  0x50   : > { %2069 = vmatprep.subr.bf16.mxu1 %v2174_v6 }
  0x51   : > { %1970 = vmatpush3.bf16.msra.mxu0 %v2173_v9 }
  0x52   : > { %1971 = vmatprep.subr.bf16.mxu0 %v2177_v11 }
  0x53   : > { %2070 = vmatpush3.bf16.msra.mxu1 %v2174_v6 }
  0x54   : > { %933 = vmatmul.mubr.bf16.gmra.mxu0 %v1687_v12  ;;  %2071 = vmatprep.subr.bf16.mxu1 %v2179_v13 }
  0x55   : > { %1972 = vmatpush3.bf16.msra.mxu0 %v2178_v14  ;;  %940 = vmatprep.mubr.bf16.mxu0 %v1691_v20 }
  0x56   : > { %1973 = vmatprep.subr.bf16.mxu0 %v2180_v15  ;;  %2064 = vmatmul.mubr.bf16.gmra.mxu1 %v2189_v25 }
  0x57   : > { %2072 = vmatpush3.bf16.msra.mxu1 %v2179_v13  ;;  %2083 = vmatprep.mubr.bf16.mxu1 %v2203_v39 }
  0x58   : > { %2073 = vmatprep.subr.bf16.mxu1 %v2182_v19 }
  0x59   : > { %1974 = vmatpush3.bf16.msra.mxu0 %v2181_v17 }
  0x5a   : > { %1975 = vmatprep.subr.bf16.mxu0 %v2185_v21 }
  0x5b   : > { %2074 = vmatpush3.bf16.msra.mxu1 %v2182_v19 }
  0x5c   : > { %941 = vmatmul.mubr.bf16.gmra.mxu0 %v1690_v24  ;;  %2075 = vmatprep.subr.bf16.mxu1 %v2187_v22 }
  0x5d   : > { %1976 = vmatpush3.bf16.msra.mxu0 %v2186_v26  ;;  %948 = vmatprep.mubr.bf16.mxu0 %v1694_v31 }
  0x5e   : > { %1977 = vmatprep.subr.bf16.mxu0 %v2190_v27 }
  0x5f   : > { %2076 = vmatpush3.bf16.msra.mxu1 %v2187_v22 }
  0x60   : > { %2077 = vmatprep.subr.bf16.mxu1 %v2192_v30 }
  0x61   : > { %1978 = vmatpush3.bf16.msra.mxu0 %v2191_v32 }
  0x62   : > { %1979 = vmatprep.subr.bf16.mxu0 %v2195_v33 }
  0x63   : > { %2078 = vmatpush3.bf16.msra.mxu1 %v2192_v30 }
  0x64   : > { %949 = vmatmul.mubr.bf16.gmra.mxu0 %v1693_v35  ;;  %2079 = vmatprep.subr.bf16.mxu1 %v2197_v36 }
  0x65   : > { %1980 = vmatpush3.bf16.msra.mxu0 %v2196_v34  ;;  %1328 = vmatprep.mubr.bf16.mxu0 %v1785_v38 }
  0x66   : > { %1981 = vmatprep.subr.bf16.mxu0 %v2198_v37 }
  0x67   : > { %2080 = vmatpush3.bf16.msra.mxu1 %v2197_v36 }
  0x68   : > { %2081 = vmatprep.subr.bf16.mxu1 %v2200_v40 }
  0x69   : > { %1982 = vmatpush3.bf16.msra.mxu0 %v2199_v41 }
  0x6b   : > { %2082 = vmatpush3.bf16.msra.mxu1 %v2200_v40 }
  0x6c   : > { %1329 = vmatmul.mubr.bf16.vlgmr.msra.gmra.mxu0 %v1784_v42 }
  0x6d   : > { %1336 = vmatprep.mubr.bf16.mxu0 %v1788_v43 }
  0x6e   : > { %2084 = vmatmul.mubr.bf16.vlgmr.msra.gmra.mxu1 %v2204_v44 }
  0x6f   : > { %2087 = vmatprep.mubr.bf16.mxu1 %v2209_v45 }
  0x74   : > { %1337 = vmatmul.mubr.bf16.gmra.mxu0 %v1787_v46 }
  0x75   : > { %1344 = vmatprep.mubr.bf16.mxu0 %v1791_v47 }
  0x76   : > { %2088 = vmatmul.mubr.bf16.gmra.mxu1 %v2210_v48 }
  0x7c   : > { %1345 = vmatmul.mubr.bf16.gmra.mxu0 %v1790_v50 }
  0x7d   : > { %1352 = vmatprep.mubr.bf16.mxu0 %v1794_v51 }
  0x84   : > { %1353 = vmatmul.mubr.bf16.gmra.mxu0 %v1793_v52 }
  0xec   : > { %v1879_v53 = vpop.f32.mrf.mxu0 }
  0xee   : > { %v1880_v54 = vpop.f32.mrf.mxu0  ;;  %v2557_v60 = vpop.f32.mrf.mxu1 }
  0xef   : > { %v1881_v55 = vadd.f32 %v1880_v54, %v1879_v53 }
  0xf0   : > { %v1882_v56 = vpop.f32.mrf.mxu0  ;;  %v653_v0 = vpop.f32.mrf.mxu1 }
  0xf1   : > { %v654_v44 = vadd.f32 %v1881_v55, %v653_v0 }
  0xf2   : > { %v1883_v57 = vpop.f32.mrf.mxu0  ;;  %v2563_v4 = vpop.f32.mrf.mxu1 }
  0xf3   : > { %v1884_v58 = vadd.f32 %v1883_v57, %v1882_v56 }
  0xf4   : > { %v1885_v59 = vpop.f32.mrf.mxu0  ;;  %v656_v8 = vpop.f32.mrf.mxu1 }
  0xf5   : > { %v657_v51 = vadd.f32 %v1884_v58, %v656_v8 }
  0xf6   : > { %v1886_v61 = vpop.f32.mrf.mxu0  ;;  %v2569_v11 = vpop.f32.mrf.mxu1 }
  0xf7   : > { %v2559_v62 = vadd.f32 %v1886_v61, %v1885_v59 }
  0xf8   : > { %v1888_v63 = vpop.f32.mrf.mxu0  ;;  %v2573_v15 = vpop.f32.mrf.mxu1 }
  0xf9   : > { %v662_v55 = vadd.f32 %v2557_v60, %v2559_v62 }
  0xfa   : > { %v1889_v1 = vpop.f32.mrf.mxu0  ;;  %v2579_v18 = vpop.f32.mrf.mxu1 }
  0xfb   : > { %v2561_v2 = vadd.f32 %v1889_v1, %v1888_v63 }
  0xfc   : > { %v1891_v3 = vpop.f32.mrf.mxu0  ;;  %v2581_v21 = vpop.f32.mrf.mxu1 }
  0xfe   : > { %v1892_v5 = vpop.f32.mrf.mxu0 }
  0xff   : > { %v2565_v6 = vadd.f32 %v1892_v5, %v1891_v3 }
 0x100   : > { %v1894_v7 = vpop.f32.mrf.mxu0 }
 0x102   : > { %v1895_v9 = vpop.f32.mrf.mxu0 }
 0x103   : > { %v2567_v10 = vadd.f32 %v1895_v9, %v1894_v7 }
 0x104   : > { %v1897_v12 = vpop.f32.mrf.mxu0 }
 0x106   : > { %v1898_v13 = vpop.f32.mrf.mxu0 }
 0x107   : > { %v2571_v14 = vadd.f32 %v1898_v13, %v1897_v12 }
 0x108   : > { %v2575_v16 = vpop.f32.mrf.mxu0 }
 0x10a   : > { %v2577_v17 = vpop.f32.mrf.mxu0 }
 0x10c   : > { %v1931_v19 = vpop.f32.mrf.mxu0 }
 0x10e   : > { %v1932_v20 = vpop.f32.mrf.mxu0  ;;  %v2061_v23 = vpop.f32.mrf.mxu1 }
 0x10f   : > { %v1933_v42 = vadd.f32 %v1932_v20, %v1931_v19  ;;  %v665_v20 = vadd.f32 %v2563_v4, %v2561_v2 }
 0x110   : > { %v1934_v22 = vpop.f32.mrf.mxu0  ;;  %v991_v26 = vpop.f32.mrf.mxu1 }
 0x111   : > { %v927_v48 = vadd.f32 %v1933_v42, %v654_v44 }
 0x112   : > { %v1935_v24 = vpop.f32.mrf.mxu0  ;;  %v2062_v29 = vpop.f32.mrf.mxu1 }
 0x113   : > { %v1936_v47 = vadd.f32 %v1935_v24, %v1934_v22  ;;  %v992_v56 = vadd.f32 %v991_v26, %v927_v48 }
 0x114   : > { %v1937_v25 = vpop.f32.mrf.mxu0  ;;  %v994_v32 = vpop.f32.mrf.mxu1 }
 0x115   : > { %v930_v59 = vadd.f32 %v1936_v47, %v657_v51 }
 0x116   : > { %v1938_v27 = vpop.f32.mrf.mxu0  ;;  %v2583_v35 = vpop.f32.mrf.mxu1 }
 0x117   : > { %v1939_v57 = vadd.f32 %v1938_v27, %v1937_v25  ;;  %v995_v12 = vadd.f32 %v994_v32, %v930_v59  ;;  %v670_v32 = vadd.f32 %v2565_v6, %v2573_v15 }
 0x118   : > { %v1940_v28 = vpop.f32.mrf.mxu0  ;;  %v1007_v37 = vpop.f32.mrf.mxu1 }
 0x119   : > { %v935_v9 = vadd.f32 %v1939_v57, %v662_v55 }
 0x11a   : > { %v1941_v30 = vpop.f32.mrf.mxu0  ;;  %v2585_v40 = vpop.f32.mrf.mxu1 }
 0x11b   : > { %v1942_v58 = vadd.f32 %v1941_v30, %v1940_v28  ;;  %v1000_v26 = vadd.f32 %v2061_v23, %v935_v9  ;;  %v673_v23 = vadd.f32 %v2567_v10, %v2581_v21 }
 0x11c   : > { %v1943_v31 = vpop.f32.mrf.mxu0  ;;  %v2591_v45 = vpop.f32.mrf.mxu1 }
 0x11d   : > { %v938_v60 = vadd.f32 %v1942_v58, %v665_v20 }
 0x11e   : > { %v1944_v33 = vpop.f32.mrf.mxu0 }
 0x11f   : > { %v1945_v62 = vadd.f32 %v1944_v33, %v1943_v31  ;;  %v1003_v47 = vadd.f32 %v2062_v29, %v938_v60  ;;  %v678_v29 = vadd.f32 %v2569_v11, %v2571_v14 }
 0x120   : > { %v1946_v34 = vpop.f32.mrf.mxu0 }
 0x122   : > { %v1947_v36 = vpop.f32.mrf.mxu0 }
 0x123   : > { %v1948_v48 = vadd.f32 %v1947_v36, %v1946_v34  ;;  %v1902_v34 = vadd.f32 %v2577_v17, %v2575_v16 }
 0x124   : > { %v1949_v38 = vpop.f32.mrf.mxu0 }
 0x126   : > { %v1950_v39 = vpop.f32.mrf.mxu0 }
 0x128   : > { %v2587_v41 = vpop.f32.mrf.mxu0 }
 0x12a   : > { %v2589_v43 = vpop.f32.mrf.mxu0 }
 0x12b   : > { %v1954_v21 = vadd.f32 %v2589_v43, %v2587_v41 }
 0x12c   : > { %v1983_v46 = vpop.f32.mrf.mxu0 }
 0x12e   : > { %v1984_v49 = vpop.f32.mrf.mxu0  ;;  %v2085_v50 = vpop.f32.mrf.mxu1 }
 0x12f   : > { %v1985_v52 = vadd.f32 %v1984_v49, %v1983_v46  ;;  %v943_v49 = vadd.f32 %v1945_v62, %v670_v32 }
 0x130   : > { %v1986_v53 = vpop.f32.mrf.mxu0  ;;  %v1395_v54 = vpop.f32.mrf.mxu1 }
 0x131   : > { %v1396_v61 = vadd.f32 %v1985_v52, %v1395_v54  ;;  %v946_v54 = vadd.f32 %v1948_v48, %v673_v23 }
 0x132   : > { %v1987_v63 = vpop.f32.mrf.mxu0  ;;  %v2086_v1 = vpop.f32.mrf.mxu1 }
 0x133   : > { %v2595_v0 = vadd.f32 %v1396_v61, %v992_v56  ;;  %v1988_v3 = vadd.f32 %v1987_v63, %v1986_v53  ;;  %v1951_v53 = vadd.f32 %v1950_v39, %v1949_v38  ;;  %v1011_v10 = vadd.f32 %v2591_v45, %v946_v54 }
 0x134   : > { %v1989_v5 = vpop.f32.mrf.mxu0  ;;  %v1398_v7 = vpop.f32.mrf.mxu1  ;;  %v681_v39 = vadd.f32 %v2579_v18, %v1902_v34 }
 0x135   : > { %v1399_v8 = vadd.f32 %v1988_v3, %v1398_v7  ;;  %v951_v61 = vadd.f32 %v1951_v53, %v678_v29 }
 0x136   : > { %v1990_v13 = vpop.f32.mrf.mxu0  ;;  %v2089_v19 = vpop.f32.mrf.mxu1  ;;  %v954_v14 = vadd.f32 %v1954_v21, %v681_v39 }
 0x137   : > { %v2599_v22 = vadd.f32 %v1399_v8, %v995_v12  ;;  %v1991_v24 = vadd.f32 %v1990_v13, %v1989_v5  ;;  %v1016_v11 = vadd.f32 %v2583_v35, %v951_v61 }
 0x138   : > { %v1992_v25 = vpop.f32.mrf.mxu0  ;;  %v1411_v44 = vpop.f32.mrf.mxu1  ;;  %v1019_v7 = vadd.f32 %v2585_v40, %v954_v14 }
 0x139   : > { %v1404_v27 = vadd.f32 %v2085_v50, %v1991_v24  ;;  %v1008_v50 = vadd.f32 %v1007_v37, %v943_v49 }
 0x13a   : > { %v1993_v42 = vpop.f32.mrf.mxu0  ;;  %v2090_v51 = vpop.f32.mrf.mxu1 }
 0x13b   : > { %v1428_v28 = vadd.f32 %v1404_v27, %v1000_v26  ;;  %v1994_v30 = vadd.f32 %v1993_v42, %v1992_v25 }
 0x13c   : > { %v1995_v46 = vpop.f32.mrf.mxu0  ;;  %v1414_v15 = vpop.f32.mrf.mxu1 }
 0x13d   : > { %v1407_v2 = vadd.f32 %v2086_v1, %v1994_v30 }
 0x13e   : > { %v1996_v4 = vpop.f32.mrf.mxu0 }
 0x13f   : > { %v1429_v52 = vadd.f32 %v1407_v2, %v1003_v47  ;;  %v1997_v31 = vadd.f32 %v1996_v4, %v1995_v46 }
 0x140   : > { %v1998_v33 = vpop.f32.mrf.mxu0 }
 0x141   : > { %v1412_v56 = vadd.f32 %v1997_v31, %v1411_v44 }
 0x142   : > { %v1999_v6 = vpop.f32.mrf.mxu0 }
 0x143   : > { %v1430_v36 = vadd.f32 %v1412_v56, %v1008_v50  ;;  %v2000_v57 = vadd.f32 %v1999_v6, %v1998_v33 }
 0x144   : > { %v2001_v59 = vpop.f32.mrf.mxu0 }
 0x145   : > { %v1415_v37 = vadd.f32 %v2000_v57, %v1414_v15 }
 0x146   : > { %v2002_v38 = vpop.f32.mrf.mxu0 }
 0x147   : > { %v1431_v63 = vadd.f32 %v1415_v37, %v1011_v10  ;;  %v2003_v1 = vadd.f32 %v2002_v38, %v2001_v59 }
 0x148   : > { %v2004_v55 = vpop.f32.mrf.mxu0 }
 0x149   : > { %v1420_v16 = vadd.f32 %v2089_v19, %v2003_v1 }
 0x14a   : > { %v2005_v17 = vpop.f32.mrf.mxu0 }
 0x14b   : > { %v1432_v3 = vadd.f32 %v1420_v16, %v1016_v11  ;;  %v2006_v5 = vadd.f32 %v2005_v17, %v2004_v55  ;;  %1437 = sbr.rel (%p1820_p4) target bundleno = 338 (0x152), region = 36 }
 0x14d   : > { %v1423_v45 = vadd.f32 %v2090_v51, %v2006_v5 }
 0x14f   : > { %v1433_v9 = vadd.f32 %v1423_v45, %v1019_v7 }
 0x150   : > { %v2221_v41 = vmov 0.0  }
 0x151   : > { %1438 = vst [vmem:[%s2644_s4] sm:$0x3] %v2221_v41 }
 0x152 PF: > { %v1439_v18 = vadd.f32 %v2599_v22, %v2595_v0  ;;  %v1452_v35 = vmul.f32 %v2595_v0, %v2595_v0  ;;  %v1453_v40 = vmul.f32 %v2599_v22, %v2599_v22  ;;  %v1454_v43 = vmul.f32 %v1428_v28, %v1428_v28 }
 0x153   : > { %v1455_v58 = vmul.f32 %v1429_v52, %v1429_v52  ;;  %v1843_v13 = vpack.c.bf16 %v2599_v22, %v2595_v0  ;;  %v1848_v19 = vpack.c.bf16 %v1429_v52, %v1428_v28  ;;  %v1853_v20 = vpack.c.bf16 %v1431_v63, %v1430_v36 }
 0x154   : > { %v1440_v12 = vadd.f32 %v1439_v18, %v1428_v28  ;;  %v1460_v8 = vadd.f32 %v1453_v40, %v1452_v35  ;;  %v1858_v24 = vpack.c.bf16 %v1433_v9, %v1432_v3  ;;  %v1456_v26 = vmul.f32 %v1430_v36, %v1430_v36 }
 0x155   : > { %1844 = vst [vmem:[%s2289_s11] sm:$0xff] %v1843_v13   ;;  %1860 = vst [vmem:[%s2289_s11 + $0x8] sm:$0xff] %v1848_v19   ;;  %v1457_v27 = vmul.f32 %v1431_v63, %v1431_v63  ;;  %v1458_v32 = vmul.f32 %v1432_v3, %v1432_v3  ;;  %v1459_v47 = vmul.f32 %v1433_v9, %v1433_v9  ;;  %vm1474_vm0 = vcmask 1040384  }
 0x156   : > { %v1441_v25 = vadd.f32 %v1440_v12, %v1429_v52  ;;  %v1461_v60 = vadd.f32 %v1460_v8, %v1454_v43  ;;  %1861 = vst [vmem:[%s2289_s11 + $0x10] sm:$0xff] %v1853_v20   ;;  %1862 = vst [vmem:[%s2289_s11 + $0x18] sm:$0xff] %v1858_v24  }
 0x158   : > { %v1442_v62 = vadd.f32 %v1441_v25, %v1430_v36  ;;  %v1462_v42 = vadd.f32 %v1461_v60, %v1455_v58  ;;  %v1473_v6 = vld [vmem:[%s2644_s4] sm:$0x3] }
 0x15a   : > { %v1443_v44 = vadd.f32 %v1442_v62, %v1431_v63  ;;  %v1463_v30 = vadd.f32 %v1462_v42, %v1456_v26 }
 0x15c   : > { %v1444_v46 = vadd.f32 %v1443_v44, %v1432_v3  ;;  %v1464_v48 = vadd.f32 %v1463_v30, %v1457_v27 }
 0x15e   : > { %v1445_v0 = vadd.f32 %v1444_v46, %v1433_v9  ;;  %v1465_v22 = vadd.f32 %v1464_v48, %v1458_v32 }
 0x160   : > { %v1446_v28 = vrot.slane %v1445_v0, 4  ;;  %v1466_v49 = vadd.f32 %v1465_v22, %v1459_v47 }
 0x162   : > { %v1447_v2 = vadd.f32 %v1446_v28, %v1445_v0  ;;  %v1467_v4 = vrot.slane %v1466_v49, 4 }
 0x164   : > { %v1448_v51 = vrot.slane %v1447_v2, 2  ;;  %v1468_v23 = vadd.f32 %v1467_v4, %v1466_v49 }
 0x166   : > { %v1449_v52 = vadd.f32 %v1448_v51, %v1447_v2  ;;  %v1469_v31 = vrot.slane %v1468_v23, 2 }
 0x168   : > { %v1450_v33 = vrot.slane %v1449_v52, 1  ;;  %v1470_v50 = vadd.f32 %v1469_v31, %v1468_v23 }
 0x16a   : > { %v1451_v53 = vadd.f32 %v1450_v33, %v1449_v52  ;;  %v1471_v54 = vrot.slane %v1470_v50, 1 }
 0x16c   : > { %v1472_v56 = vadd.f32 %v1471_v54, %v1470_v50 }
 0x16e   : > { %v1475_v15 = vsel %vm1474_vm0, %v1451_v53, %v1472_v56 }
 0x16f   : > { %v1476_v29 = vadd.f32 %v1475_v15, %v1473_v6 }
 0x171   : > { %1477 = vst [vmem:[%s2644_s4] sm:$0x3] %v1476_v29 }
 0x172 PF: > { %s15_s15 = sadd.s32 1, %s2219_s15  }
 0x173   : > { %p12_p5 = scmp.ge.s32.totalorder %s15_s15, 4  }
 0x175   :  { %14 = sbr.rel (!%p12_p5) target bundleno = 1 (0x1), region = 80 }

</bundles_post_ra>
